<compile_context>
chip_gen: v6e
topology: v6e:2x2x1
jax: 0.10.0
libtpu: 0.0.40
codegen_flags: <defaults>
</compile_context>

<pallas_src>
import jax
import jax.numpy as jnp
from jax.experimental import pallas as pl
from jax.experimental.pallas import tpu as pltpu


# ----------------------------------------------------------------------------
# Fused Inception kernel (one grid step == one TH-row tile of one image)
# ----------------------------------------------------------------------------
def _inception_kernel(x_ref, wred_ref, bred_ref, w1_ref, w3_ref, w5_ref,
                      wp_ref, bout_ref, o_ref):
    """All four Inception branches for one row tile.

    x_ref   : (1, Hp, Wp, Cin)      bf16, full image zero-padded by 2 each side
    wred_ref: (Cin, Cr)             bf16, [3x3-reduce | 5x5-reduce] 1x1 weights
    bred_ref: (1, Cr)               f32
    w1_ref  : (Cin, Ctot)           bf16, branch1 1x1, zero-padded on Cout
    w3_ref  : (9*ch3red, Ctot)      bf16, branch2 3x3 im2col weights, Cout-padded
    w5_ref  : (25*ch5red, Ctot)     bf16, branch3 5x5 im2col weights, Cout-padded
    wp_ref  : (Cin, Ctot)           bf16, branch4 pool-proj 1x1, Cout-padded
    bout_ref: (1, Ctot)             f32, concatenated per-branch biases
    o_ref   : (1, TH, W, Ctot)      f32, channel-concatenated output row tile
    """
    _, Hp, Wp, Cin = x_ref.shape
    _, TH, W, Ctot = o_ref.shape
    Cr = wred_ref.shape[1]
    cr3 = w3_ref.shape[0] // 9
    cr5 = w5_ref.shape[0] // 25
    pad = 2                       # 5x5 halo; the 3x3/pool use radius 1
    H = Hp - 2 * pad
    TH4 = TH + 2 * pad            # halo'd tile rows

    rt = pl.program_id(1)
    r0 = pl.multiple_of(rt * TH, TH)          # top of halo'd tile (padded coords)

    xt = x_ref[0, pl.ds(r0, TH4), :, :]       # (TH4, Wp, Cin) bf16

    # Validity mask of real (non zero-padded) pixels inside the halo'd tile.
    li = jax.lax.broadcasted_iota(jnp.int32, (TH4, Wp, 1), 0) + r0
    ci = jax.lax.broadcasted_iota(jnp.int32, (TH4, Wp, 1), 1)
    valid = (li >= pad) & (li < pad + H) & (ci >= pad) & (ci < pad + W)

    # ---- fused 1x1 "reduce" convs for branch2 + branch3 (one MXU matmul) ----
    yr = jnp.dot(xt.reshape(TH4 * Wp, Cin), wred_ref[...],
                 preferred_element_type=jnp.float32)
    yr = jnp.maximum(yr + bred_ref[...], 0.0).reshape(TH4, Wp, Cr)
    # Zero the padded ring (acts as the conv zero-padding of the reduce
    # activation) and cast to bf16 exactly once.
    yr = jnp.where(valid, yr, 0.0).astype(jnp.bfloat16)
    yr3 = yr[:, :, :cr3]          # un-padded Cin slice for the 3x3 branch
    yr5 = yr[:, :, cr3:]          # un-padded Cin slice for the 5x5 branch

    # ---- single wide accumulator = channel-concatenated output --------------
    acc = jnp.broadcast_to(bout_ref[...], (TH * W, Ctot))   # bias pre-loaded

    # branch1: 1x1 conv on the tile's valid center
    xc = xt[pad:pad + TH, pad:pad + W, :].reshape(TH * W, Cin)
    acc = acc + jnp.dot(xc, w1_ref[...], preferred_element_type=jnp.float32)

    # branch2: 3x3 conv (pad=1) as ONE matmul; taps folded into K via im2col
    p3 = jnp.concatenate(
        [yr3[1 + kh:1 + kh + TH, 1 + kw:1 + kw + W, :]
         for kh in range(3) for kw in range(3)], axis=-1)
    acc = acc + jnp.dot(p3.reshape(TH * W, 9 * cr3), w3_ref[...],
                        preferred_element_type=jnp.float32)

    # branch3: 5x5 conv (pad=2) as ONE matmul; K = 25 * ch5red
    p5 = jnp.concatenate(
        [yr5[kh:kh + TH, kw:kw + W, :]
         for kh in range(5) for kw in range(5)], axis=-1)
    acc = acc + jnp.dot(p5.reshape(TH * W, 25 * cr5), w5_ref[...],
                        preferred_element_type=jnp.float32)

    # branch4: 3x3/s1/p1 max-pool on x (border masked to -inf), then 1x1 proj.
    # The window center is always a real pixel, so -inf never reaches the MXU.
    xm = jnp.where(valid, xt, -jnp.inf)
    pooled = xm[1:1 + TH, 1:1 + W, :]
    for kh in range(3):
        for kw in range(3):
            if kh == 0 and kw == 0:
                continue
            pooled = jnp.maximum(pooled, xm[1 + kh:1 + kh + TH,
                                            1 + kw:1 + kw + W, :])
    acc = acc + jnp.dot(pooled.reshape(TH * W, Cin), wp_ref[...],
                        preferred_element_type=jnp.float32)

    # bias already in acc; fused ReLU; one store of all branches for this tile
    o_ref[...] = jnp.maximum(acc, 0.0).reshape(1, TH, W, Ctot).astype(o_ref.dtype)


def _pick_row_tile(H, W):
    """Smallest divisor of H giving >= 128 matmul rows per tile (else whole H)."""
    for th in range(1, H + 1):
        if H % th == 0 and th * W >= 128:
            return th
    return H


# ----------------------------------------------------------------------------
# Wrapper: weight packing + pallas_call
# ----------------------------------------------------------------------------
@jax.jit
def inception_forward(x_nchw, params):
    x = jnp.transpose(x_nchw, (0, 2, 3, 1)).astype(jnp.float32)   # NHWC
    N, H, W, Cin = x.shape

    w1, b1 = params["b1"]
    w2r, b2r = params["b2_r"]
    w3, b3 = params["b2"]
    w3r, b3r = params["b3_r"]
    w5, b5 = params["b3"]
    wp, bp = params["b4"]
    ch1, ch3red, ch3 = w1.shape[-1], w2r.shape[-1], w3.shape[-1]
    ch5red, ch5, chp = w3r.shape[-1], w5.shape[-1], wp.shape[-1]
    Cr = ch3red + ch5red
    Ctot = ch1 + ch3 + ch5 + chp

    bf = lambda a: a.astype(jnp.bfloat16)
    # Reduce 1x1s fused along Cout (one matmul feeds both branches).
    w_red = bf(jnp.concatenate([w2r.reshape(Cin, ch3red),
                                w3r.reshape(Cin, ch5red)], axis=1))
    b_red = jnp.concatenate([b2r, b3r]).reshape(1, Cr).astype(jnp.float32)
    # Final weights: im2col layout for 3x3/5x5 (taps folded into K, Cin
    # UN-padded) and Cout zero-padded into each branch's slot of the
    # concatenated output channel axis.
    w1_w = bf(jnp.pad(w1.reshape(Cin, ch1), ((0, 0), (0, Ctot - ch1))))
    w3_w = bf(jnp.pad(w3.reshape(9 * ch3red, ch3),
                      ((0, 0), (ch1, Ctot - ch1 - ch3))))
    w5_w = bf(jnp.pad(w5.reshape(25 * ch5red, ch5),
                      ((0, 0), (ch1 + ch3, Ctot - ch1 - ch3 - ch5))))
    wp_w = bf(jnp.pad(wp.reshape(Cin, chp), ((0, 0), (Ctot - chp, 0))))
    b_out = jnp.concatenate([b1, b3, b5, bp]).reshape(1, Ctot).astype(jnp.float32)

    # Single zero-pad of the input (5x5 halo), cast to bf16 once (half the DMA
    # bytes). Conv/pool padding of intermediates is handled in-kernel by masks.
    pad = 2
    xp = bf(jnp.pad(x, ((0, 0), (pad, pad), (pad, pad), (0, 0))))
    Hp, Wp = H + 2 * pad, W + 2 * pad

    TH = _pick_row_tile(H, W)        # row tile of the output
    num_rt = H // TH
    TH4 = TH + 2 * pad

    flops = 2 * N * num_rt * (
        TH4 * Wp * Cin * Cr
        + TH * W * (Cin * Ctot              # branch1 1x1
                    + 9 * ch3red * Ctot     # branch2 3x3 (im2col)
                    + 25 * ch5red * Ctot    # branch3 5x5 (im2col)
                    + Cin * Ctot))          # branch4 proj
    bytes_accessed = (xp.size * 2 + N * H * W * Ctot * 4
                      + 2 * (w_red.size + w1_w.size + w3_w.size
                             + w5_w.size + wp_w.size)
                      + 4 * (b_red.size + b_out.size))

    out_nhwc = pl.pallas_call(
        _inception_kernel,
        out_shape=jax.ShapeDtypeStruct((N, H, W, Ctot), jnp.float32),
        grid=(N, num_rt),
        in_specs=[
            # x block is rt-invariant -> DMA'd once per image, reused per tile
            pl.BlockSpec((1, Hp, Wp, Cin), lambda n, rt: (n, 0, 0, 0)),
            pl.BlockSpec((Cin, Cr), lambda n, rt: (0, 0)),
            pl.BlockSpec((1, Cr), lambda n, rt: (0, 0)),
            pl.BlockSpec((Cin, Ctot), lambda n, rt: (0, 0)),
            pl.BlockSpec((9 * ch3red, Ctot), lambda n, rt: (0, 0)),
            pl.BlockSpec((25 * ch5red, Ctot), lambda n, rt: (0, 0)),
            pl.BlockSpec((Cin, Ctot), lambda n, rt: (0, 0)),
            pl.BlockSpec((1, Ctot), lambda n, rt: (0, 0)),
        ],
        out_specs=pl.BlockSpec((1, TH, W, Ctot), lambda n, rt: (n, rt, 0, 0)),
        compiler_params=pltpu.CompilerParams(
            dimension_semantics=("parallel", "parallel"),
            vmem_limit_bytes=32 * 1024 * 1024),
        cost_estimate=pl.CostEstimate(flops=flops, transcendentals=0,
                                      bytes_accessed=bytes_accessed),
    )(xp, w_red, b_red, w1_w, w3_w, w5_w, wp_w, b_out)

    return jnp.transpose(out_nhwc, (0, 3, 1, 2))      # back to NCHW


# ----------------------------------------------------------------------------
# Parameter init (deterministic, PyTorch-like uniform)
# ----------------------------------------------------------------------------
def _init_conv(key, kh, kw, cin, cout):
    kw_key, kb_key = jax.random.split(key)
    bound = 1.0 / jnp.sqrt(cin * kh * kw)
    w = jax.random.uniform(kw_key, (kh, kw, cin, cout), jnp.float32,
                           -bound, bound)
    b = jax.random.uniform(kb_key, (cout,), jnp.float32, -bound, bound)
    return w, b


def init_inception_params(key, in_channels, ch1x1, ch3x3red, ch3x3,
                          ch5x5red, ch5x5, pool_proj):
    keys = jax.random.split(key, 6)
    return {
        "b1":   _init_conv(keys[0], 1, 1, in_channels, ch1x1),
        "b2_r": _init_conv(keys[1], 1, 1, in_channels, ch3x3red),
        "b2":   _init_conv(keys[2], 3, 3, ch3x3red, ch3x3),
        "b3_r": _init_conv(keys[3], 1, 1, in_channels, ch5x5red),
        "b3":   _init_conv(keys[4], 5, 5, ch5x5red, ch5x5),
        "b4":   _init_conv(keys[5], 1, 1, in_channels, pool_proj),
    }


# ----------------------------------------------------------------------------
# Pure-JAX reference (same bf16-input / f32-accumulate numerics)
# ----------------------------------------------------------------------------
def _ref_conv_relu(x_nhwc, w_hwio, bias, padding):
    y = jax.lax.conv_general_dilated(
        x_nhwc.astype(jnp.bfloat16), w_hwio.astype(jnp.bfloat16),
        window_strides=(1, 1),
        padding=[(padding, padding), (padding, padding)],
        dimension_numbers=("NHWC", "HWIO", "NHWC"),
        preferred_element_type=jnp.float32)
    return jnp.maximum(y + bias, 0.0)


def _ref_forward(x_nchw, params):
    x = jnp.transpose(x_nchw, (0, 2, 3, 1)).astype(jnp.float32)
    br1 = _ref_conv_relu(x, *params["b1"], padding=0)
    br2 = _ref_conv_relu(_ref_conv_relu(x, *params["b2_r"], padding=0),
                         *params["b2"], padding=1)
    br3 = _ref_conv_relu(_ref_conv_relu(x, *params["b3_r"], padding=0),
                         *params["b3"], padding=2)
    br4 = jax.lax.reduce_window(x, -jnp.inf, jax.lax.max,
                                (1, 3, 3, 1), (1, 1, 1, 1),
                                [(0, 0), (1, 1), (1, 1), (0, 0)])
    br4 = _ref_conv_relu(br4, *params["b4"], padding=0)
    out = jnp.concatenate([br1, br2, br3, br4], axis=-1)
    return jnp.transpose(out, (0, 3, 1, 2))


if __name__ == "__main__":
    key = jax.random.PRNGKey(0)
    k_x, k_p = jax.random.split(key)

    N, Cin, H, W = 2, 4, 16, 16
    ch1x1, ch3x3red, ch3x3, ch5x5red, ch5x5, pool_proj = 8, 4, 8, 4, 8, 8

    x = jax.random.normal(k_x, (N, Cin, H, W), jnp.float32)
    params = init_inception_params(k_p, Cin, ch1x1, ch3x3red, ch3x3,
                                   ch5x5red, ch5x5, pool_proj)

    out = jax.block_until_ready(inception_forward(x, params))

    expected_c = ch1x1 + ch3x3 + ch5x5 + pool_proj
    assert out.shape == (N, expected_c, H, W), out.shape

    ref = jax.block_until_ready(_ref_forward(x, params))
    max_err = float(jnp.max(jnp.abs(out - ref)))
    assert jnp.allclose(out, ref, atol=1e-2, rtol=1e-2), max_err

    print("KERNEL_OK")
</pallas_src>

<mosaic_0001>
module attributes {stable_mosaic.version = 11 : i64} {
  func.func @_inception_kernel(%arg0: i32, %arg1: i32, %arg2: memref<1x20x20x4xbf16, #tpu.memory_space<vmem>>, %arg3: memref<4x8xbf16, #tpu.memory_space<vmem>>, %arg4: memref<1x8xf32, #tpu.memory_space<vmem>>, %arg5: memref<4x32xbf16, #tpu.memory_space<vmem>>, %arg6: memref<36x32xbf16, #tpu.memory_space<vmem>>, %arg7: memref<100x32xbf16, #tpu.memory_space<vmem>>, %arg8: memref<4x32xbf16, #tpu.memory_space<vmem>>, %arg9: memref<1x32xf32, #tpu.memory_space<vmem>>, %arg10: memref<1x8x16x32xf32, #tpu.memory_space<vmem>>) attributes {dimension_semantics = [#tpu.dimension_semantics<parallel>, #tpu.dimension_semantics<parallel>], iteration_bounds = array<i64: 2, 2>, scalar_prefetch = 0 : i64, scratch_operands = 0 : i64, tpu.core_type = #tpu.core_type<tc>, window_params = [{transform_indices = @transform_0, window_bounds = array<i64: 1, 20, 20, 4>}, {pipeline_mode = #tpu.pipeline_mode<synchronous>, transform_indices = @transform_1, window_bounds = array<i64: 4, 8>}, {pipeline_mode = #tpu.pipeline_mode<synchronous>, transform_indices = @transform_2, window_bounds = array<i64: 1, 8>}, {pipeline_mode = #tpu.pipeline_mode<synchronous>, transform_indices = @transform_3, window_bounds = array<i64: 4, 32>}, {pipeline_mode = #tpu.pipeline_mode<synchronous>, transform_indices = @transform_4, window_bounds = array<i64: 36, 32>}, {pipeline_mode = #tpu.pipeline_mode<synchronous>, transform_indices = @transform_5, window_bounds = array<i64: 100, 32>}, {pipeline_mode = #tpu.pipeline_mode<synchronous>, transform_indices = @transform_6, window_bounds = array<i64: 4, 32>}, {pipeline_mode = #tpu.pipeline_mode<synchronous>, transform_indices = @transform_7, window_bounds = array<i64: 1, 32>}, {transform_indices = @transform_8, window_bounds = array<i64: 1, 8, 16, 32>}]} {
    %c8_i32 = arith.constant 8 : i32
    %0 = arith.muli %arg1, %c8_i32 : i32
    %1 = tpu.assume_multiple %0, 8 : i32
    %c0 = arith.constant 0 : index
    %2 = arith.index_cast %1 : i32 to index
    %c0_0 = arith.constant 0 : index
    %c0_1 = arith.constant 0 : index
    %3 = vector.load %arg2[%c0, %2, %c0_0, %c0_1] : memref<1x20x20x4xbf16, #tpu.memory_space<vmem>>, vector<1x12x20x4xbf16>
    %4 = vector.shape_cast %3 : vector<1x12x20x4xbf16> to vector<12x20x4xbf16>
    %5 = tpu.iota {dimensions = array<i32: 0>} : vector<12x20x1xi32>
    %6 = vector.broadcast %1 : i32 to vector<12x20x1xi32>
    %7 = arith.addi %5, %6 : vector<12x20x1xi32>
    %8 = tpu.iota {dimensions = array<i32: 1>} : vector<12x20x1xi32>
    %c2_i32 = arith.constant 2 : i32
    %9 = vector.broadcast %c2_i32 : i32 to vector<12x20x1xi32>
    %10 = arith.cmpi sge, %7, %9 : vector<12x20x1xi32>
    %c18_i32 = arith.constant 18 : i32
    %11 = vector.broadcast %c18_i32 : i32 to vector<12x20x1xi32>
    %12 = arith.cmpi slt, %7, %11 : vector<12x20x1xi32>
    %13 = arith.andi %10, %12 : vector<12x20x1xi1>
    %c2_i32_2 = arith.constant 2 : i32
    %14 = vector.broadcast %c2_i32_2 : i32 to vector<12x20x1xi32>
    %15 = arith.cmpi sge, %8, %14 : vector<12x20x1xi32>
    %16 = arith.andi %13, %15 : vector<12x20x1xi1>
    %c18_i32_3 = arith.constant 18 : i32
    %17 = vector.broadcast %c18_i32_3 : i32 to vector<12x20x1xi32>
    %18 = arith.cmpi slt, %8, %17 : vector<12x20x1xi32>
    %19 = arith.andi %16, %18 : vector<12x20x1xi1>
    %20 = vector.shape_cast %4 : vector<12x20x4xbf16> to vector<240x4xbf16>
    %c0_4 = arith.constant 0 : index
    %c0_5 = arith.constant 0 : index
    %21 = vector.load %arg3[%c0_4, %c0_5] : memref<4x8xbf16, #tpu.memory_space<vmem>>, vector<4x8xbf16>
    %cst = arith.constant dense<0.000000e+00> : vector<240x8xf32>
    %22 = tpu.matmul %20, %21, %cst {dimension_numbers = #tpu.dot_dimension_numbers<[1], [0], [0], [1], [0, 0, 1, 1], [], []>} : vector<240x4xbf16>, vector<4x8xbf16>, vector<240x8xf32> -> vector<240x8xf32>
    %c0_6 = arith.constant 0 : index
    %c0_7 = arith.constant 0 : index
    %23 = vector.load %arg4[%c0_6, %c0_7] : memref<1x8xf32, #tpu.memory_space<vmem>>, vector<1x8xf32>
    %24 = vector.broadcast %23 : vector<1x8xf32> to vector<240x8xf32>
    %25 = arith.addf %22, %24 : vector<240x8xf32>
    %cst_8 = arith.constant 0.000000e+00 : f32
    %26 = vector.broadcast %cst_8 : f32 to vector<240x8xf32>
    %27 = arith.maximumf %25, %26 : vector<240x8xf32>
    %28 = vector.shape_cast %27 : vector<240x8xf32> to vector<12x20x8xf32>
    %cst_9 = arith.constant 0.000000e+00 : f32
    %29 = vector.shape_cast %19 : vector<12x20x1xi1> to vector<12x20x1xi1>
    %30 = vector.broadcast %29 : vector<12x20x1xi1> to vector<12x20x8xi1>
    %31 = vector.broadcast %cst_9 : f32 to vector<12x20x8xf32>
    %32 = arith.select %30, %28, %31 : vector<12x20x8xi1>, vector<12x20x8xf32>
    %33 = arith.truncf %32 : vector<12x20x8xf32> to vector<12x20x8xbf16>
    %34 = vector.extract_strided_slice %33 {offsets = [0, 0, 0], sizes = [12, 20, 4], strides = [1, 1, 1]} : vector<12x20x8xbf16> to vector<12x20x4xbf16>
    %35 = vector.extract_strided_slice %33 {offsets = [0, 0, 4], sizes = [12, 20, 4], strides = [1, 1, 1]} : vector<12x20x8xbf16> to vector<12x20x4xbf16>
    %c0_10 = arith.constant 0 : index
    %c0_11 = arith.constant 0 : index
    %36 = vector.load %arg9[%c0_10, %c0_11] : memref<1x32xf32, #tpu.memory_space<vmem>>, vector<1x32xf32>
    %37 = vector.shape_cast %36 : vector<1x32xf32> to vector<1x32xf32>
    %38 = vector.broadcast %37 : vector<1x32xf32> to vector<128x32xf32>
    %39 = vector.extract_strided_slice %4 {offsets = [2, 2, 0], sizes = [8, 16, 4], strides = [1, 1, 1]} : vector<12x20x4xbf16> to vector<8x16x4xbf16>
    %40 = vector.shape_cast %39 : vector<8x16x4xbf16> to vector<128x4xbf16>
    %c0_12 = arith.constant 0 : index
    %c0_13 = arith.constant 0 : index
    %41 = vector.load %arg5[%c0_12, %c0_13] : memref<4x32xbf16, #tpu.memory_space<vmem>>, vector<4x32xbf16>
    %cst_14 = arith.constant dense<0.000000e+00> : vector<128x32xf32>
    %42 = tpu.matmul %40, %41, %cst_14 {dimension_numbers = #tpu.dot_dimension_numbers<[1], [0], [0], [1], [0, 0, 1, 1], [], []>} : vector<128x4xbf16>, vector<4x32xbf16>, vector<128x32xf32> -> vector<128x32xf32>
    %43 = arith.addf %38, %42 : vector<128x32xf32>
    %44 = vector.extract_strided_slice %34 {offsets = [1, 1, 0], sizes = [8, 16, 4], strides = [1, 1, 1]} : vector<12x20x4xbf16> to vector<8x16x4xbf16>
    %45 = vector.extract_strided_slice %34 {offsets = [1, 2, 0], sizes = [8, 16, 4], strides = [1, 1, 1]} : vector<12x20x4xbf16> to vector<8x16x4xbf16>
    %46 = vector.extract_strided_slice %34 {offsets = [1, 3, 0], sizes = [8, 16, 4], strides = [1, 1, 1]} : vector<12x20x4xbf16> to vector<8x16x4xbf16>
    %47 = vector.extract_strided_slice %34 {offsets = [2, 1, 0], sizes = [8, 16, 4], strides = [1, 1, 1]} : vector<12x20x4xbf16> to vector<8x16x4xbf16>
    %48 = vector.extract_strided_slice %34 {offsets = [2, 2, 0], sizes = [8, 16, 4], strides = [1, 1, 1]} : vector<12x20x4xbf16> to vector<8x16x4xbf16>
    %49 = vector.extract_strided_slice %34 {offsets = [2, 3, 0], sizes = [8, 16, 4], strides = [1, 1, 1]} : vector<12x20x4xbf16> to vector<8x16x4xbf16>
    %50 = vector.extract_strided_slice %34 {offsets = [3, 1, 0], sizes = [8, 16, 4], strides = [1, 1, 1]} : vector<12x20x4xbf16> to vector<8x16x4xbf16>
    %51 = vector.extract_strided_slice %34 {offsets = [3, 2, 0], sizes = [8, 16, 4], strides = [1, 1, 1]} : vector<12x20x4xbf16> to vector<8x16x4xbf16>
    %52 = vector.extract_strided_slice %34 {offsets = [3, 3, 0], sizes = [8, 16, 4], strides = [1, 1, 1]} : vector<12x20x4xbf16> to vector<8x16x4xbf16>
    %53 = tpu.concatenate %44, %45, %46, %47, %48, %49, %50, %51, %52 in 2 : vector<8x16x4xbf16>, vector<8x16x4xbf16>, vector<8x16x4xbf16>, vector<8x16x4xbf16>, vector<8x16x4xbf16>, vector<8x16x4xbf16>, vector<8x16x4xbf16>, vector<8x16x4xbf16>, vector<8x16x4xbf16> -> vector<8x16x36xbf16>
    %54 = vector.shape_cast %53 : vector<8x16x36xbf16> to vector<128x36xbf16>
    %c0_15 = arith.constant 0 : index
    %c0_16 = arith.constant 0 : index
    %55 = vector.load %arg6[%c0_15, %c0_16] : memref<36x32xbf16, #tpu.memory_space<vmem>>, vector<36x32xbf16>
    %cst_17 = arith.constant dense<0.000000e+00> : vector<128x32xf32>
    %56 = tpu.matmul %54, %55, %cst_17 {dimension_numbers = #tpu.dot_dimension_numbers<[1], [0], [0], [1], [0, 0, 1, 1], [], []>} : vector<128x36xbf16>, vector<36x32xbf16>, vector<128x32xf32> -> vector<128x32xf32>
    %57 = arith.addf %43, %56 : vector<128x32xf32>
    %58 = vector.extract_strided_slice %35 {offsets = [0, 0, 0], sizes = [8, 16, 4], strides = [1, 1, 1]} : vector<12x20x4xbf16> to vector<8x16x4xbf16>
    %59 = vector.extract_strided_slice %35 {offsets = [0, 1, 0], sizes = [8, 16, 4], strides = [1, 1, 1]} : vector<12x20x4xbf16> to vector<8x16x4xbf16>
    %60 = vector.extract_strided_slice %35 {offsets = [0, 2, 0], sizes = [8, 16, 4], strides = [1, 1, 1]} : vector<12x20x4xbf16> to vector<8x16x4xbf16>
    %61 = vector.extract_strided_slice %35 {offsets = [0, 3, 0], sizes = [8, 16, 4], strides = [1, 1, 1]} : vector<12x20x4xbf16> to vector<8x16x4xbf16>
    %62 = vector.extract_strided_slice %35 {offsets = [0, 4, 0], sizes = [8, 16, 4], strides = [1, 1, 1]} : vector<12x20x4xbf16> to vector<8x16x4xbf16>
    %63 = vector.extract_strided_slice %35 {offsets = [1, 0, 0], sizes = [8, 16, 4], strides = [1, 1, 1]} : vector<12x20x4xbf16> to vector<8x16x4xbf16>
    %64 = vector.extract_strided_slice %35 {offsets = [1, 1, 0], sizes = [8, 16, 4], strides = [1, 1, 1]} : vector<12x20x4xbf16> to vector<8x16x4xbf16>
    %65 = vector.extract_strided_slice %35 {offsets = [1, 2, 0], sizes = [8, 16, 4], strides = [1, 1, 1]} : vector<12x20x4xbf16> to vector<8x16x4xbf16>
    %66 = vector.extract_strided_slice %35 {offsets = [1, 3, 0], sizes = [8, 16, 4], strides = [1, 1, 1]} : vector<12x20x4xbf16> to vector<8x16x4xbf16>
    %67 = vector.extract_strided_slice %35 {offsets = [1, 4, 0], sizes = [8, 16, 4], strides = [1, 1, 1]} : vector<12x20x4xbf16> to vector<8x16x4xbf16>
    %68 = vector.extract_strided_slice %35 {offsets = [2, 0, 0], sizes = [8, 16, 4], strides = [1, 1, 1]} : vector<12x20x4xbf16> to vector<8x16x4xbf16>
    %69 = vector.extract_strided_slice %35 {offsets = [2, 1, 0], sizes = [8, 16, 4], strides = [1, 1, 1]} : vector<12x20x4xbf16> to vector<8x16x4xbf16>
    %70 = vector.extract_strided_slice %35 {offsets = [2, 2, 0], sizes = [8, 16, 4], strides = [1, 1, 1]} : vector<12x20x4xbf16> to vector<8x16x4xbf16>
    %71 = vector.extract_strided_slice %35 {offsets = [2, 3, 0], sizes = [8, 16, 4], strides = [1, 1, 1]} : vector<12x20x4xbf16> to vector<8x16x4xbf16>
    %72 = vector.extract_strided_slice %35 {offsets = [2, 4, 0], sizes = [8, 16, 4], strides = [1, 1, 1]} : vector<12x20x4xbf16> to vector<8x16x4xbf16>
    %73 = vector.extract_strided_slice %35 {offsets = [3, 0, 0], sizes = [8, 16, 4], strides = [1, 1, 1]} : vector<12x20x4xbf16> to vector<8x16x4xbf16>
    %74 = vector.extract_strided_slice %35 {offsets = [3, 1, 0], sizes = [8, 16, 4], strides = [1, 1, 1]} : vector<12x20x4xbf16> to vector<8x16x4xbf16>
    %75 = vector.extract_strided_slice %35 {offsets = [3, 2, 0], sizes = [8, 16, 4], strides = [1, 1, 1]} : vector<12x20x4xbf16> to vector<8x16x4xbf16>
    %76 = vector.extract_strided_slice %35 {offsets = [3, 3, 0], sizes = [8, 16, 4], strides = [1, 1, 1]} : vector<12x20x4xbf16> to vector<8x16x4xbf16>
    %77 = vector.extract_strided_slice %35 {offsets = [3, 4, 0], sizes = [8, 16, 4], strides = [1, 1, 1]} : vector<12x20x4xbf16> to vector<8x16x4xbf16>
    %78 = vector.extract_strided_slice %35 {offsets = [4, 0, 0], sizes = [8, 16, 4], strides = [1, 1, 1]} : vector<12x20x4xbf16> to vector<8x16x4xbf16>
    %79 = vector.extract_strided_slice %35 {offsets = [4, 1, 0], sizes = [8, 16, 4], strides = [1, 1, 1]} : vector<12x20x4xbf16> to vector<8x16x4xbf16>
    %80 = vector.extract_strided_slice %35 {offsets = [4, 2, 0], sizes = [8, 16, 4], strides = [1, 1, 1]} : vector<12x20x4xbf16> to vector<8x16x4xbf16>
    %81 = vector.extract_strided_slice %35 {offsets = [4, 3, 0], sizes = [8, 16, 4], strides = [1, 1, 1]} : vector<12x20x4xbf16> to vector<8x16x4xbf16>
    %82 = vector.extract_strided_slice %35 {offsets = [4, 4, 0], sizes = [8, 16, 4], strides = [1, 1, 1]} : vector<12x20x4xbf16> to vector<8x16x4xbf16>
    %83 = tpu.concatenate %58, %59, %60, %61, %62, %63, %64, %65, %66, %67, %68, %69, %70, %71, %72, %73 in 2 : vector<8x16x4xbf16>, vector<8x16x4xbf16>, vector<8x16x4xbf16>, vector<8x16x4xbf16>, vector<8x16x4xbf16>, vector<8x16x4xbf16>, vector<8x16x4xbf16>, vector<8x16x4xbf16>, vector<8x16x4xbf16>, vector<8x16x4xbf16>, vector<8x16x4xbf16>, vector<8x16x4xbf16>, vector<8x16x4xbf16>, vector<8x16x4xbf16>, vector<8x16x4xbf16>, vector<8x16x4xbf16> -> vector<8x16x64xbf16>
    %84 = tpu.concatenate %74, %75, %76, %77, %78, %79, %80, %81, %82 in 2 : vector<8x16x4xbf16>, vector<8x16x4xbf16>, vector<8x16x4xbf16>, vector<8x16x4xbf16>, vector<8x16x4xbf16>, vector<8x16x4xbf16>, vector<8x16x4xbf16>, vector<8x16x4xbf16>, vector<8x16x4xbf16> -> vector<8x16x36xbf16>
    %85 = tpu.concatenate %83, %84 in 2 : vector<8x16x64xbf16>, vector<8x16x36xbf16> -> vector<8x16x100xbf16>
    %86 = vector.shape_cast %85 : vector<8x16x100xbf16> to vector<128x100xbf16>
    %c0_18 = arith.constant 0 : index
    %c0_19 = arith.constant 0 : index
    %87 = vector.load %arg7[%c0_18, %c0_19] : memref<100x32xbf16, #tpu.memory_space<vmem>>, vector<100x32xbf16>
    %cst_20 = arith.constant dense<0.000000e+00> : vector<128x32xf32>
    %88 = tpu.matmul %86, %87, %cst_20 {dimension_numbers = #tpu.dot_dimension_numbers<[1], [0], [0], [1], [0, 0, 1, 1], [], []>} : vector<128x100xbf16>, vector<100x32xbf16>, vector<128x32xf32> -> vector<128x32xf32>
    %89 = arith.addf %57, %88 : vector<128x32xf32>
    %cst_21 = arith.constant 0xFF800000 : f32
    %90 = arith.truncf %cst_21 : f32 to bf16
    %91 = vector.shape_cast %19 : vector<12x20x1xi1> to vector<12x20x1xi1>
    %92 = vector.broadcast %91 : vector<12x20x1xi1> to vector<12x20x4xi1>
    %93 = vector.broadcast %90 : bf16 to vector<12x20x4xbf16>
    %94 = arith.select %92, %4, %93 : vector<12x20x4xi1>, vector<12x20x4xbf16>
    %95 = vector.extract_strided_slice %94 {offsets = [1, 1, 0], sizes = [8, 16, 4], strides = [1, 1, 1]} : vector<12x20x4xbf16> to vector<8x16x4xbf16>
    %96 = vector.extract_strided_slice %94 {offsets = [1, 2, 0], sizes = [8, 16, 4], strides = [1, 1, 1]} : vector<12x20x4xbf16> to vector<8x16x4xbf16>
    %97 = arith.maximumf %95, %96 : vector<8x16x4xbf16>
    %98 = vector.extract_strided_slice %94 {offsets = [1, 3, 0], sizes = [8, 16, 4], strides = [1, 1, 1]} : vector<12x20x4xbf16> to vector<8x16x4xbf16>
    %99 = arith.maximumf %97, %98 : vector<8x16x4xbf16>
    %100 = vector.extract_strided_slice %94 {offsets = [2, 1, 0], sizes = [8, 16, 4], strides = [1, 1, 1]} : vector<12x20x4xbf16> to vector<8x16x4xbf16>
    %101 = arith.maximumf %99, %100 : vector<8x16x4xbf16>
    %102 = vector.extract_strided_slice %94 {offsets = [2, 2, 0], sizes = [8, 16, 4], strides = [1, 1, 1]} : vector<12x20x4xbf16> to vector<8x16x4xbf16>
    %103 = arith.maximumf %101, %102 : vector<8x16x4xbf16>
    %104 = vector.extract_strided_slice %94 {offsets = [2, 3, 0], sizes = [8, 16, 4], strides = [1, 1, 1]} : vector<12x20x4xbf16> to vector<8x16x4xbf16>
    %105 = arith.maximumf %103, %104 : vector<8x16x4xbf16>
    %106 = vector.extract_strided_slice %94 {offsets = [3, 1, 0], sizes = [8, 16, 4], strides = [1, 1, 1]} : vector<12x20x4xbf16> to vector<8x16x4xbf16>
    %107 = arith.maximumf %105, %106 : vector<8x16x4xbf16>
    %108 = vector.extract_strided_slice %94 {offsets = [3, 2, 0], sizes = [8, 16, 4], strides = [1, 1, 1]} : vector<12x20x4xbf16> to vector<8x16x4xbf16>
    %109 = arith.maximumf %107, %108 : vector<8x16x4xbf16>
    %110 = vector.extract_strided_slice %94 {offsets = [3, 3, 0], sizes = [8, 16, 4], strides = [1, 1, 1]} : vector<12x20x4xbf16> to vector<8x16x4xbf16>
    %111 = arith.maximumf %109, %110 : vector<8x16x4xbf16>
    %112 = vector.shape_cast %111 : vector<8x16x4xbf16> to vector<128x4xbf16>
    %c0_22 = arith.constant 0 : index
    %c0_23 = arith.constant 0 : index
    %113 = vector.load %arg8[%c0_22, %c0_23] : memref<4x32xbf16, #tpu.memory_space<vmem>>, vector<4x32xbf16>
    %cst_24 = arith.constant dense<0.000000e+00> : vector<128x32xf32>
    %114 = tpu.matmul %112, %113, %cst_24 {dimension_numbers = #tpu.dot_dimension_numbers<[1], [0], [0], [1], [0, 0, 1, 1], [], []>} : vector<128x4xbf16>, vector<4x32xbf16>, vector<128x32xf32> -> vector<128x32xf32>
    %115 = arith.addf %89, %114 : vector<128x32xf32>
    %cst_25 = arith.constant 0.000000e+00 : f32
    %116 = vector.broadcast %cst_25 : f32 to vector<128x32xf32>
    %117 = arith.maximumf %115, %116 : vector<128x32xf32>
    %118 = vector.shape_cast %117 : vector<128x32xf32> to vector<1x8x16x32xf32>
    %c0_26 = arith.constant 0 : index
    %c0_27 = arith.constant 0 : index
    %c0_28 = arith.constant 0 : index
    %c0_29 = arith.constant 0 : index
    %119 = vector.load %arg10[%c0_26, %c0_27, %c0_28, %c0_29] : memref<1x8x16x32xf32, #tpu.memory_space<vmem>>, vector<1x8x16x32xf32>
    tpu.vector_store %arg10[%c0_26, %c0_27, %c0_28, %c0_29], %118 {strides = array<i32>} : memref<1x8x16x32xf32, #tpu.memory_space<vmem>>, vector<1x8x16x32xf32>,
    return
  }
  func.func @transform_0(%arg0: i32, %arg1: i32) -> (i32, i32, i32, i32) {
    %c0_i32 = arith.constant 0 : i32
    %c0_i32_0 = arith.constant 0 : i32
    %c0_i32_1 = arith.constant 0 : i32
    %c0_i32_2 = arith.constant 0 : i32
    return %arg0, %c0_i32, %c0_i32_0, %c0_i32_1 : i32, i32, i32, i32
  }
  func.func @transform_1(%arg0: i32, %arg1: i32) -> (i32, i32) {
    %c0_i32 = arith.constant 0 : i32
    %c0_i32_0 = arith.constant 0 : i32
    %c0_i32_1 = arith.constant 0 : i32
    return %c0_i32, %c0_i32_0 : i32, i32
  }
  func.func @transform_2(%arg0: i32, %arg1: i32) -> (i32, i32) {
    %c0_i32 = arith.constant 0 : i32
    %c0_i32_0 = arith.constant 0 : i32
    %c0_i32_1 = arith.constant 0 : i32
    return %c0_i32, %c0_i32_0 : i32, i32
  }
  func.func @transform_3(%arg0: i32, %arg1: i32) -> (i32, i32) {
    %c0_i32 = arith.constant 0 : i32
    %c0_i32_0 = arith.constant 0 : i32
    %c0_i32_1 = arith.constant 0 : i32
    return %c0_i32, %c0_i32_0 : i32, i32
  }
  func.func @transform_4(%arg0: i32, %arg1: i32) -> (i32, i32) {
    %c0_i32 = arith.constant 0 : i32
    %c0_i32_0 = arith.constant 0 : i32
    %c0_i32_1 = arith.constant 0 : i32
    return %c0_i32, %c0_i32_0 : i32, i32
  }
  func.func @transform_5(%arg0: i32, %arg1: i32) -> (i32, i32) {
    %c0_i32 = arith.constant 0 : i32
    %c0_i32_0 = arith.constant 0 : i32
    %c0_i32_1 = arith.constant 0 : i32
    return %c0_i32, %c0_i32_0 : i32, i32
  }
  func.func @transform_6(%arg0: i32, %arg1: i32) -> (i32, i32) {
    %c0_i32 = arith.constant 0 : i32
    %c0_i32_0 = arith.constant 0 : i32
    %c0_i32_1 = arith.constant 0 : i32
    return %c0_i32, %c0_i32_0 : i32, i32
  }
  func.func @transform_7(%arg0: i32, %arg1: i32) -> (i32, i32) {
    %c0_i32 = arith.constant 0 : i32
    %c0_i32_0 = arith.constant 0 : i32
    %c0_i32_1 = arith.constant 0 : i32
    return %c0_i32, %c0_i32_0 : i32, i32
  }
  func.func @transform_8(%arg0: i32, %arg1: i32) -> (i32, i32, i32, i32) {
    %c0_i32 = arith.constant 0 : i32
    %c0_i32_0 = arith.constant 0 : i32
    %c0_i32_1 = arith.constant 0 : i32
    return %arg0, %arg1, %c0_i32, %c0_i32_0 : i32, i32, i32, i32
  }
}

</mosaic_0001>

<bundles_post_ra>
// kernel: inception_forward.1
= control target key start
LH: loop header
LB: loop body
LE: loop exit
PB: predicated region body
PF: predicated region fallthrough
CT: control target
= control target key end

     0   :  { %s10345_s0 = inlined_call_operand.vmem [shape: bf16[2,20,20,4], index: 0, kind: input, shape index: {}]   ;;  %s10346_s1 = inlined_call_operand.vmem [shape: bf16[4,8], index: 1, kind: input, shape index: {}]   ;;  %s10347_s2 = inlined_call_operand.vmem [shape: f32[1,8], index: 2, kind: input, shape index: {}]   ;;  %s10348_s3 = inlined_call_operand.vmem [shape: bf16[4,32], index: 3, kind: input, shape index: {}]   ;;  %s10349_s4 = inlined_call_operand.vmem [shape: bf16[36,32], index: 4, kind: input, shape index: {}]   ;;  %s10350_s5 = inlined_call_operand.vmem [shape: bf16[100,32], index: 5, kind: input, shape index: {}]   ;;  %s10351_s6 = inlined_call_operand.vmem [shape: bf16[4,32], index: 6, kind: input, shape index: {}]   ;;  %s10352_s7 = inlined_call_operand.vmem [shape: f32[1,32], index: 7, kind: input, shape index: {}]   ;;  %s10353_s8 = inlined_call_operand.hbm [shape: f32[2,16,16,32], index: 8, kind: output, shape index: {}]  }
   0x1   :  { %10650 = sst [smem:[#allocation185_spill]] %s10345_s0 }
   0x2   :  { %10651 = sst [smem:[#allocation186_spill]] %s10346_s1 }
   0x3   :  { %10652 = sst [smem:[#allocation187_spill]] %s10347_s2 }
   0x4   :  { %10653 = sst [smem:[#allocation188_spill]] %s10348_s3 }
   0x5   :  { %10654 = sst [smem:[#allocation189_spill]] %s10349_s4 }
   0x6   :  { %13 = vsyncpa [#allocation3], 0 }
   0x7   :  { %15 = vsyncpa [#allocation3 + $0x1], 0  ;;  %s5935_s27 = smov 0   ;;  %s5937_s28 = smov 0  }
   0x8   :  { %s5939_s29 = smov 0   ;;  %s5941_s30 = smov 0  }
   0x9   :  { %s5943_s9 = smov 0   ;;  %s5945_s10 = smov 0  }
   0xa   :  { %s5947_s11 = smov 0   ;;  %s5949_s12 = smov 0  }
   0xb LB: > { %s5282_s13 = sadd.s32 4294967295, %s5867_s12   ;;  %s5283_s14 = sadd.s32 4294967294, %s5867_s12   ;;  %s5867_s12 = sphi %s5949_s12, %s21_s12   ;;  %s5863_s11 = sphi %s5947_s11, %s11518_s11   ;;  %s5859_s10 = sphi %s5945_s10, %s11517_s10   ;;  %s5855_s9 = sphi %s5943_s9, %s11516_s9   ;;  %s5851_s30 = sphi %s5941_s30, %s11515_s30   ;;  %s5847_s29 = sphi %s5939_s29, %s11514_s29   ;;  %s5843_s28 = sphi %s5937_s28, %s11513_s28   ;;  %s5839_s27 = sphi %s5935_s27, %s11512_s27  }
   0xc   : > { %s30_s15 = sadd.s32 1, %s5859_s10  ;;  %s33_s16 = sadd.s32 1, %s5863_s11 }
   0xd   : > { %p31_p0 = scmp.ge.s32.totalorder %s30_s15, 2  ;;  %p225_p1 = scmp.ne.s32.totalorder %s5847_s29, %s5843_s28 }
   0xe   : > { %p226_p2 = scmp.eq.s32.totalorder %s5282_s13, 3  ;;  %p231_p5 = scmp.ne.s32.totalorder %s5843_s28, %s5839_s27 }
   0xf   : > { %s11520_s15 = smov (%p31_p0, %s30_s15), 0  ;;  %s11522_s16 = smov (!%p31_p0, %s33_s16), %s5863_s11 }
  0x10   : > { %s211_s17 = ssub.s32 %s5859_s10, %s11520_s15  ;;  %p5986_p3 = por %p226_p2, %p225_p1 }
  0x11   : > { %p35_p4 = scmp.ge.s32.totalorder %s11522_s16, 2  ;;  %p232_p6 = scmp.eq.s32.totalorder %s5283_s14, 3 }
  0x12   : > { %p5286_p7 = scmp.ge.s32.totalorder %s5867_s12, 1  ;;  %p279_p9 = scmp.lt.s32.totalorder %s5867_s12, 5 }
  0x13   : > { %s11524_s16 = smov (%p35_p4, %s11522_s16), 0  ;;  %p5995_p8 = por %p232_p6, %p231_p5 }
  0x14   : > { %s210_s20 = ssub.s32 %s5863_s11, %s11524_s16  ;;  %s215_s21 = sadd.s32 1, %s5847_s29 }
  0x15   : > { %s212_s22 = sor.u32 %s211_s17, %s210_s20  ;;  %p280_p10 = pnand %p5286_p7, %p279_p9 }
  0x16   : > { %p213_p11 = scmp.eq.s32.totalorder %s212_s22, 0 }
  0x17   : > { %283 = sbr.rel (%p280_p10) target bundleno = 1327 (0x52f), region = 52 }
  0x18   : > { %s6004_s23 = scalar_select %p213_p11, %s5847_s29, %s215_s21  }
  0x1c   : > { %s10657_s1 = sld [smem:[#allocation186_spill]]  ;;  %vm10354_vm0 = vcmask 1041408   ;;  %p313_p12 = scmp.lt.s32.totalorder %s5855_s9, 1  ;;  %v373_v1 = vlaneseq  ;;  %v5869_v2 = vmov 0.0   ;;  %vm5870_vm1 = vmmov 0  }
  0x1d   : > { %5462 = vmatprep.subr.bf16.mxu0 %v5869_v2  ;;  %5464 = vmatprep.mubr.msk.bf16.mxu0 %vm5870_vm1, %v5869_v2  ;;  %v5871_v4 = vmov 1983009808   ;;  %s5400_s13 = smul.u32 96, %s5851_s30  ;;  %s10658_s0 = sld [smem:[#allocation185_spill]]  ;;  %vm10355_vm2 = vcmask 31744  }
  0x1e   : > { %s314_s26 = scalar_select %p313_p12, %s5855_s9, 1  ;;  %v551_v5 = vunpack.c.l.s4 %v5871_v4  ;;  %v6016_v6 = vshrl.u32 %v373_v1, 7 }
  0x1f   : > { %s5289_s24 = sshll.u32 %s5851_s30, 3  ;;  %s10659_s2 = sld [smem:[#allocation187_spill]] }
  0x20   : > { %s5616_s14 = smul.u32 240, %s314_s26  ;;  %v552_v7 = vunpack.c.0.s8 %v551_v5  ;;  %vm10361_vm8 = vcmp.ge.s32.totalorder %v6016_v6, 2  ;;  %s10533_s17 = smov 12  }
  0x21   : > { %s10516_s20 = smov 8   ;;  %s10394_s25 = smov 24  }
  0x22   : > { %v803_v0 = vld [vmem:[%s10657_s1] sm:$0x3]  ;;  %v6024_v8 = vsub.s32 %v552_v7, %v6016_v6  ;;  %s10770_s3 = sld [smem:[#allocation188_spill]]  ;;  %s10423_s26 = smov 28  }
  0x23   : > { %v1114_v3 = vsel %vm10354_vm0, %v803_v0, 0  ;;  %s317_s21 = scalar_lea.vmem %s10658_s0, %s5616_s14  ;;  %s10483_s14 = smov 4  }
  0x24   : > { %5463 = vmatpush3.bf16.msra.mxu0 %v1114_v3  ;;  %s6021_s22 = scalar_lea.vmem %s317_s21, %s5400_s13  ;;  %s10435_s13 = smov 124  }
  0x25   : > { %v5292_v9 = vld.sshfl [vmem:[%s6021_s22] sm:$0x33 pattern:$0x76325410]  ;;  %v6054_v48 = vld [vmem:[%s6021_s22 + $0x30] sm:$0xf] }
  0x26   : > { %v5756_v10 = vld.sshfl [vmem:[%s6021_s22 + $0xc] sm:$0x33 pattern:$0x76325410]  ;;  %v534_v12 = vcombine.high %v5292_v9, %v5292_v9  ;;  %v6059_v49 = vld [vmem:[%s6021_s22 + $0x34] sm:$0xf]  ;;  %v625_v50 = vrot.slane %v6054_v48, %v6024_v8 }
  0x27   : > { %v5293_v11 = vld.sshfl [vmem:[%s6021_s22 + $0x4] sm:$0x33 pattern:$0x76325410]  ;;  %v557_v17 = vcombine.high %v5756_v10, %v5756_v10  ;;  %v633_v54 = vrot.slane %v6059_v49, %v6024_v8  ;;  %v6071_v59 = vld [vmem:[%s6021_s22 + $0x3c] sm:$0xf] }
  0x28   : > { %v5757_v13 = vld.sshfl [vmem:[%s6021_s22 + $0x10] sm:$0x33 pattern:$0x76325410]  ;;  %v542_v14 = vcombine.high %v5293_v11, %v5293_v11  ;;  %v811_v15 = vcombine.low %v5292_v9, %v534_v12  ;;  %v626_v57 = vcombine.high %v625_v50, %v625_v50  ;;  %v648_v0 = vrot.slane %v6071_v59, %v6024_v8  ;;  %v6077_v1 = vld [vmem:[%s6021_s22 + $0x40] sm:$0xf] }
  0x29   : > { %v5294_v16 = vld.sshfl [vmem:[%s6021_s22 + $0x8] sm:$0x3 pattern:$0x76325410]  ;;  %v829_v23 = vcombine.low %v557_v17, %v5757_v13  ;;  %v565_v28 = vcombine.high %v5757_v13, %v5757_v13  ;;  %v634_v58 = vcombine.high %v633_v54, %v633_v54  ;;  %v656_v7 = vrot.slane %v6077_v1, %v6024_v8  ;;  %s10447_s21 = smov 20   ;;  %s10846_s4 = sld [smem:[#allocation189_spill]] }
  0x2a   : > { %v5758_v18 = vld.sshfl [vmem:[%s6021_s22 + $0x18] sm:$0x33 pattern:$0x76325410]  ;;  %v812_v19 = vcombine.low %v5293_v11, %v542_v14  ;;  %v819_v20 = vrot.slane %v811_v15, %v6024_v8  ;;  %v828_v22 = vcombine.low %v5294_v16, %v5756_v10  ;;  %v896_v61 = vcombine.low %v625_v50, %v626_v57  ;;  %v6087_v9 = vld [vmem:[%s6021_s22 + $0x48] sm:$0xf] }
  0x2b   : > { %v5759_v24 = vld.sshfl [vmem:[%s6021_s22 + $0x14] sm:$0x3 pattern:$0x76325410]  ;;  %v843_v27 = vrot.slane %v829_v23, %v6024_v8  ;;  %v580_v29 = vcombine.high %v5758_v18, %v5758_v18  ;;  %v897_v62 = vcombine.low %v633_v54, %v634_v58  ;;  %v649_v5 = vcombine.high %v648_v0, %v648_v0  ;;  %v6092_v14 = vld [vmem:[%s6021_s22 + $0x44] sm:$0x3] }
  0x2c   : > { %v826_v21 = vrot.slane %v812_v19, %v6024_v8  ;;  %v836_v26 = vrot.slane %v828_v22, %v6024_v8  ;;  %v5760_v30 = vld.sshfl [vmem:[%s6021_s22 + $0x1c] sm:$0x33 pattern:$0x76325410]  ;;  %v845_v32 = vcombine.low %v565_v28, %v5759_v24  ;;  %v904_v3 = vrot.slane %v896_v61, %v6024_v8  ;;  %v6105_v24 = vld [vmem:[%s6021_s22 + $0x50] sm:$0x3] }
  0x2d   : > { %v846_v33 = vcombine.low %v5758_v18, %v580_v29  ;;  %v5761_v34 = vld.sshfl [vmem:[%s6021_s22 + $0x20] sm:$0x3 pattern:$0x76325410]  ;;  %v588_v38 = vcombine.high %v5760_v30, %v5760_v30  ;;  %v911_v4 = vrot.slane %v897_v62, %v6024_v8  ;;  %v914_v12 = vcombine.low %v649_v5, %v656_v7  ;;  %s10965_s0 = smov 12  }
  0x2e   : > { %v827_v25 = vcombine.low %v819_v20, %v826_v21  ;;  %v844_v31 = vcombine.low %v836_v26, %v843_v27  ;;  %v5762_v35 = vld.sshfl [vmem:[%s6021_s22 + $0x24] sm:$0x33 pattern:$0x76325410]  ;;  %v853_v36 = vrot.slane %v845_v32, %v6024_v8  ;;  %v671_v13 = vrot.slane %v6087_v9, %v6024_v8  ;;  %v6102_v20 = vld [vmem:[%s6021_s22 + $0x4c] sm:$0xf] }
  0x2f   : > { %v860_v37 = vrot.slane %v846_v33, %v6024_v8  ;;  %v5763_v39 = vld.sshfl [vmem:[%s6021_s22 + $0x28] sm:$0x33 pattern:$0x76325410]  ;;  %v862_v41 = vcombine.low %v5760_v30, %v588_v38  ;;  %v863_v42 = vcombine.low %v5761_v34, %v5762_v35  ;;  %v603_v46 = vcombine.high %v5762_v35, %v5762_v35  ;;  %v6110_v26 = vld [vmem:[%s6021_s22 + $0x54] sm:$0xf] }
  0x30   : > { %5465 = vmatmul.mubr.msk.bf16.vlgmr.msra.gmra.mxu0 %vm10355_vm2, %v827_v25  ;;  %v5764_v43 = vld.sshfl [vmem:[%s6021_s22 + $0x2c] sm:$0x3 pattern:$0x76325410]  ;;  %v611_v47 = vcombine.high %v5763_v39, %v5763_v39  ;;  %v912_v10 = vcombine.low %v904_v3, %v911_v4  ;;  %v657_v15 = vcombine.high %v656_v7, %v656_v7  ;;  %v928_v17 = vrot.slane %v914_v12, %v6024_v8  ;;  %v6122_v35 = vld [vmem:[%s6021_s22 + $0x58] sm:$0xf] }
  0x31   : > { %5468 = vmatprep.mubr.msk.bf16.mxu0 %vm5870_vm1, %v5869_v2  ;;  %v861_v40 = vcombine.low %v853_v36, %v860_v37  ;;  %v870_v44 = vrot.slane %v862_v41, %v6024_v8  ;;  %v877_v45 = vrot.slane %v863_v42, %v6024_v8  ;;  %v879_v52 = vcombine.low %v603_v46, %v5763_v39  ;;  %v5765_v63 = vld.sshfl [vmem:[%s6021_s22 + $0x38] sm:$0x3 pattern:$0x76325410]  ;;  %v6132_v39 = vld [vmem:[%s6021_s22 + $0x5c] sm:$0x3] }
  0x32   : > { %v880_v53 = vcombine.low %v611_v47, %v5764_v43  ;;  %v913_v11 = vcombine.low %v5765_v63, %v648_v0  ;;  %v664_v18 = vrot.slane %v6092_v14, %v6024_v8  ;;  %v672_v19 = vcombine.high %v671_v13, %v671_v13  ;;  %v5769_v62 = vld.sshfl [vmem:[%s6021_s22 + $0x68] sm:$0x3 pattern:$0x76325410] }
  0x33   : > { %v878_v51 = vcombine.low %v870_v44, %v877_v45  ;;  %v887_v55 = vrot.slane %v879_v52, %v6024_v8  ;;  %v679_v25 = vrot.slane %v6102_v20, %v6024_v8  ;;  %v687_v27 = vrot.slane %v6105_v24, %v6024_v8  ;;  %v5767_v52 = vld.sshfl [vmem:[%s6021_s22 + $0x64] sm:$0x33 pattern:$0x76325410] }
  0x34   : > { %v894_v56 = vrot.slane %v880_v53, %v6024_v8  ;;  %v921_v16 = vrot.slane %v913_v11, %v6024_v8  ;;  %v930_v22 = vcombine.low %v657_v15, %v664_v18  ;;  %v931_v23 = vcombine.low %v671_v13, %v672_v19  ;;  %v5770_v63 = vld.sshfl [vmem:[%s6021_s22 + $0x70] sm:$0x33 pattern:$0x76325410] }
  0x35   : > { %v680_v30 = vcombine.high %v679_v25, %v679_v25  ;;  %v702_v38 = vrot.slane %v6122_v35, %v6024_v8  ;;  %v710_v42 = vrot.slane %v6132_v39, %v6024_v8  ;;  %v726_v54 = vcombine.high %v5767_v52, %v5767_v52  ;;  %v5772_v12 = vld.sshfl [vmem:[%s6021_s22 + $0x74] sm:$0x3 pattern:$0x76325410] }
  0x36   : > { %v895_v60 = vcombine.low %v887_v55, %v894_v56  ;;  %v929_v21 = vcombine.low %v921_v16, %v928_v17  ;;  %v938_v28 = vrot.slane %v930_v22, %v6024_v8  ;;  %v945_v29 = vrot.slane %v931_v23, %v6024_v8  ;;  %v5773_v22 = vld.sshfl [vmem:[%s6021_s22 + $0x7c] sm:$0x33 pattern:$0x76325410] }
  0x37   : > { %v947_v33 = vcombine.low %v679_v25, %v680_v30  ;;  %v703_v41 = vcombine.high %v702_v38, %v702_v38  ;;  %v982_v56 = vcombine.low %v5767_v52, %v726_v54  ;;  %v749_v13 = vcombine.high %v5770_v63, %v5770_v63  ;;  %v5774_v23 = vld.sshfl [vmem:[%s6021_s22 + $0x80] sm:$0x3 pattern:$0x76325410] }
  0x38   : > { %5469 = vmatmul.mubr.msk.bf16.gmra.mxu0 %vm10355_vm2, %v844_v31  ;;  %v694_v31 = vrot.slane %v6110_v26, %v6024_v8  ;;  %v946_v32 = vcombine.low %v938_v28, %v945_v29  ;;  %v5295_v25 = vld.sshfl [vmem:[%s6021_s22 + $0x84] sm:$0x33 pattern:$0x76325410] }
  0x39   : > { %5472 = vmatprep.mubr.msk.bf16.mxu0 %vm5870_vm1, %v5869_v2  ;;  %v955_v36 = vrot.slane %v947_v33, %v6024_v8  ;;  %v965_v45 = vcombine.low %v703_v41, %v710_v42  ;;  %v996_v58 = vrot.slane %v982_v56, %v6024_v8  ;;  %v1015_v16 = vcombine.low %v749_v13, %v5772_v12  ;;  %v5296_v41 = vld.sshfl [vmem:[%s6021_s22 + $0x88] sm:$0x33 pattern:$0x76325410] }
  0x3a   : > { %v948_v34 = vcombine.low %v687_v27, %v694_v31  ;;  %v772_v27 = vcombine.high %v5773_v22, %v5773_v22  ;;  %v1033_v29 = vcombine.low %v5774_v23, %v5295_v25  ;;  %v787_v42 = vcombine.high %v5295_v25, %v5295_v25 }
  0x3b   : > { %v979_v47 = vrot.slane %v965_v45, %v6024_v8  ;;  %v1023_v18 = vrot.slane %v1015_v16, %v6024_v8  ;;  %v6193_v45 = vadd.s32 16, %v6016_v6 }
  0x3c   : > { %v962_v37 = vrot.slane %v948_v34, %v6024_v8  ;;  %v1032_v28 = vcombine.low %v5773_v22, %v772_v27  ;;  %v1049_v52 = vcombine.low %v787_v42, %v5296_v41  ;;  %v10673_v22 = vmov 0 }
  0x3d   : > { %vm10356_vm12 = vcmp.lt.s32.totalorder %v6193_v45, 18 }
  0x3e   : > { %v963_v43 = vcombine.low %v955_v36, %v962_v37  ;;  %v1040_v30 = vrot.slane %v1032_v28, %v6024_v8  ;;  %v6181_v36 = vld [vmem:[%s10659_s2] ss:$0 sm:$0xff] }
  0x40   : > { %5473 = vmatmul.mubr.msk.bf16.gmra.mxu0 %vm10355_vm2, %v861_v40  ;;  %v695_v40 = vcombine.high %v694_v31, %v694_v31  ;;  %v1047_v31 = vrot.slane %v1033_v29, %v6024_v8 }
  0x41   : > { %5476 = vmatprep.mubr.msk.bf16.mxu0 %vm5870_vm1, %v5869_v2 }
  0x42   : > { %v964_v44 = vcombine.low %v695_v40, %v702_v38  ;;  %v1048_v33 = vcombine.low %v1040_v30, %v1047_v31 }
  0x44   : > { %v972_v46 = vrot.slane %v964_v44, %v6024_v8 }
  0x46   : > { %v980_v50 = vcombine.low %v972_v46, %v979_v47  ;;  %v5297_v46 = vld.sshfl [vmem:[%s6021_s22 + $0x8c] sm:$0x3 pattern:$0x76325410] }
  0x48   : > { %5477 = vmatmul.mubr.msk.bf16.gmra.mxu0 %vm10355_vm2, %v878_v51  ;;  %v5766_v51 = vld.sshfl [vmem:[%s6021_s22 + $0x60] sm:$0x33 pattern:$0x76325410] }
  0x49   : > { %5480 = vmatprep.mubr.msk.bf16.mxu0 %vm5870_vm1, %v5869_v2  ;;  %v718_v53 = vcombine.high %v5766_v51, %v5766_v51 }
  0x4b   : > { %v981_v55 = vcombine.low %v5766_v51, %v718_v53 }
  0x4d   : > { %v989_v57 = vrot.slane %v981_v55, %v6024_v8 }
  0x4f   : > { %v997_v61 = vcombine.low %v989_v57, %v996_v58 }
  0x50   : > { %5481 = vmatmul.mubr.msk.bf16.gmra.mxu0 %vm10355_vm2, %v895_v60  ;;  %v5768_v60 = vld.sshfl [vmem:[%s6021_s22 + $0x6c] sm:$0x33 pattern:$0x76325410] }
  0x51   : > { %5484 = vmatprep.mubr.msk.bf16.mxu0 %vm5870_vm1, %v5869_v2  ;;  %v741_v0 = vcombine.high %v5768_v60, %v5768_v60  ;;  %v998_v3 = vcombine.low %v5769_v62, %v5768_v60  ;;  %v1057_v60 = vrot.slane %v1049_v52, %v6024_v8 }
  0x53   : > { %v999_v4 = vcombine.low %v741_v0, %v5770_v63  ;;  %v1006_v5 = vrot.slane %v998_v3, %v6024_v8 }
  0x55   : > { %v1013_v7 = vrot.slane %v999_v4, %v6024_v8 }
  0x57   : > { %v1014_v11 = vcombine.low %v1006_v5, %v1013_v7 }
  0x58   : > { %5485 = vmatmul.mubr.msk.bf16.gmra.mxu0 %vm10355_vm2, %v912_v10  ;;  %v5771_v10 = vld.sshfl [vmem:[%s6021_s22 + $0x78] sm:$0x33 pattern:$0x76325410] }
  0x59   : > { %5488 = vmatprep.mubr.msk.bf16.mxu0 %vm5870_vm1, %v5869_v2  ;;  %v764_v15 = vcombine.high %v5771_v10, %v5771_v10 }
  0x5b   : > { %v1016_v17 = vcombine.low %v5771_v10, %v764_v15 }
  0x5d   : > { %v1030_v19 = vrot.slane %v1016_v17, %v6024_v8 }
  0x60   : > { %5489 = vmatmul.mubr.msk.bf16.gmra.mxu0 %vm10355_vm2, %v929_v21  ;;  %v1031_v21 = vcombine.low %v1023_v18, %v1030_v19 }
  0x61   : > { %5492 = vmatprep.mubr.msk.bf16.mxu0 %vm5870_vm1, %v5869_v2 }
  0x68   : > { %5493 = vmatmul.mubr.msk.bf16.gmra.mxu0 %vm10355_vm2, %v946_v32  ;;  %v6172_v32 = vstv %s5289_s24  ;;  %s10437_s24 = smov 16  }
  0x69   : > { %5496 = vmatprep.mubr.msk.bf16.mxu0 %vm5870_vm1, %v5869_v2  ;;  %v365_v34 = vadd.s32 4, %v6172_v32  ;;  %vm377_vm5 = vcmp.ge.s32.totalorder %v6172_v32, 2  ;;  %vm389_vm7 = vcmp.lt.s32.totalorder %v6172_v32, 18  ;;  %v366_v51 = vadd.s32 5, %v6172_v32 }
  0x6a   : > { %vm6213_vm11 = vmand %vm377_vm5, %vm389_vm7  ;;  %v362_v58 = vadd.s32 1, %v6172_v32  ;;  %vm10359_vm7 = vcmask 1046528   ;;  %v6265_v29 = vadd.s32 2, %v6172_v32 }
  0x6b   : > { %vm381_vm3 = vcmp.ge.s32.totalorder %v365_v34, 2  ;;  %vm393_vm4 = vcmp.lt.s32.totalorder %v365_v34, 18  ;;  %vm382_vm13 = vcmp.ge.s32.totalorder %v366_v51, 2  ;;  %vm394_vm14 = vcmp.lt.s32.totalorder %v366_v51, 18  ;;  %vm6228_vm15 = vmand %vm6213_vm11, %vm10361_vm8 }
  0x6c   : > { %vm6185_vm6 = vmand %vm381_vm3, %vm393_vm4  ;;  %vm378_vm3 = vcmp.ge.s32.totalorder %v362_v58, 2  ;;  %vm390_vm4 = vcmp.lt.s32.totalorder %v362_v58, 18  ;;  %v10679_v51 = vmov 0 }
  0x6d   : > { %vm6200_vm9 = vmand %vm6185_vm6, %vm10361_vm8 }
  0x6e   : > { %vm4102_vm10 = vmpackc.low %vm6200_vm9, %vm6200_vm9 }
  0x6f   : > { %v6222_v0 = vsel %vm4102_vm10, %v6054_v48, 4286644096  ;;  %vm6244_vm5 = vmand %vm382_vm13, %vm394_vm14  ;;  %vm10357_vm10 = vcmask 1045504   ;;  %vm10358_vm14 = vsmask.f32 7424 }
  0x70   : > { %5497 = vmatmul.mubr.msk.bf16.gmra.mxu0 %vm10355_vm2, %v963_v43  ;;  %v795_v43 = vcombine.high %v5296_v41, %v5296_v41  ;;  %10666 = vst [vmem:[#allocation5_spill] sm:$0xff] %v6222_v0  ;;  %v4241_v13 = vshrl.u32 %v6222_v0, 16  ;;  %vm4103_vm0 = vmpackc.low %vm6185_vm6, %vm6185_vm6  ;;  %v4244_v17 = vshll.u32 %v6222_v0, 16 }
  0x71   : > { %5500 = vmatprep.mubr.msk.bf16.mxu0 %vm5870_vm1, %v5869_v2  ;;  %vm6259_vm13 = vmand %vm378_vm3, %vm390_vm4  ;;  %v6276_v34 = vsel %vm4103_vm0, %v6059_v49, 4286644096 }
  0x72   : > { %v1050_v53 = vcombine.low %v795_v43, %v5297_v46  ;;  %v10674_v22 = vsel %vm6259_vm13, 4294967295, %v10673_v22  ;;  %10678 = vst [vmem:[#allocation7_spill] sm:$0xff] %v6276_v34  ;;  %vm6291_vm0 = vmand %vm6259_vm13, %vm10361_vm8 }
  0x73   : > { %10675 = vst [vmem:[#allocation6_spill] sm:$0xff] %v10674_v22  ;;  %v10680_v51 = vsel %vm6291_vm0, 4294967295, %v10679_v51  ;;  %vm6308_vm3 = vmand %vm6259_vm13, %vm10356_vm12 }
  0x74   : > { %10681 = vst [vmem:[#allocation8_spill] sm:$0xff] %v10680_v51 }
  0x78   : > { %5501 = vmatmul.mubr.msk.bf16.gmra.mxu0 %vm10355_vm2, %v980_v50 }
  0x79   : > { %5504 = vmatprep.mubr.msk.bf16.mxu0 %vm5870_vm1, %v5869_v2 }
  0x80   : > { %5505 = vmatmul.mubr.msk.bf16.gmra.mxu0 %vm10355_vm2, %v997_v61  ;;  %v1064_v61 = vrot.slane %v1050_v53, %v6024_v8 }
  0x81   : > { %5508 = vmatprep.mubr.msk.bf16.mxu0 %vm5870_vm1, %v5869_v2 }
  0x82   : > { %v1065_v3 = vcombine.low %v1057_v60, %v1064_v61 }
  0x88   : > { %5509 = vmatmul.mubr.msk.bf16.gmra.mxu0 %vm10355_vm2, %v1014_v11 }
  0x89   : > { %5512 = vmatprep.mubr.msk.bf16.mxu0 %vm5870_vm1, %v5869_v2 }
  0x90   : > { %5513 = vmatmul.mubr.msk.bf16.gmra.mxu0 %vm10355_vm2, %v1031_v21 }
  0x91   : > { %5516 = vmatprep.mubr.msk.bf16.mxu0 %vm5870_vm1, %v5869_v2 }
  0x98   : > { %5517 = vmatmul.mubr.msk.bf16.gmra.mxu0 %vm10355_vm2, %v1048_v33 }
  0x99   : > { %5520 = vmatprep.mubr.msk.bf16.mxu0 %vm5870_vm1, %v5869_v2  ;;  %vm6237_vm1 = vmand %vm6213_vm11, %vm10356_vm12  ;;  %vm4153_vm12 = vsmask.f32 3328 }
  0xa0   : > { %5521 = vmatmul.mubr.msk.bf16.gmra.mxu0 %vm10355_vm2, %v1065_v3  ;;  %vm10696_vm2 = vcmask 1046528  }
  0xf0   : > { %v1150_v37 = vpop.f32.mrf.mxu0 }
  0xf1   : > { %v1151_v38 = vadd.f32 %v6181_v36, %v1150_v37  ;;  %v6278_v37 = vrot.slane %v4241_v13, 4 }
  0xf2   : > { %v5466_v2 = vpop.f32.mrf.mxu0 }
  0xf3   : > { %v1269_v44 = vmax.f32 %v1151_v38, 0.0 }
  0xf4   : > { %v1153_v47 = vpop.f32.mrf.mxu0 }
  0xf5   : > { %v1329_v54 = vcombine.high %v1269_v44, %v1269_v44  ;;  %v1154_v55 = vadd.f32 %v6181_v36, %v1153_v47  ;;  %v6285_v47 = vrot.slane %v4244_v17, 5  ;;  %v367_v17 = vadd.s32 6, %v6172_v32 }
  0xf6   : > { %v5467_v57 = vpop.f32.mrf.mxu0 }
  0xf7   : > { %v1270_v62 = vmax.f32 %v1154_v55, 0.0  ;;  %v1437_v5 = vcombine.low %v1269_v44, %v1329_v54  ;;  %vm383_vm4 = vcmp.ge.s32.totalorder %v367_v17, 2 }
  0xf8   : > { %v1158_v63 = vpop.f32.mrf.mxu0 }
  0xf9   : > { %v1330_v8 = vcombine.high %v1270_v62, %v1270_v62  ;;  %v1159_v7 = vadd.f32 %v6181_v36, %v1158_v63  ;;  %v1485_v18 = vsel %vm6228_vm15, %v1437_v5, 0.0 }
  0xfa   : > { %v5470_v10 = vpop.f32.mrf.mxu0 }
  0xfb   : > { %v1438_v11 = vcombine.low %v1270_v62, %v1330_v8  ;;  %v1271_v12 = vmax.f32 %v1159_v7, 0.0  ;;  %v10683_v62 = vmov 0 }
  0xfc   : > { %v1161_v16 = vpop.f32.mrf.mxu0  ;;  %v10684_v62 = vsel %vm6308_vm3, 4294967295, %v10683_v62 }
  0xfd   : > { %v1486_v19 = vsel %vm6213_vm11, %v1438_v11, 0.0  ;;  %v1487_v21 = vsel %vm6237_vm1, %v1271_v12, 0.0  ;;  %v1162_v23 = vadd.f32 %v6181_v36, %v1161_v16  ;;  %vm6271_vm11 = vmand %vm6244_vm5, %vm10361_vm8  ;;  %v1331_v31 = vcombine.high %v1271_v12, %v1271_v12  ;;  %10685 = vst [vmem:[#allocation10_spill] sm:$0xff] %v10684_v62 }
  0xfe   : > { %v1521_v25 = vpack.c.bf16 %v1486_v19, %v1485_v18  ;;  %v1522_v27 = vpack.c.bf16 %v1487_v21, %v1487_v21  ;;  %v5471_v28 = vpop.f32.mrf.mxu0  ;;  %vm4105_vm15 = vmpackc.low %vm6271_vm11, %vm6271_vm11  ;;  %vm10360_vm1 = vsmask.f32 6400 }
  0xff   : > { %v1272_v33 = vmax.f32 %v1162_v23, 0.0  ;;  %v6302_v56 = vsel %vm4105_vm15, %v6071_v59, 4286644096  ;;  %vm4154_vm15 = vsmask.f32 7440 }
 0x100   : > { %2729 = vrot.lane.b32.xlu0 %v1521_v25, %s10435_s13  ;;  %v1166_v38 = vpop.f32.mrf.mxu0  ;;  %v2758_v41 = vrot.slane %v1521_v25, 1  ;;  %v2759_v2 = vrot.slane %v1522_v27, 1  ;;  %v2853_v42 = vrot.slane %v1521_v25, 2  ;;  %v2854_v43 = vrot.slane %v1522_v27, 2  ;;  %10682 = vst [vmem:[#allocation9_spill] sm:$0xff] %v6302_v56 }
 0x101   : > { %v1439_v44 = vcombine.low %v1331_v31, %v1272_v33  ;;  %v1167_v46 = vadd.f32 %v6181_v36, %v1166_v38  ;;  %v2746_v49 = vshrl.u32 %v1521_v25, 16  ;;  %v2748_v54 = vshll.u32 %v1521_v25, 16 }
 0x102   : > { %v5474_v52 = vpop.f32.mrf.mxu0  ;;  %v2760_v53 = vsel %vm10359_vm7, %v2758_v41, %v2759_v2  ;;  %v2753_v55 = vshll.u32 %v1522_v27, 16  ;;  %v1332_v57 = vcombine.high %v1272_v33, %v1272_v33  ;;  %v2781_v61 = vshrl.u32 %v1522_v27, 16 }
 0x103   : > { %v1273_v58 = vmax.f32 %v1167_v46, 0.0  ;;  %v2778_v60 = vrot.slane %v2746_v49, 1  ;;  %v2855_v3 = vsel %vm10357_vm10, %v2853_v42, %v2854_v43  ;;  %v2779_v59 = vrot.slane %v2748_v54, 2 }
 0x104   : > { %2761 = vrot.lane.b32.xlu0 %v2760_v53, %s10483_s14  ;;  %v1169_v63 = vpop.f32.mrf.mxu0  ;;  %v2784_v4 = vrot.slane %v2753_v55, 2  ;;  %v2750_v5 = vrot.slane %v2748_v54, 1  ;;  %v1488_v8 = vsel %vm6291_vm0, %v1439_v44, 0.0  ;;  %v2783_v10 = vrot.slane %v2781_v61, 1 }
 0x105   : > { %v1333_v7 = vcombine.high %v1273_v58, %v1273_v58  ;;  %v1440_v48 = vcombine.low %v1332_v57, %v1273_v58  ;;  %v1170_v11 = vadd.f32 %v6181_v36, %v1169_v63  ;;  %v2755_v16 = vrot.slane %v2753_v55, 1 }
 0x106   : > { %v5475_v12 = vpop.f32.mrf.mxu0  ;;  %v2751_v13 = vor.u32 %v2750_v5, %v2746_v49  ;;  %v2780_v21 = vor.u32 %v2779_v59, %v2778_v60  ;;  %v2785_v23 = vor.u32 %v2784_v4, %v2783_v10  ;;  %v4250_v38 = vshll.u32 %v6276_v34, 16 }
 0x107   : > { %v1489_v18 = vsel %vm6259_vm13, %v1440_v48, 0.0  ;;  %v1490_v19 = vsel %vm6308_vm3, %v1333_v7, 0.0  ;;  %vm395_vm10 = vcmp.lt.s32.totalorder %v367_v17, 18  ;;  %v1274_v41 = vmax.f32 %v1170_v11, 0.0 }
 0x108   : > { %v6322_v25 = vpack.c.bf16 %v1489_v18, %v1488_v8  ;;  %v6324_v27 = vpack.c.bf16 %v1490_v19, %v1490_v19  ;;  %2877 = vrot.lane.b32.xlu0 %v2855_v3, %s10533_s17  ;;  %v1174_v28 = vpop.f32.mrf.mxu0  ;;  %v6328_v31 = vsel %vm10358_vm14, %v2751_v13, %v2755_v16  ;;  %v4247_v42 = vor.u32 %v6285_v47, %v6278_v37  ;;  %vm6338_vm14 = vmand %vm383_vm4, %vm395_vm10 }
 0x109   : > { %10687 = vst [vmem:[#allocation12_spill] sm:$0xff] %v6328_v31  ;;  %v1175_v33 = vadd.f32 %v6181_v36, %v1174_v28  ;;  %v4269_v43 = vshrl.u32 %v6302_v56, 16  ;;  %v4272_v44 = vshll.u32 %v6302_v56, 16  ;;  %v2786_v52 = vsel %vm10360_vm1, %v2780_v21, %v2785_v23  ;;  %vm6348_vm7 = vmand %vm6338_vm14, %vm10361_vm8 }
 0x10a   : > { %10686 = vst [vmem:[#allocation11_spill] sm:$0xff] %v6322_v25  ;;  %2731 = vrot.lane.b32.xlu1 %v6322_v25, %s10435_s13  ;;  %v5478_v2 = vpop.f32.mrf.mxu0  ;;  %v1939_v53 = vrot.slane %v6324_v27, 1  ;;  %v1789_v54 = vshrl.u32 %v6324_v27, 16  ;;  %v1938_v55 = vrot.slane %v6322_v25, 1  ;;  %v1780_v57 = vshll.u32 %v6322_v25, 16  ;;  %vm4108_vm10 = vmpackc.low %vm6348_vm7, %vm6348_vm7 }
 0x10b   : > { %v1275_v49 = vmax.f32 %v1175_v33, 0.0  ;;  %vm391_vm4 = vcmp.lt.s32.totalorder %v6265_v29, 18  ;;  %v1778_v58 = vshrl.u32 %v6322_v25, 16  ;;  %v1785_v60 = vshll.u32 %v6324_v27, 16  ;;  %vm4106_vm1 = vmpackc.low %vm6244_vm5, %vm6244_vm5 }
 0x10c   : > { %2836 = vrot.lane.b32.xlu0 %v2786_v52, %s10516_s20  ;;  %v1177_v47 = vpop.f32.mrf.mxu0  ;;  %v6363_v61 = vrot.slane %v4250_v38, 5  ;;  %v1334_v63 = vcombine.high %v1274_v41, %v1274_v41  ;;  %v4248_v59 = vrot.slane %v4247_v42, 4  ;;  %v4271_v4 = vrot.slane %v4269_v43, 4  ;;  %vm6380_vm8 = vmor %vm4153_vm12, %vm4154_vm15 }
 0x10d   : > { %v4274_v5 = vrot.slane %v4272_v44, 5  ;;  %v1335_v8 = vcombine.high %v1275_v49, %v1275_v49  ;;  %v2856_v7 = vrot.slane %v6322_v25, 2  ;;  %v1782_v48 = vrot.slane %v1780_v57, 1 }
 0x10e   : > { %10692 = vst [vmem:[#allocation13_spill] sm:$0xff] %v6363_v61  ;;  %1964 = vrot.lane.b32.xlu1 %v1939_v53, %s10516_s20  ;;  %v5479_v3 = vpop.f32.mrf.mxu0  ;;  %v6376_v10 = vsel %vm4108_vm10, %v6087_v9, 4286644096  ;;  %v10693_v11 = vmov 0  ;;  %v1178_v12 = vadd.f32 %v6181_v36, %v1177_v47  ;;  %v2790_v13 = vrot.slane %v1789_v54, 1 }
 0x10f   : > { %v10694_v11 = vsel %vm6380_vm8, 4294967295, %v10693_v11  ;;  %v6389_v17 = vsel %vm10696_vm2, %v1938_v55, %v1939_v53  ;;  %v2857_v18 = vrot.slane %v6324_v27, 2  ;;  %v2787_v9 = vrot.slane %v1778_v58, 1 }
 0x110   : > { %10695 = vst [vmem:[#allocation14_spill] sm:$0xff] %v10694_v11  ;;  %1891 = vrot.lane.b32.xlu0 %v1789_v54, %s10483_s14  ;;  %v6386_v16 = vpop.f32.mrf.mxu0  ;;  %10697 = vst [vmem:[#allocation15_spill] sm:$0xff] %v6389_v17  ;;  %v2788_v19 = vrot.slane %v1780_v57, 2  ;;  %v2791_v21 = vrot.slane %v1785_v60, 2  ;;  %v4297_v23 = vshrl.u32 %v6376_v10, 16  ;;  %v6401_v33 = vsel %vm6380_vm8, %v4248_v59, %v6363_v61 }
 0x111   : > { %10698 = vst [vmem:[#allocation16_spill] sm:$0xff] %v6401_v33  ;;  %v5369_v38 = vrot.slane %v6222_v0, 9  ;;  %v10363_v2 = vrot.slane %v6276_v34, 5  ;;  %v6411_v42 = vsel %vm4106_vm1, %v6077_v1, 4286644096  ;;  %vm10700_vm2 = vcmp.ge.s32.totalorder %v6265_v29, 2 }
 0x112   : > { %2763 = vrot.lane.b32.xlu1 %v6389_v17, %s10483_s14  ;;  %v5482_v28 = vpop.f32.mrf.mxu0  ;;  %10699 = vst [vmem:[#allocation17_spill] sm:$0xff] %v6411_v42  ;;  %vm6417_vm15 = vmand %vm10700_vm2, %vm391_vm4  ;;  %v10701_v43 = vmov 0  ;;  %v1442_v44 = vcombine.low %v1275_v49, %v1335_v8  ;;  %v1783_v52 = vor.u32 %v1782_v48, %v1778_v58  ;;  %v4275_v47 = vor.u32 %v4274_v5, %v4271_v4  ;;  %v5732_v34 = vld [vmem:[%s6021_s22 + $0x50] sm:$0x3] }
 0x113   : > { %v10702_v43 = vsel %vm6417_vm15, 4294967295, %v10701_v43  ;;  %v4300_v53 = vshll.u32 %v6376_v10, 16  ;;  %vm10704_vm10 = vcmask 1046532   ;;  %vm10705_vm12 = vcmask 1042432   ;;  %vm10711_vm4 = vmpackc.low %vm6338_vm14, %vm6338_vm14 }
 0x114   : > { %10703 = vst [vmem:[#allocation18_spill] sm:$0xff] %v10702_v43  ;;  %vm6424_vm3 = vmor %vm10705_vm12, %vm10704_vm10  ;;  %v10706_v54 = vmov 0  ;;  %v1441_v1 = vcombine.low %v1274_v41, %v1334_v63  ;;  %v6428_v55 = vmax.f32 %v1178_v12, 0.0  ;;  %1962 = vrot.lane.b32.xlu0 %v6389_v17, %s10516_s20  ;;  %v6432_v29 = vpop.f32.mrf.mxu0  ;;  %vm10709_vm1 = vcmask 1045504  }
 0x115   : > { %v10707_v54 = vsel %vm6424_vm3, 4294967295, %v10706_v54  ;;  %v6435_v49 = vsel %vm10709_vm1, %v2856_v7, %v2857_v18  ;;  %v6443_v57 = vsel %vm10711_vm4, %v6102_v20, 4286644096  ;;  %vm10713_vm12 = vcmp.lt.s32.totalorder %v6193_v45, 18 }
 0x116   : > { %10708 = vst [vmem:[#allocation19_spill] sm:$0xff] %v10707_v54  ;;  %10710 = vst [vmem:[#allocation20_spill] sm:$0xff] %v6435_v49  ;;  %v10714_v41 = vmov 0  ;;  %v1787_v58 = vrot.slane %v1785_v60, 1  ;;  %v2789_v63 = vor.u32 %v2788_v19, %v2787_v9  ;;  %v2792_v3 = vor.u32 %v2791_v21, %v2790_v13  ;;  %2879 = vrot.lane.b32.xlu1 %v6435_v49, %s10533_s17  ;;  %v5483_v20 = vpop.f32.mrf.mxu0 }
 0x117   : > { %10712 = vst [vmem:[#allocation21_spill] sm:$0xff] %v6443_v57  ;;  %vm6449_vm2 = vmand %vm6417_vm15, %vm10713_vm12  ;;  %v4299_v59 = vrot.slane %v4297_v23, 4  ;;  %vm10717_vm10 = vcmp.ge.s32.totalorder %v6016_v6, 2  ;;  %v10718_v4 = vmov 0  ;;  %v4413_v5 = vmax.bf16 %v6401_v33, %v6222_v0 }
 0x118   : > { %v10715_v41 = vsel %vm6449_vm2, 4294967295, %v10714_v41  ;;  %vm6457_vm1 = vmand %vm6417_vm15, %vm10717_vm10  ;;  %v6469_v60 = vsel %vm6424_vm3, %v5369_v38, %v10363_v2  ;;  %v4278_v8 = vshll.u32 %v6411_v42, 16  ;;  %v1492_v7 = vsel %vm6417_vm15, %v1442_v44, 0.0  ;;  %v6483_v9 = vpop.f32.mrf.mxu0 }
 0x119   : > { %10716 = vst [vmem:[#allocation22_spill] sm:$0xff] %v10715_v41  ;;  %v10719_v4 = vsel %vm6457_vm1, 4294967295, %v10718_v4  ;;  %10721 = vst [vmem:[#allocation24_spill] sm:$0xff] %v6469_v60  ;;  %vm10722_vm4 = vsmask.f32 7424  ;;  %v4302_v12 = vrot.slane %v4300_v53, 5 }
 0x11a   : > { %10720 = vst [vmem:[#allocation23_spill] sm:$0xff] %v10719_v4  ;;  %v6475_v48 = vsel %vm10722_vm4, %v1783_v52, %v1787_v58  ;;  %v4306_v13 = vshll.u32 %v6443_v57, 16  ;;  %v1493_v18 = vsel %vm6449_vm2, %v6428_v55, 0.0  ;;  %v1491_v19 = vsel %vm6457_vm1, %v1441_v1, 0.0  ;;  %v5486_v44 = vpop.f32.mrf.mxu0 }
 0x11b   : > { %10723 = vst [vmem:[#allocation25_spill] sm:$0xff] %v6475_v48  ;;  %1889 = vrot.lane.b32.xlu0 %v6475_v48, %s10483_s14  ;;  %vm10724_vm12 = vsmask.f32 6400  ;;  %v4276_v23 = vrot.slane %v4275_v47, 4  ;;  %v4303_v28 = vor.u32 %v4302_v12, %v4299_v59  ;;  %v6490_v38 = vpack.c.bf16 %v1492_v7, %v1491_v19 }
 0x11c   : > { %v6488_v21 = vsel %vm10724_vm12, %v2789_v63, %v2792_v3  ;;  %v4549_v52 = vmax.bf16 %v6469_v60, %v4413_v5  ;;  %v6495_v53 = vpack.c.bf16 %v1493_v18, %v1493_v18  ;;  %v6497_v58 = vrot.slane %v4278_v8, 5  ;;  %v6503_v47 = vpop.f32.mrf.mxu0 }
 0x11d   : > { %10725 = vst [vmem:[#allocation26_spill] sm:$0xff] %v6488_v21  ;;  %10726 = vst [vmem:[#allocation27_spill] sm:$0xff] %v6490_v38  ;;  %2838 = vrot.lane.b32.xlu1 %v6488_v21, %s10516_s20  ;;  %v4304_v20 = vrot.slane %v4303_v28, 4  ;;  %v6499_v2 = vrot.slane %v4306_v13, 5  ;;  %v5370_v63 = vrot.slane %v6302_v56, 9  ;;  %vm10732_vm10 = vcmp.lt.s32.totalorder %v6193_v45, 18 }
 0x11e   : > { %10727 = vst [vmem:[#allocation28_spill] sm:$0xff] %v6495_v53  ;;  %10728 = vst [vmem:[#allocation29_spill] sm:$0xff] %v6497_v58  ;;  %v6508_v1 = vsel %vm6380_vm8, %v4276_v23, %v6497_v58  ;;  %v5487_v59 = vpop.f32.mrf.mxu0  ;;  %v4573_v5 = vmax.bf16 %v4549_v52, %v6302_v56  ;;  %v1941_v7 = vrot.slane %v6490_v38, 1  ;;  %v6529_v12 = vrot.slane %v6495_v53, 1 }
 0x11f   : > { %10729 = vst [vmem:[#allocation30_spill] sm:$0xff] %v6499_v2  ;;  %1996 = vrot.lane.b32.xlu0 %v6490_v38, %s10533_s17  ;;  %10730 = vst [vmem:[#allocation31_spill] sm:$0xff] %v6508_v1  ;;  %v6514_v3 = vsel %vm6380_vm8, %v4304_v20, %v6499_v2  ;;  %v10369_v13 = vrot.slane %v6411_v42, 5  ;;  %v1183_v18 = vadd.f32 %v6181_v36, %v6386_v16  ;;  %v6540_v19 = vshrl.u32 %v6495_v53, 16 }
 0x120   : > { %10731 = vst [vmem:[#allocation32_spill] sm:$0xff] %v6514_v3  ;;  %vm6523_vm4 = vmand %vm6244_vm5, %vm10732_vm10  ;;  %v1198_v23 = vpop.f32.mrf.mxu0  ;;  %v4416_v28 = vmax.bf16 %v6508_v1, %v6302_v56  ;;  %v364_v16 = vadd.s32 3, %v6172_v32  ;;  %v4628_v59 = vmax.bf16 %v4573_v5, %v6508_v1  ;;  %vm10737_vm10 = vcmask 1046528  }
 0x121   : > { %1998 = vrot.lane.b32.xlu1 %v6495_v53, %s10533_s17  ;;  %vm4107_vm12 = vmpackc.low %vm6523_vm4, %vm6523_vm4  ;;  %v1199_v44 = vadd.f32 %v6181_v36, %v1198_v23  ;;  %v6549_v52 = vsel %vm6424_vm3, %v5370_v63, %v10369_v13  ;;  %v6560_v23 = vsel %vm10737_vm10, %v1941_v7, %v6529_v12  ;;  %v1794_v56 = vshll.u32 %v6490_v38, 16 }
 0x122   : > { %10735 = vst [vmem:[#allocation33_spill] sm:$0xff] %v6549_v52  ;;  %v5490_v20 = vpop.f32.mrf.mxu0  ;;  %v6556_v60 = vsel %vm4107_vm12, %v6092_v14, 4286644096  ;;  %10738 = vst [vmem:[#allocation35_spill] sm:$0xff] %v6560_v23  ;;  %v1277_v13 = vmax.f32 %v1183_v18, 0.0  ;;  %v4552_v7 = vmax.bf16 %v6549_v52, %v4416_v28  ;;  %vm380_vm12 = vcmp.ge.s32.totalorder %v364_v16, 2 }
 0x123   : > { %2733 = vrot.lane.b32.xlu0 %v6490_v38, %s10435_s13  ;;  %10736 = vst [vmem:[#allocation34_spill] sm:$0xff] %v6556_v60  ;;  %v6563_v33 = vmax.f32 %v1199_v44, 0.0  ;;  %v1186_v20 = vadd.f32 %v6181_v36, %v6432_v29  ;;  %v4292_v5 = vshrl.u32 %v6556_v60, 16  ;;  %vm392_vm10 = vcmp.lt.s32.totalorder %v364_v16, 18 }
 0x124   : > { %v1201_v14 = vpop.f32.mrf.mxu0  ;;  %v1792_v29 = vshrl.u32 %v6490_v38, 16  ;;  %v1799_v18 = vshll.u32 %v6495_v53, 16  ;;  %v1796_v0 = vrot.slane %v1794_v56, 1  ;;  %v4576_v2 = vmax.bf16 %v4552_v7, %v6376_v10  ;;  %vm6588_vm2 = vmand %vm380_vm12, %vm392_vm10 }
 0x125   : > { %1895 = vrot.lane.b32.xlu1 %v6540_v19, %s10483_s14  ;;  %v1341_v1 = vcombine.high %v6563_v33, %v6563_v33  ;;  %v1202_v44 = vadd.f32 %v6181_v36, %v1201_v14  ;;  %v4666_v28 = vmax.bf16 %v4628_v59, %v6549_v52  ;;  %v1336_v58 = vcombine.high %v6428_v55, %v6428_v55 }
 0x126   : > { %v5491_v63 = vpop.f32.mrf.mxu0  ;;  %v1337_v14 = vcombine.high %v1277_v13, %v1277_v13  ;;  %v1278_v43 = vmax.f32 %v1186_v20, 0.0  ;;  %v4294_v31 = vrot.slane %v4292_v5, 4  ;;  %v6594_v55 = vmax.bf16 %v4576_v2, %v6514_v3 }
 0x127   : > { %1966 = vrot.lane.b32.xlu0 %v6560_v23, %s10516_s20  ;;  %v1282_v41 = vmax.f32 %v1202_v44, 0.0  ;;  %v10739_v63 = vmov 0  ;;  %v2794_v20 = vrot.slane %v1792_v29, 1  ;;  %v2795_v52 = vrot.slane %v1794_v56, 2 }
 0x128   : > { %v1206_v4 = vpop.f32.mrf.mxu0  ;;  %v10740_v63 = vsel %vm6588_vm2, 4294967295, %v10739_v63  ;;  %v2797_v5 = vrot.slane %v6540_v19, 1  ;;  %v6600_v42 = vmax.bf16 %v4666_v28, %v6376_v10  ;;  %v1797_v61 = vor.u32 %v1796_v0, %v1792_v29 }
 0x129   : > { %1968 = vrot.lane.b32.xlu1 %v6529_v12, %s10516_s20  ;;  %10741 = vst [vmem:[#allocation36_spill] sm:$0xff] %v10740_v63  ;;  %v1342_v7 = vcombine.high %v1282_v41, %v1282_v41  ;;  %v1447_v44 = vcombine.low %v1341_v1, %v1282_v41  ;;  %v1207_v59 = vadd.f32 %v6181_v36, %v1206_v4  ;;  %v1801_v62 = vrot.slane %v1799_v18, 1 }
 0x12a   : > { %v5494_v16 = vpop.f32.mrf.mxu0  ;;  %10742 = vst [vmem:[#allocation37_spill] sm:$0xff] %v6600_v42  ;;  %v2798_v41 = vrot.slane %v1799_v18, 2  ;;  %vm10743_vm12 = vcmp.lt.s32.totalorder %v6193_v45, 18  ;;  %v10744_v2 = vmov 0  ;;  %v1338_v0 = vcombine.high %v1278_v43, %v1278_v43 }
 0x12b   : > { %2077 = vrot.lane.b32.xlu0 %v6560_v23, %s10447_s21  ;;  %v6602_v1 = vmax.f32 %v1207_v59, 0.0  ;;  %vm6608_vm10 = vmand %vm6588_vm2, %vm10743_vm12  ;;  %v1443_v59 = vcombine.low %v1336_v58, %v1277_v13  ;;  %v1444_v16 = vcombine.low %v1337_v14, %v1278_v43  ;;  %v2796_v4 = vor.u32 %v2795_v52, %v2794_v20 }
 0x12c   : > { %v10745_v2 = vsel %vm6608_vm10, 4294967295, %v10744_v2  ;;  %v1209_v56 = vpop.f32.mrf.mxu0  ;;  %vm6624_vm15 = vmand %vm6338_vm14, %vm10743_vm12  ;;  %v6630_v30 = vrot.slane %v4294_v31, 4  ;;  %vm10750_vm1 = vcmp.ge.s32.totalorder %v6016_v6, 2  ;;  %vm10754_vm13 = vsmask.f32 7424 }
 0x12d   : > { %2044 = vrot.lane.b32.xlu1 %v6540_v19, %s10437_s24  ;;  %10746 = vst [vmem:[#allocation38_spill] sm:$0xff] %v10745_v2  ;;  %v1500_v19 = vsel %vm6271_vm11, %v1447_v44, 0.0  ;;  %v1448_v29 = vcombine.low %v1342_v7, %v6602_v1  ;;  %v1210_v18 = vadd.f32 %v6181_v36, %v1209_v56  ;;  %vm4110_vm11 = vmpackc.low %vm6624_vm15, %vm6624_vm15  ;;  %v10751_v7 = vmov 0 }
 0x12e   : > { %10749 = vst [vmem:[#allocation39_spill] sm:$0xff] %v6630_v30  ;;  %v5495_v44 = vpop.f32.mrf.mxu0  ;;  %vm6639_vm12 = vmand %vm6588_vm2, %vm10750_vm1  ;;  %v6644_v43 = vsel %vm10754_vm13, %v1797_v61, %v1801_v62  ;;  %v2799_v58 = vor.u32 %v2798_v41, %v2797_v5  ;;  %v10393_v52 = vrot.slane %v6556_v60, 5  ;;  %v1496_v20 = vsel %vm6608_vm10, %v1338_v0, 0.0 }
 0x12f   : > { %2765 = vrot.lane.b32.xlu0 %v6560_v23, %s10483_s14  ;;  %v10752_v7 = vsel %vm6639_vm12, 4294967295, %v10751_v7  ;;  %10755 = vst [vmem:[#allocation41_spill] sm:$0xff] %v6644_v43  ;;  %v1501_v31 = vsel %vm6244_vm5, %v1448_v29, 0.0  ;;  %v6657_v61 = vsel %vm4110_vm11, %v6105_v24, 4286644096  ;;  %v1494_v15 = vsel %vm6639_vm12, %v1443_v59, 0.0 }
 0x130   : > { %10753 = vst [vmem:[#allocation40_spill] sm:$0xff] %v10752_v7  ;;  %v6650_v13 = vpack.c.bf16 %v1501_v31, %v1500_v19  ;;  %v1214_v14 = vpop.f32.mrf.mxu0  ;;  %10757 = vst [vmem:[#allocation43_spill] sm:$0xff] %v6657_v61  ;;  %v4418_v5 = vmax.bf16 %v6630_v30, %v6556_v60  ;;  %v6667_v41 = vrot.slane %v10393_v52, 4  ;;  %v4320_v19 = vshrl.u32 %v6657_v61, 16  ;;  %v5726_v30 = vld [vmem:[%s6021_s22 + $0x38] sm:$0x3] }
 0x131   : > { %2079 = vrot.lane.b32.xlu1 %v6529_v12, %s10447_s21  ;;  %v1284_v12 = vmax.f32 %v1210_v18, 0.0  ;;  %v1215_v62 = vadd.f32 %v6181_v36, %v1214_v14  ;;  %v1495_v24 = vsel %vm6588_vm2, %v1444_v16, 0.0  ;;  %vm10759_vm5 = vsmask.f32 6400 }
 0x132   : > { %10756 = vst [vmem:[#allocation42_spill] sm:$0xff] %v6650_v13  ;;  %10758 = vst [vmem:[#allocation44_spill] sm:$0xff] %v6667_v41  ;;  %v5498_v0 = vpop.f32.mrf.mxu0  ;;  %v6673_v29 = vsel %vm10759_vm5, %v2796_v4, %v2799_v58  ;;  %v6675_v44 = vpack.c.bf16 %v1496_v20, %v1496_v20  ;;  %v4322_v16 = vrot.slane %v4320_v19, 4  ;;  %v4554_v4 = vmax.bf16 %v6667_v41, %v4418_v5  ;;  %v5724_v41 = vld [vmem:[%s6021_s22 + $0x30] sm:$0xf] }
 0x133   : > { %2042 = vrot.lane.b32.xlu0 %v6644_v43, %s10437_s24  ;;  %v1344_v56 = vcombine.high %v1284_v12, %v1284_v12  ;;  %10760 = vst [vmem:[#allocation45_spill] sm:$0xff] %v6673_v29  ;;  %v1285_v59 = vmax.f32 %v1215_v62, 0.0  ;;  %v6680_v0 = vpack.c.bf16 %v1495_v24, %v1494_v15  ;;  %v5371_v20 = vrot.slane %v6376_v10, 9 }
 0x134   : > { %10761 = vst [vmem:[#allocation46_spill] sm:$0xff] %v6675_v44  ;;  %v1217_v31 = vpop.f32.mrf.mxu0  ;;  %v10397_v15 = vrot.slane %v6443_v57, 5  ;;  %v6699_v5 = vrot.slane %v4322_v16, 4  ;;  %v4578_v19 = vmax.bf16 %v4554_v4, %v6657_v61  ;;  %v10396_v16 = vrot.slane %v6657_v61, 5 }
 0x135   : > { %1893 = vrot.lane.b32.xlu1 %v6644_v43, %s10483_s14  ;;  %v1449_v18 = vcombine.low %v1284_v12, %v1344_v56  ;;  %v1345_v14 = vcombine.high %v1285_v59, %v1285_v59  ;;  %v1218_v52 = vadd.f32 %v6181_v36, %v1217_v31  ;;  %10762 = vst [vmem:[#allocation47_spill] sm:$0xff] %v6680_v0  ;;  %vm10774_vm5 = vcmask 1041408  }
 0x136   : > { %v5499_v58 = vpop.f32.mrf.mxu0  ;;  %10764 = vst [vmem:[#allocation49_spill] sm:$0xff] %v6699_v5  ;;  %v10766_v4 = vmax.bf16 %v6514_v3, %v6376_v10  ;;  %v6730_v10 = vrot.slane %v10396_v16, 4  ;;  %v1574_v60 = vrot.slane %v5726_v30, 5  ;;  %v1588_v22 = vrot.slane %v5732_v34, 5 }
 0x137   : > { %2840 = vrot.lane.b32.xlu0 %v6673_v29, %s10516_s20  ;;  %v1503_v12 = vsel %vm6348_vm7, %v1449_v18, 0.0  ;;  %v1450_v56 = vcombine.low %v1285_v59, %v1345_v14  ;;  %v6693_v31 = vmax.f32 %v1218_v52, 0.0  ;;  %v368_v14 = vadd.s32 7, %v6172_v32 }
 0x138   : > { %v1222_v62 = vpop.f32.mrf.mxu0  ;;  %v6710_v52 = vsel %vm6424_vm3, %v5371_v20, %v10397_v15  ;;  %10767 = vst [vmem:[#allocation51_spill] sm:$0xff] %v6730_v10 }
 0x139   : > { %2002 = vrot.lane.b32.xlu1 %v6675_v44, %s10533_s17  ;;  %v1504_v24 = vsel %vm6338_vm14, %v1450_v56, 0.0  ;;  %v1346_v59 = vcombine.high %v6693_v31, %v6693_v31  ;;  %v1223_v46 = vadd.f32 %v6181_v36, %v1222_v62  ;;  %10765 = vst [vmem:[#allocation50_spill] sm:$0xff] %v6710_v52  ;;  %v6719_v58 = vmax.bf16 %v6710_v52, %v10766_v4 }
 0x13a   : > { %v6697_v37 = vpack.c.bf16 %v1504_v24, %v1503_v12  ;;  %v5502_v18 = vpop.f32.mrf.mxu0  ;;  %v4669_v12 = vmax.bf16 %v6594_v55, %v6710_v52  ;;  %vm384_vm7 = vcmp.ge.s32.totalorder %v368_v14, 2  ;;  %vm396_vm13 = vcmp.lt.s32.totalorder %v368_v14, 18  ;;  %v1611_v55 = vld [vmem:[%s10770_s3] sm:$0x3]  ;;  %s5886_s3 = smov 52  }
 0x13b   : > { %2000 = vrot.lane.b32.xlu0 %v6680_v0, %s10533_s17  ;;  %v1287_v62 = vmax.f32 %v1223_v46, 0.0  ;;  %v4421_v24 = vmax.bf16 %v6699_v5, %v6657_v61  ;;  %vm6732_vm14 = vmand %vm384_vm7, %vm396_vm13  ;;  %v4633_v46 = vmax.bf16 %v4578_v19, %v6699_v5  ;;  %5612 = vmatprep.subr.msk.bf16.mxu1 %vm10774_vm5, %v1611_v55  ;;  %v1191_v19 = vadd.f32 %v6181_v36, %v6483_v9  ;;  %v5718_v18 = vld [vmem:[%s6021_s22 + $0x18] sm:$0xf] }
 0x13c   : > { %10763 = vst [vmem:[#allocation48_spill] sm:$0xff] %v6697_v37  ;;  %v1225_v56 = vpop.f32.mrf.mxu0  ;;  %vm6744_vm11 = vmand %vm6732_vm14, %vm10750_vm1  ;;  %v5317_v61 = vrot.slane %v5724_v41, 9  ;;  %v5727_v41 = vld [vmem:[%s6021_s22 + $0x3c] sm:$0xf] }
 0x13d   : > { %2113 = vrot.lane.b32.xlu1 %v6675_v44, %s10394_s25  ;;  %v1226_v20 = vadd.f32 %v6181_v36, %v1225_v56  ;;  %v1347_v56 = vcombine.high %v1287_v62, %v1287_v62  ;;  %v1451_v16 = vcombine.low %v1346_v59, %v1287_v62  ;;  %vm4111_vm7 = vmpackc.low %vm6744_vm11, %vm6744_vm11  ;;  %v6763_v59 = vrot.slane %v6675_v44, 1 }
 0x13e   : > { %v5503_v14 = vpop.f32.mrf.mxu0  ;;  %vm10776_vm13 = vmmov %vm10774_vm5  ;;  %v1944_v62 = vrot.slane %v6680_v0, 1  ;;  %vm10778_vm5 = vcmp.lt.s32.totalorder %v6193_v45, 18  ;;  %v4671_v4 = vmax.bf16 %v4633_v46, %v6730_v10 }
 0x13f   : > { %2111 = vrot.lane.b32.xlu0 %v6680_v0, %s10394_s25  ;;  %v6748_v15 = vmax.f32 %v1226_v20, 0.0  ;;  %v6754_v14 = vshrl.u32 %v6675_v44, 16  ;;  %v1661_v2 = vsel %vm10776_vm13, %v1611_v55, 0  ;;  %vm4112_vm1 = vmpackc.low %vm6732_vm14, %vm6732_vm14  ;;  %v6770_v20 = vsel %vm4111_vm7, %v6110_v26, 4286644096  ;;  %s10481_s25 = smov 32  }
 0x140   : > { %5525 = vmatpush3.bf16.msra.mxu1 %v1661_v2  ;;  %v1506_v55 = vsel %vm6744_vm11, %v1451_v16, 0.0  ;;  %v6778_v63 = vsel %vm4112_vm1, %v6122_v35, 4286644096  ;;  %v4325_v7 = vshrl.u32 %v6770_v20, 16  ;;  %v4328_v3 = vshll.u32 %v6770_v20, 16  ;;  %vm6786_vm7 = vmand %vm6732_vm14, %vm10778_vm5 }
 0x141   : > { %2735 = vrot.lane.b32.xlu1 %v6680_v0, %s10435_s13  ;;  %10773 = vst [vmem:[#allocation52_spill] sm:$0xff] %v6748_v15  ;;  %10775 = vst [vmem:[#allocation53_spill] sm:$0xff] %v6754_v14  ;;  %v1452_v9 = vcombine.low %v1347_v56, %v6748_v15  ;;  %v10779_v26 = vmov 0  ;;  %v6791_v2 = vmax.bf16 %v6730_v10, %v4421_v24  ;;  %v4334_v16 = vshll.u32 %v6778_v63, 16 }
 0x142   : > { %10777 = vst [vmem:[#allocation54_spill] sm:$0xff] %v6778_v63  ;;  %v10780_v26 = vsel %vm6786_vm7, 4294967295, %v10779_v26  ;;  %v4579_v35 = vmax.bf16 %v6719_v58, %v6770_v20  ;;  %vm4113_vm11 = vmpackc.low %vm6786_vm7, %vm6786_vm7  ;;  %v4327_v56 = vrot.slane %v4325_v7, 4  ;;  %v4330_v42 = vrot.slane %v4328_v3, 5 }
 0x143   : > { %3343 = vrot.lane.b32.xlu0 %v6675_v44, %s10435_s13  ;;  %10781 = vst [vmem:[#allocation55_spill] sm:$0xff] %v10780_v26  ;;  %v6803_v24 = vmax.bf16 %v4669_v12, %v6770_v20  ;;  %v1507_v52 = vsel %vm6732_vm14, %v1452_v9, 0.0  ;;  %v6812_v46 = vsel %vm4113_vm11, %v6132_v39, 4286644096  ;;  %vm10785_vm13 = vcmask 1046528  }
 0x144   : > { %v6807_v58 = vpack.c.bf16 %v1507_v52, %v1506_v55  ;;  %v4331_v5 = vor.u32 %v4330_v42, %v4327_v56  ;;  %10784 = vst [vmem:[#allocation58_spill] sm:$0xff] %v6812_v46  ;;  %v6816_v3 = vsel %vm10785_vm13, %v1944_v62, %v6763_v59  ;;  %v6818_v7 = vmax.f32 %v1191_v19, 0.0  ;;  %v5719_v55 = vld [vmem:[%s6021_s22 + $0x1c] sm:$0xf]  ;;  %v5721_v12 = vld [vmem:[%s6021_s22 + $0x24] sm:$0xf] }
 0x145   : > { %1899 = vrot.lane.b32.xlu1 %v6754_v14, %s10483_s14  ;;  %10782 = vst [vmem:[#allocation56_spill] sm:$0xff] %v6803_v24  ;;  %10786 = vst [vmem:[#allocation59_spill] sm:$0xff] %v6816_v3  ;;  %v6824_v42 = vrot.slane %v4334_v16, 5  ;;  %v6827_v39 = vmax.bf16 %v4671_v4, %v6812_v46  ;;  %v5315_v9 = vrot.slane %v5718_v18, 9  ;;  %v1194_v19 = vadd.f32 %v6181_v36, %v6503_v47  ;;  %v5720_v16 = vld [vmem:[%s6021_s22 + $0x20] sm:$0x3] }
 0x146   : > { %10783 = vst [vmem:[#allocation57_spill] sm:$0xff] %v6807_v58  ;;  %v4332_v52 = vrot.slane %v4331_v5, 4  ;;  %v1557_v56 = vrot.slane %v5719_v55, 5  ;;  %v1560_v4 = vrot.slane %v5720_v16, 5  ;;  %v5316_v18 = vrot.slane %v5721_v12, 9 }
 0x147   : > { %3365 = vrot.lane.b32.xlu0 %v6763_v59, %s10483_s14  ;;  %10787 = vst [vmem:[#allocation60_spill] sm:$0xff] %v6824_v42  ;;  %10788 = vst [vmem:[#allocation61_spill] sm:$0xff] %v6827_v39  ;;  %v5722_v39 = vld [vmem:[%s6021_s22 + $0x28] sm:$0xf]  ;;  %v1813_v12 = vshll.u32 %v6675_v44, 16  ;;  %v6858_v47 = vmax.f32 %v1194_v19, 0.0 }
 0x148   : > { %v6839_v5 = vsel %vm6380_vm8, %v4332_v52, %v6824_v42  ;;  %v1564_v10 = vrot.slane %v5722_v39, 5  ;;  %v1558_v39 = vsel %vm6424_vm3, %v5315_v9, %v1557_v56  ;;  %v1559_v16 = vrot.slane %v1557_v56, 4  ;;  %v5723_v52 = vld [vmem:[%s6021_s22 + $0x2c] sm:$0x3] }
 0x149   : > { %1972 = vrot.lane.b32.xlu1 %v6763_v59, %s10516_s20  ;;  %10789 = vst [vmem:[#allocation62_spill] sm:$0xff] %v6839_v5  ;;  %v6849_v55 = vmax.bf16 %v4579_v35, %v6839_v5  ;;  %v1806_v35 = vshrl.u32 %v6680_v0, 16  ;;  %v1567_v24 = vrot.slane %v5723_v52, 5  ;;  %v10790_v9 = vshll.u32 %v6680_v0, 16 }
 0x14a   : > { %v1566_v36 = vrot.slane %v1564_v10, 4  ;;  %v1565_v62 = vsel %vm6424_vm3, %v5316_v18, %v1564_v10  ;;  %v1561_v19 = vsel %vm6424_vm3, %v1559_v16, %v1560_v4  ;;  %v5725_v18 = vld [vmem:[%s6021_s22 + $0x34] sm:$0xf]  ;;  %v2805_v42 = vrot.slane %v1813_v12, 2  ;;  %v5728_v16 = vld [vmem:[%s6021_s22 + $0x40] sm:$0xf] }
 0x14b   : > { %1970 = vrot.lane.b32.xlu0 %v6816_v3, %s10516_s20  ;;  %v1810_v56 = vrot.slane %v10790_v9, 1  ;;  %v5323_v57 = vcombine.low %v1558_v39, %v1561_v19  ;;  %v1571_v52 = vrot.slane %v5725_v18, 5  ;;  %v1815_v9 = vrot.slane %v1813_v12, 1  ;;  %v5729_v19 = vld [vmem:[%s6021_s22 + $0x44] sm:$0x3] }
 0x14c   : > { %v1568_v10 = vsel %vm6424_vm3, %v1566_v36, %v1567_v24  ;;  %v5318_v39 = vrot.slane %v5727_v41, 9  ;;  %vm10791_vm14 = vcmask 31744   ;;  %v1578_v30 = vrot.slane %v5728_v16, 5  ;;  %v5730_v12 = vld [vmem:[%s6021_s22 + $0x48] sm:$0xf] }
 0x14d   : > { %2048 = vrot.lane.b32.xlu1 %v6754_v14, %s10437_s24  ;;  %v5324_v4 = vcombine.low %v1565_v62, %v1568_v10  ;;  %5526 = vmatprep.mubr.msk.bf16.mxu1 %vm10791_vm14, %v5323_v57  ;;  %v1572_v24 = vsel %vm6424_vm3, %v5317_v61, %v1571_v52  ;;  %v1573_v36 = vrot.slane %v1571_v52, 4  ;;  %v1581_v18 = vrot.slane %v5729_v19, 5  ;;  %vm10792_vm1 = vmmov %vm10791_vm14  ;;  %v5731_v41 = vld [vmem:[%s6021_s22 + $0x4c] sm:$0xf]  ;;  %v5733_v19 = vld [vmem:[%s6021_s22 + $0x58] sm:$0xf] }
 0x14e   : > { %v1811_v62 = vor.u32 %v1810_v56, %v1806_v35  ;;  %v5319_v10 = vrot.slane %v5730_v12, 9  ;;  %v1585_v57 = vrot.slane %v5731_v41, 5  ;;  %v1579_v52 = vsel %vm6424_vm3, %v5318_v39, %v1578_v30  ;;  %vm10797_vm11 = vmmov %vm10792_vm1 }
 0x14f   : > { %2081 = vrot.lane.b32.xlu0 %v6816_v3, %s10447_s21  ;;  %5527 = vmatmul.mubr.msk.bf16.vlgmr.msra.gmra.mxu1 %vm10792_vm1, %v5324_v4  ;;  %v1575_v61 = vsel %vm6424_vm3, %v1573_v36, %v1574_v60  ;;  %v1580_v16 = vrot.slane %v1578_v30, 4  ;;  %v1592_v51 = vrot.slane %v5733_v19, 5  ;;  %v1340_v56 = vcombine.high %v6858_v47, %v6858_v47 }
 0x150   : > { %v10793_v4 = vrot.slane %v6754_v14, 1  ;;  %v5325_v12 = vcombine.low %v1572_v24, %v1575_v61  ;;  %v1586_v34 = vsel %vm6424_vm3, %v5319_v10, %v1585_v57  ;;  %v1587_v60 = vrot.slane %v1585_v57, 4 }
 0x151   : > { %2083 = vrot.lane.b32.xlu1 %v6763_v59, %s10447_s21  ;;  %v2801_v36 = vrot.slane %v1806_v35, 1  ;;  %v10794_v39 = vshll.u32 %v6680_v0, 16  ;;  %v1582_v41 = vsel %vm6424_vm3, %v1580_v16, %v1581_v18  ;;  %vm10795_vm5 = vsmask.f32 7424  ;;  %v5734_v35 = vld [vmem:[%s6021_s22 + $0x54] sm:$0xf] }
 0x152   : > { %v6909_v19 = vsel %vm10795_vm5, %v1811_v62, %v1815_v9  ;;  %5530 = vmatprep.mubr.msk.bf16.mxu1 %vm10797_vm11, %v5325_v12  ;;  %v5326_v24 = vcombine.low %v1579_v52, %v1582_v41  ;;  %v1589_v10 = vsel %vm6424_vm3, %v1587_v60, %v1588_v22  ;;  %v5320_v57 = vrot.slane %v5734_v35, 9  ;;  %v6917_v16 = vld [vmem:[%s6021_s22 + $0x64] sm:$0xf]  ;;  %v6930_v60 = vld [vmem:[%s6021_s22 + $0x60] sm:$0xf]  ;;  %vm10804_vm5 = vmmov %vm10792_vm1 }
 0x153   : > { %2192 = vrot.lane.b32.xlu0 %v6816_v3, %s10481_s25  ;;  %v2802_v30 = vrot.slane %v10794_v39, 2  ;;  %10796 = vst [vmem:[#allocation63_spill] sm:$0xff] %v6909_v19  ;;  %v5327_v61 = vcombine.low %v1586_v34, %v1589_v10  ;;  %v5735_v39 = vld [vmem:[%s6021_s22 + $0x5c] sm:$0x3]  ;;  %v10798_v9 = vcombine.high %v6818_v7, %v6818_v7  ;;  %v1446_v52 = vcombine.low %v6858_v47, %v1340_v56  ;;  %v6934_v35 = vld [vmem:[%s6021_s22 + $0x68] sm:$0x3] }
 0x154   : > { %v1595_v18 = vrot.slane %v5735_v39, 5  ;;  %v10799_v22 = vrot.slane %v6754_v14, 1  ;;  %v5321_v41 = vrot.slane %v6930_v60, 9  ;;  %v1602_v39 = vrot.slane %v6934_v35, 5 }
 0x155   : > { %2159 = vrot.lane.b32.xlu1 %v6754_v14, %s10423_s26  ;;  %v1445_v62 = vcombine.low %v6818_v7, %v10798_v9  ;;  %v2803_v34 = vor.u32 %v2802_v30, %v2801_v36  ;;  %vm10800_vm13 = vcmp.lt.s32.totalorder %v6193_v45, 18  ;;  %v10801_v7 = vmov 0  ;;  %v6957_v36 = vld [vmem:[%s6021_s22 + $0x70] sm:$0xf] }
 0x156   : > { %v2806_v12 = vor.u32 %v2805_v42, %v10799_v22  ;;  %vm6941_vm14 = vmand %vm6185_vm6, %vm10800_vm13  ;;  %v1593_v42 = vsel %vm6424_vm3, %v5320_v57, %v1592_v51  ;;  %v6954_v56 = vshrl.u32 %v6697_v37, 16  ;;  %v1606_v30 = vrot.slane %v6957_v36, 5  ;;  %v6982_v22 = vld [vmem:[%s6021_s22 + $0x6c] sm:$0xf] }
 0x157   : > { %3394 = vrot.lane.b32.xlu0 %v10793_v4, %s10516_s20  ;;  %v1594_v4 = vrot.slane %v1592_v51, 4  ;;  %v10802_v7 = vsel %vm6941_vm14, 4294967295, %v10801_v7  ;;  %5531 = vmatmul.mubr.msk.bf16.gmra.mxu1 %vm10792_vm1, %v5326_v24  ;;  %v1497_v57 = vsel %vm6200_vm9, %v1445_v62, 0.0  ;;  %vm10806_vm11 = vsmask.f32 6400  ;;  %vm10814_vm9 = vmmov %vm10792_vm1 }
 0x158   : > { %10803 = vst [vmem:[#allocation64_spill] sm:$0xff] %v10802_v7  ;;  %5534 = vmatprep.mubr.msk.bf16.mxu1 %vm10804_vm5, %v5327_v61  ;;  %10805 = vst [vmem:[#allocation65_spill] sm:$0xff] %v6954_v56  ;;  %v1498_v61 = vsel %vm6185_vm6, %v1446_v52, 0.0  ;;  %v6979_v9 = vshll.u32 %v6697_v37, 16  ;;  %v5322_v50 = vrot.slane %v6982_v22, 9  ;;  %v6986_v40 = vshrl.u32 %v6807_v58, 16 }
 0x159   : > { %2194 = vrot.lane.b32.xlu1 %v6763_v59, %s10481_s25  ;;  %v1599_v59 = vrot.slane %v6917_v16, 5  ;;  %v1596_v47 = vsel %vm6424_vm3, %v1594_v4, %v1595_v18  ;;  %v1499_v4 = vsel %vm6941_vm14, %v6563_v33, 0.0  ;;  %v6974_v18 = vsel %vm10806_vm11, %v2803_v34, %v2806_v12  ;;  %v6989_v33 = vld [vmem:[%s6021_s22 + $0x74] sm:$0x3]  ;;  %vm10812_vm6 = vmmov %vm10792_vm1 }
 0x15a   : > { %10807 = vst [vmem:[#allocation66_spill] sm:$0xff] %v6974_v18  ;;  %10808 = vst [vmem:[#allocation67_spill] sm:$0xff] %v6986_v40  ;;  %v1608_v52 = vrot.slane %v1606_v30, 4  ;;  %v1609_v12 = vrot.slane %v6989_v33, 5  ;;  %v10425_v34 = vrot.slane %v6954_v56, 7  ;;  %v369_v14 = vadd.s32 8, %v6172_v32 }
 0x15b   : > { %1897 = vrot.lane.b32.xlu0 %v6909_v19, %s10483_s14  ;;  %v1601_v10 = vrot.slane %v1599_v59, 4  ;;  %v1600_v24 = vsel %vm6424_vm3, %v5321_v41, %v1599_v59  ;;  %v5328_v59 = vcombine.low %v1593_v42, %v1596_v47  ;;  %v6993_v41 = vpack.c.bf16 %v1499_v4, %v1499_v4  ;;  %vm10817_vm13 = vmmov %vm10792_vm1 }
 0x15c   : > { %v7008_v42 = vshll.u32 %v6807_v58, 16  ;;  %v10426_v47 = vrot.slane %v6986_v40, 7  ;;  %vm10821_vm1 = vcmask 1046528   ;;  %vm385_vm5 = vcmp.ge.s32.totalorder %v369_v14, 2 }
 0x15d   : > { %2767 = vrot.lane.b32.xlu1 %v6816_v3, %s10483_s14  ;;  %v1603_v51 = vsel %vm6424_vm3, %v1601_v10, %v1602_v39  ;;  %10809 = vst [vmem:[#allocation68_spill] sm:$0xff] %v6993_v41  ;;  %v7000_v10 = vor.u32 %v10425_v34, %v6979_v9  ;;  %v7002_v39 = vpack.c.bf16 %v1498_v61, %v1497_v57  ;;  %v7038_v4 = vrot.slane %v6993_v41, 1 }
 0x15e   : > { %v5329_v62 = vcombine.low %v1600_v24, %v1603_v51  ;;  %10813 = vst [vmem:[#allocation71_spill] sm:$0xff] %v7008_v42  ;;  %v1607_v24 = vsel %vm6424_vm3, %v5322_v50, %v1606_v30  ;;  %v1610_v51 = vsel %vm6424_vm3, %v1608_v52, %v1609_v12  ;;  %v7021_v57 = vor.u32 %v10426_v47, %v7008_v42 }
 0x15f   : > { %2046 = vrot.lane.b32.xlu0 %v6909_v19, %s10437_s24  ;;  %10810 = vst [vmem:[#allocation69_spill] sm:$0xff] %v7000_v10  ;;  %10811 = vst [vmem:[#allocation70_spill] sm:$0xff] %v7002_v39  ;;  %5535 = vmatmul.mubr.msk.bf16.gmra.mxu1 %vm10812_vm6, %v5328_v59  ;;  %v5330_v61 = vcombine.low %v1607_v24, %v1610_v51  ;;  %v7033_v30 = vshrl.u32 %v6993_v41, 16  ;;  %v1947_v59 = vrot.slane %v7002_v39, 1  ;;  %v7044_v50 = vshll.u32 %v7002_v39, 16 }
 0x160   : > { %5538 = vmatprep.mubr.msk.bf16.mxu1 %vm10814_vm9, %v5329_v62  ;;  %10815 = vst [vmem:[#allocation72_spill] sm:$0xff] %v7021_v57  ;;  %10819 = vst [vmem:[#allocation74_spill] sm:$0xff] %v7038_v4  ;;  %v4348_v52 = vshrl.u32 %v6812_v46, 16  ;;  %v7056_v24 = vshrl.u32 %v7002_v39, 16  ;;  %v10439_v51 = vshll.u32 %v6993_v41, 16  ;;  %v1343_v3 = vcombine.high %v6602_v1, %v6602_v1 }
 0x161   : > { %2842 = vrot.lane.b32.xlu1 %v6974_v18, %s10516_s20  ;;  %10818 = vst [vmem:[#allocation73_spill] sm:$0xff] %v7033_v30  ;;  %v7053_v12 = vsel %vm10821_vm1, %v1947_v59, %v7038_v4  ;;  %v1824_v34 = vrot.slane %v7044_v50, 1  ;;  %v10443_v59 = vrot.slane %v6778_v63, 5  ;;  %v7086_v1 = vld [vmem:[%s10659_s2] ss:$0 sm:$0xff]  ;;  %vm397_vm11 = vcmp.lt.s32.totalorder %v369_v14, 18 }
 0x162   : > { %10822 = vst [vmem:[#allocation76_spill] sm:$0xff] %v7053_v12  ;;  %10823 = vst [vmem:[#allocation77_spill] sm:$0xff] %v7056_v24  ;;  %v1829_v18 = vrot.slane %v10439_v51, 1  ;;  %v10826_v51 = vmax.bf16 %v6839_v5, %v6770_v20  ;;  %vm10832_vm9 = vcmp.ge.s32.totalorder %v6016_v6, 2  ;;  %vm10836_vm1 = vsmask.f32 7424 }
 0x163   : > { %2157 = vrot.lane.b32.xlu0 %v6909_v19, %s10423_s26  ;;  %s10816_s26 = smov 24   ;;  %vm7103_vm6 = vmand %vm385_vm5, %vm397_vm11  ;;  %v10838_v5 = vrot.slane %v7056_v24, 7  ;;  %vm10843_vm11 = vcmp.lt.s32.totalorder %v6193_v45, 18  ;;  %v2809_v57 = vrot.slane %v7044_v50, 2  ;;  %s5882_s2 = smov 44  }
 0x165   : > { %2006 = vrot.lane.b32.xlu1 %v6993_v41, %s10533_s17 }
 0x167   : > { %2004 = vrot.lane.b32.xlu0 %v7002_v39, %s10533_s17  ;;  %5539 = vmatmul.mubr.msk.bf16.gmra.mxu1 %vm10817_vm13, %v5330_v61  ;;  %v5372_v61 = vrot.slane %v6770_v20, 9  ;;  %vm7115_vm13 = vmand %vm7103_vm6, %vm10832_vm9 }
 0x168   : > { %vm4114_vm5 = vmpackc.low %vm7115_vm13, %vm7115_vm13 }
 0x169   : > { %2117 = vrot.lane.b32.xlu1 %v6993_v41, %s10816_s26  ;;  %v7080_v19 = vsel %vm6424_vm3, %v5372_v61, %v10443_v59  ;;  %vm7164_vm9 = vmand %vm7103_vm6, %vm10843_vm11 }
 0x16a   : > { %10825 = vst [vmem:[#allocation79_spill] sm:$0xff] %v7080_v19  ;;  %v7093_v49 = vmax.bf16 %v7080_v19, %v10826_v51  ;;  %v4672_v63 = vmax.bf16 %v6849_v55, %v7080_v19  ;;  %v7132_v19 = vor.u32 %v10838_v5, %v7044_v50  ;;  %v7147_v5 = vsel %vm4114_vm5, %v6930_v60, 4286644096 }
 0x16b   : > { %2115 = vrot.lane.b32.xlu0 %v7002_v39, %s10816_s26  ;;  %v4353_v8 = vshrl.u32 %v7147_v5, 16  ;;  %vm10849_vm5 = vcmask 1041408  }
 0x16c   : > { %v7199_v44 = vmax.bf16 %v4672_v63, %v7147_v5  ;;  %vm10871_vm11 = vmmov %vm10849_vm5 }
 0x16d   : > { %3345 = vrot.lane.b32.xlu1 %v6993_v41, %s10435_s13  ;;  %v4355_v43 = vrot.slane %v4353_v8, 4 }
 0x16e   : > { %10850 = vst [vmem:[#allocation88_spill] sm:$0xff] %v7199_v44 }
 0x16f   : > { %2737 = vrot.lane.b32.xlu0 %v7002_v39, %s10435_s13  ;;  %s10840_s13 = smov 28  }
 0x171   : > { %1903 = vrot.lane.b32.xlu1 %v7033_v30, %s10483_s14 }
 0x172   : > { %v7046_v62 = vpop.permute.xlu0 %2729 }
 0x173   : > { %2899 = vrot.lane.b32.xlu0 %v7002_v39, %s10437_s24  ;;  %10820 = vst [vmem:[#allocation75_spill] sm:$0xff] %v7046_v62  ;;  %v4350_v62 = vrot.slane %v4348_v52, 4  ;;  %v1825_v52 = vor.u32 %v1824_v34, %v7056_v24 }
 0x175   : > { %1976 = vrot.lane.b32.xlu1 %v7038_v4, %s10516_s20  ;;  %v7101_v34 = vrot.slane %v4350_v62, 4  ;;  %v7121_v62 = vsel %vm6523_vm4, %v1343_v3, 0.0  ;;  %vm4115_vm4 = vmpackc.low %vm7103_vm6, %vm7103_vm6 }
 0x176   : > { %v7063_v47 = vpop.permute.xlu0 %2761  ;;  %v7156_v21 = vsel %vm4115_vm4, %v6917_v16, 4286644096  ;;  %v10847_v16 = vrot.slane %v6812_v46, 5 }
 0x177   : > { %1974 = vrot.lane.b32.xlu0 %v7053_v12, %s10516_s20  ;;  %10824 = vst [vmem:[#allocation78_spill] sm:$0xff] %v7063_v47  ;;  %v1230_v47 = vpop.f32.mrf.mxu0  ;;  %10828 = vst [vmem:[#allocation81_spill] sm:$0xff] %v7101_v34  ;;  %v4362_v17 = vshll.u32 %v7156_v21, 16  ;;  %v4366_v29 = vshrl.u32 %v7156_v21, 16  ;;  %v4424_v23 = vmax.bf16 %v7101_v34, %v6812_v46 }
 0x178   : > { %v1231_v7 = vadd.f32 %v7086_v1, %v1230_v47  ;;  %10842 = vst [vmem:[#allocation86_spill] sm:$0xff] %v7156_v21 }
 0x179   : > { %2052 = vrot.lane.b32.xlu1 %v7033_v30, %s10437_s24  ;;  %v5506_v59 = vpop.f32.mrf.mxu0  ;;  %v4368_v39 = vrot.slane %v4366_v29, 4  ;;  %s10893_s24 = smov 4  }
 0x17a   : > { %v7097_v61 = vpop.permute.xlu0 %2877  ;;  %v1289_v20 = vmax.f32 %v1231_v7, 0.0  ;;  %v7124_v7 = vrot.slane %v7033_v30, 1  ;;  %v7127_v59 = vsel %vm10836_vm1, %v1825_v52, %v1829_v18  ;;  %v10841_v52 = vmax.bf16 %v6791_v2, %v6812_v46  ;;  %v7171_v2 = vld [vmem:[%s10846_s4 + $0x10] ss:$0 sps:$4 sm:$0x33]   ;;  %vm4116_vm1 = vmpackc.low %vm7164_vm9, %vm7164_vm9 }
 0x17b   : > { %2085 = vrot.lane.b32.xlu0 %v7053_v12, %s10447_s21  ;;  %10827 = vst [vmem:[#allocation80_spill] sm:$0xff] %v7097_v61  ;;  %v1233_v14 = vpop.f32.mrf.mxu0  ;;  %10837 = vst [vmem:[#allocation84_spill] sm:$0xff] %v7127_v59  ;;  %5613 = vmatprep.subr.msk.bf16.mxu1 %vm10849_vm5, %v7171_v2 }
 0x17c   : > { %v7107_v51 = vpop.permute.xlu1 %2731  ;;  %10835 = vst [vmem:[#allocation83_spill] sm:$0xff] %v7124_v7  ;;  %v1234_v3 = vadd.f32 %v7086_v1, %v1233_v14  ;;  %v7179_v14 = vrot.slane %v10847_v16, 4  ;;  %v7208_v16 = vsel %vm4116_vm1, %v6934_v35, 4286644096  ;;  %vm10873_vm1 = vcmp.ge.s32.totalorder %v6016_v6, 2 }
 0x17d   : > { %2087 = vrot.lane.b32.xlu1 %v7038_v4, %s10447_s21  ;;  %10831 = vst [vmem:[#allocation82_spill] sm:$0xff] %v7107_v51  ;;  %v5507_v18 = vpop.f32.mrf.mxu0  ;;  %v7153_v51 = vmax.bf16 %v10841_v52, %v7101_v34  ;;  %v4356_v52 = vshll.u32 %v7147_v5, 16  ;;  %v4372_v50 = vshll.u32 %v7208_v16, 16  ;;  %v4376_v35 = vshrl.u32 %v7208_v16, 16  ;;  %s10862_s21 = smov 16  }
 0x17e   : > { %v7137_v61 = vpop.permute.xlu0 %2836  ;;  %10848 = vst [vmem:[#allocation87_spill] sm:$0xff] %v7179_v14  ;;  %v1290_v46 = vmax.f32 %v1234_v3, 0.0 }
 0x17f   : > { %2196 = vrot.lane.b32.xlu0 %v7053_v12, %s10481_s25  ;;  %10839 = vst [vmem:[#allocation85_spill] sm:$0xff] %v7137_v61  ;;  %v1349_v61 = vcombine.high %v1289_v20, %v1289_v20  ;;  %v1238_v48 = vpop.f32.mrf.mxu0  ;;  %v4378_v42 = vrot.slane %v4376_v35, 4  ;;  %v10858_v35 = vrot.slane %v7056_v24, 1 }
 0x180   : > { %v7173_v18 = vpop.permute.xlu1 %1964  ;;  %v1239_v63 = vadd.f32 %v7086_v1, %v1238_v48 }
 0x181   : > { %2163 = vrot.lane.b32.xlu1 %v7033_v30, %s10840_s13  ;;  %v4358_v30 = vrot.slane %v4356_v52, 5  ;;  %v5510_v8 = vpop.f32.mrf.mxu0  ;;  %v1453_v34 = vcombine.low %v1289_v20, %v1349_v61  ;;  %v10852_v20 = vshll.u32 %v6993_v41, 16  ;;  %v1350_v52 = vcombine.high %v1290_v46, %v1290_v46 }
 0x182   : > { %v7194_v10 = vpop.permute.xlu0 %1891  ;;  %v4560_v8 = vmax.bf16 %v7179_v14, %v4424_v23  ;;  %v5373_v41 = vrot.slane %v7147_v5, 9 }
 0x183   : > { %2769 = vrot.lane.b32.xlu0 %v7053_v12, %s10483_s14  ;;  %v4364_v12 = vrot.slane %v4362_v17, 5  ;;  %v4359_v17 = vor.u32 %v4358_v30, %v4355_v43  ;;  %v1241_v61 = vpop.f32.mrf.mxu0  ;;  %v7218_v3 = vrot.slane %v10852_v20, 2  ;;  %v10853_v30 = vrot.slane %v7156_v21, 5 }
 0x184   : > { %v7210_v0 = vpop.permute.xlu1 %2763  ;;  %v1509_v20 = vsel %vm7115_vm13, %v1453_v34, 0.0  ;;  %v1454_v40 = vcombine.low %v1290_v46, %v1350_v52  ;;  %v4513_v34 = vrot.slane %v7208_v16, 5 }
 0x185   : > { %2198 = vrot.lane.b32.xlu1 %v7038_v4, %s10481_s25  ;;  %10851 = vst [vmem:[#allocation89_spill] sm:$0xff] %v7210_v0  ;;  %v4369_v29 = vor.u32 %v4368_v39, %v4364_v12  ;;  %v4360_v43 = vrot.slane %v4359_v17, 4  ;;  %v4374_v39 = vrot.slane %v4372_v50, 5  ;;  %v4512_v53 = vrot.slane %v10853_v30, 4  ;;  %v5511_v38 = vpop.f32.mrf.mxu0  ;;  %s10887_s25 = smov 124  }
 0x186   : > { %v7222_v0 = vpop.permute.xlu0 %1962  ;;  %v1510_v52 = vsel %vm7103_vm6, %v1454_v40, 0.0  ;;  %v10865_v50 = vrot.slane %v7156_v21, 5 }
 0x187   : > { %3396 = vrot.lane.b32.xlu0 %v7124_v7, %s10516_s20  ;;  %v4370_v48 = vrot.slane %v4369_v29, 4  ;;  %v7237_v17 = vsel %vm6380_vm8, %v4360_v43, %v4364_v12  ;;  %v7239_v29 = vmax.f32 %v1239_v63, 0.0  ;;  %v1246_v55 = vpop.f32.mrf.mxu0  ;;  %v7252_v12 = vrot.slane %v4378_v42, 4 }
 0x188   : > { %v7231_v23 = vpop.permute.xlu1 %2879  ;;  %10855 = vst [vmem:[#allocation91_spill] sm:$0xff] %v7237_v17  ;;  %v4425_v46 = vmax.bf16 %v7237_v17, %v7147_v5  ;;  %v2810_v43 = vor.u32 %v2809_v57, %v10858_v35  ;;  %v7266_v30 = vsel %vm6424_vm3, %v4512_v53, %v4513_v34  ;;  %v2813_v42 = vor.u32 %v7218_v3, %v7124_v7 }
 0x189   : > { %3367 = vrot.lane.b32.xlu1 %v7038_v4, %s10483_s14  ;;  %10854 = vst [vmem:[#allocation90_spill] sm:$0xff] %v7231_v23  ;;  %v7243_v38 = vsel %vm6380_vm8, %v4370_v48, %v4374_v39  ;;  %10857 = vst [vmem:[#allocation93_spill] sm:$0xff] %v7252_v12  ;;  %v7260_v48 = vpack.c.bf16 %v1510_v52, %v1509_v20  ;;  %v5514_v40 = vpop.f32.mrf.mxu0  ;;  %v1351_v47 = vcombine.high %v7239_v29, %v7239_v29 }
 0x18a   : > { %10856 = vst [vmem:[#allocation92_spill] sm:$0xff] %v7243_v38  ;;  %v4426_v39 = vmax.bf16 %v7243_v38, %v7156_v21  ;;  %10860 = vst [vmem:[#allocation95_spill] sm:$0xff] %v7266_v30  ;;  %v4674_v57 = vmax.bf16 %v7153_v51, %v7179_v14  ;;  %v7279_v52 = vrot.slane %v4513_v34, 4  ;;  %v370_v3 = vadd.s32 9, %v6172_v32 }
 0x18b   : > { %1901 = vrot.lane.b32.xlu0 %v7127_v59, %s10483_s14  ;;  %10859 = vst [vmem:[#allocation94_spill] sm:$0xff] %v7260_v48  ;;  %v1242_v35 = vadd.f32 %v7086_v1, %v1241_v61  ;;  %v7298_v34 = vsel %vm6424_vm3, %v5373_v41, %v10865_v50  ;;  %s10867_s14 = smov 20   ;;  %v10870_v41 = vmax.bf16 %v7093_v49, %v7147_v5 }
 0x18c   : > { %10863 = vst [vmem:[#allocation97_spill] sm:$0xff] %v7279_v52  ;;  %v7282_v53 = vmax.bf16 %v7266_v30, %v4426_v39  ;;  %v7292_v51 = vmax.bf16 %v4674_v57, %v7208_v16  ;;  %10866 = vst [vmem:[#allocation99_spill] sm:$0xff] %v7298_v34  ;;  %v5709_v39 = vld [vmem:[%s10846_s4 + $0x8] sm:$0xff]   ;;  %vm386_vm6 = vcmp.ge.s32.totalorder %v370_v3, 2  ;;  %vm398_vm13 = vcmp.lt.s32.totalorder %v370_v3, 18 }
 0x18d   : > { %v7254_v63 = vpop.permute.xlu0 %1889  ;;  %3437 = vrot.lane.b32.xlu1 %v7132_v19, %s10533_s17  ;;  %v4584_v19 = vmax.bf16 %v4560_v8, %v7208_v16  ;;  %v4427_v8 = vmax.bf16 %v7252_v12, %v7208_v16  ;;  %v7308_v16 = vmax.bf16 %v7298_v34, %v4425_v46  ;;  %vm7310_vm4 = vmand %vm386_vm6, %vm398_vm13  ;;  %v4637_v50 = vmax.bf16 %v10870_v41, %v7237_v17 }
 0x18e   : > { %10864 = vst [vmem:[#allocation98_spill] sm:$0xff] %v7292_v51  ;;  %v2613_v30 = vsel %vm10871_vm11, %v7171_v2, 0  ;;  %v1247_v38 = vadd.f32 %v7086_v1, %v1246_v55  ;;  %v7323_v3 = vpack.c.bf16 %v7121_v62, %v7121_v62  ;;  %vm7333_vm5 = vmand %vm7310_vm4, %vm10873_vm1  ;;  %v5710_v55 = vld [vmem:[%s10846_s4] sm:$0xff]   ;;  %vm10877_vm13 = vsmask.f32 6400  ;;  %s5884_s4 = smov 48  }
 0x18f   : > { %v7275_v20 = vpop.permute.xlu1 %2838  ;;  %2050 = vrot.lane.b32.xlu0 %v7127_v59, %s10862_s21  ;;  %v7289_v40 = vmax.bf16 %v4584_v19, %v7252_v12  ;;  %v1292_v19 = vmax.f32 %v1242_v35, 0.0  ;;  %5543 = vmatpush3.bf16.msra.mxu1 %v2613_v30  ;;  %vm4117_vm6 = vmpackc.low %vm7333_vm5, %vm7333_vm5  ;;  %v4675_v62 = vmax.bf16 %v4637_v50, %v7298_v34  ;;  %v7351_v30 = vsel %vm10877_vm13, %v2810_v43, %v2813_v42 }
 0x190   : > { %10861 = vst [vmem:[#allocation96_spill] sm:$0xff] %v7275_v20  ;;  %10872 = vst [vmem:[#allocation100_spill] sm:$0xff] %v7323_v3  ;;  %5544 = vmatprep.subr.bf16.mxu1 %v5709_v39  ;;  %v7357_v41 = vsel %vm4117_vm6, %v6982_v22, 4286644096  ;;  %vm10880_vm1 = vcmp.lt.s32.totalorder %v6193_v45, 18  ;;  %v7376_v22 = vmax.f32 %v1247_v38, 0.0 }
 0x191   : > { %v7303_v61 = vpop.permute.xlu0 %1996  ;;  %2915 = vrot.lane.b32.xlu1 %v7127_v59, %s10867_s14  ;;  %v1455_v5 = vcombine.low %v1351_v47, %v1292_v19  ;;  %v4677_v2 = vmax.bf16 %v7289_v40, %v7279_v52  ;;  %10878 = vst [vmem:[#allocation102_spill] sm:$0xff] %v7351_v30  ;;  %v1352_v47 = vcombine.high %v1292_v19, %v1292_v19  ;;  %vm4118_vm11 = vmpackc.low %vm7310_vm4, %vm7310_vm4  ;;  %v4589_v43 = vshrl.u32 %v7357_v41, 16 }
 0x192   : > { %v7360_v40 = vmax.bf16 %v7279_v52, %v4427_v8  ;;  %v7363_v50 = vsel %vm4118_vm11, %v6957_v36, 4286644096  ;;  %v4585_v21 = vmax.bf16 %v7308_v16, %v7357_v41  ;;  %vm7372_vm13 = vmand %vm7310_vm4, %vm10880_vm1  ;;  %v4592_v19 = vshll.u32 %v7357_v41, 16 }
 0x193   : > { %v7325_v46 = vpop.permute.xlu1 %1998  ;;  %2161 = vrot.lane.b32.xlu0 %v7127_v59, %s10840_s13  ;;  %10879 = vst [vmem:[#allocation103_spill] sm:$0xff] %v7363_v50  ;;  %v4586_v36 = vmax.bf16 %v7282_v53, %v7363_v50  ;;  %v4598_v16 = vshll.u32 %v7363_v50, 16  ;;  %v4602_v52 = vshrl.u32 %v7363_v50, 16  ;;  %vm4119_vm6 = vmpackc.low %vm7372_vm13, %vm7372_vm13  ;;  %5545 = vmatpush3.bf16.msra.mxu1 %v5709_v39  ;;  %v4591_v38 = vrot.slane %v4589_v43, 4 }
 0x194   : > { %v4648_v14 = vrot.slane %v7363_v50, 5  ;;  %5546 = vmatprep.subr.bf16.mxu1 %v5710_v55  ;;  %v4594_v53 = vrot.slane %v4592_v19, 5  ;;  %v4699_v51 = vmax.bf16 %v4675_v62, %v7357_v41  ;;  %v7397_v12 = vshll.u32 %v6650_v13, 16  ;;  %v1249_v62 = vpop.f32.mrf.mxu0 }
 0x195   : > { %v7346_v35 = vpop.permute.xlu0 %2733  ;;  %2010 = vrot.lane.b32.xlu1 %v7323_v3, %s10533_s17  ;;  %v4600_v44 = vrot.slane %v4598_v16, 5  ;;  %v4604_v34 = vrot.slane %v4602_v52, 4  ;;  %v1512_v39 = vsel %vm7333_vm5, %v1455_v5, 0.0  ;;  %v1456_v43 = vcombine.low %v1352_v47, %v7376_v22 }
 0x196   : > { %10876 = vst [vmem:[#allocation101_spill] sm:$0xff] %v7346_v35  ;;  %v7403_v50 = vsel %vm4119_vm6, %v6989_v33, 4286644096  ;;  %v4595_v19 = vor.u32 %v4594_v53, %v4591_v38  ;;  %v4650_v38 = vrot.slane %v4648_v14, 4  ;;  %v5515_v59 = vpop.f32.mrf.mxu0  ;;  %vm10902_vm1 = vcmask 1046528  }
 0x197   : > { %v7378_v8 = vpop.permute.xlu1 %1895  ;;  %2844 = vrot.lane.b32.xlu0 %v7351_v30, %s10516_s20  ;;  %v4605_v52 = vor.u32 %v4604_v34, %v4600_v44  ;;  %v4608_v16 = vshll.u32 %v7403_v50, 16  ;;  %5547 = vmatpush3.bf16.msra.mxu1 %v5710_v55  ;;  %v1513_v49 = vsel %vm7310_vm4, %v1456_v43, 0.0  ;;  %v7421_v34 = vshrl.u32 %v7323_v3, 16 }
 0x198   : > { %10883 = vst [vmem:[#allocation104_spill] sm:$0xff] %v7378_v8  ;;  %v4596_v33 = vrot.slane %v4595_v19, 4  ;;  %v7418_v47 = vpack.c.bf16 %v1513_v49, %v1512_v39  ;;  %v7425_v55 = vmax.bf16 %v4677_v2, %v7403_v50  ;;  %v1838_v43 = vrot.slane %v7397_v12, 1 }
 0x199   : > { %v7391_v17 = vpop.permute.xlu0 %1966  ;;  %2121 = vrot.lane.b32.xlu1 %v7323_v3, %s10816_s26  ;;  %v4606_v23 = vrot.slane %v4605_v52, 4  ;;  %10889 = vst [vmem:[#allocation109_spill] sm:$0xff] %v7421_v34  ;;  %v4610_v53 = vrot.slane %v4608_v16, 5  ;;  %v5374_v52 = vrot.slane %v7357_v41, 9  ;;  %v4612_v2 = vshrl.u32 %v7403_v50, 16 }
 0x19a   : > { %10884 = vst [vmem:[#allocation105_spill] sm:$0xff] %v7391_v17  ;;  %10888 = vst [vmem:[#allocation108_spill] sm:$0xff] %v7418_v47  ;;  %v4601_v19 = vsel %vm6380_vm8, %v4596_v33, %v4600_v44  ;;  %v7446_v39 = vrot.slane %v7323_v3, 1  ;;  %v7449_v44 = vshrl.u32 %v6650_v13, 16  ;;  %v1950_v33 = vrot.slane %v6650_v13, 1 }
 0x19b   : > { %v7405_v35 = vpop.permute.xlu1 %1968  ;;  %2008 = vrot.lane.b32.xlu0 %v6650_v13, %s10533_s17  ;;  %10890 = vst [vmem:[#allocation110_spill] sm:$0xff] %v7425_v55  ;;  %v4754_v16 = vmax.bf16 %v4699_v51, %v4601_v19  ;;  %v7438_v49 = vsel %vm6380_vm8, %v4606_v23, %v4610_v53  ;;  %v10895_v23 = vrot.slane %v7403_v50, 5  ;;  %v371_v53 = vadd.s32 10, %v6172_v32 }
 0x19c   : > { %10885 = vst [vmem:[#allocation106_spill] sm:$0xff] %v7405_v35  ;;  %10891 = vst [vmem:[#allocation111_spill] sm:$0xff] %v7438_v49  ;;  %v7452_v51 = vmax.bf16 %v7438_v49, %v4586_v36  ;;  %v4640_v20 = vmax.bf16 %v4601_v19, %v4585_v21  ;;  %v1839_v36 = vor.u32 %v1838_v43, %v7449_v44  ;;  %v10897_v49 = vshll.u32 %v7323_v3, 16 }
 0x19d   : > { %v7414_v5 = vpop.permute.xlu0 %2077  ;;  %2739 = vrot.lane.b32.xlu1 %v6650_v13, %s10887_s25  ;;  %10894 = vst [vmem:[#allocation113_spill] sm:$0xff] %v7446_v39  ;;  %v7458_v41 = vsel %vm6424_vm3, %v4650_v38, %v10895_v23  ;;  %v4649_v23 = vsel %vm6424_vm3, %v5374_v52, %v4648_v14  ;;  %v7474_v30 = vrot.slane %v4612_v2, 4  ;;  %vm387_vm4 = vcmp.ge.s32.totalorder %v371_v53, 2 }
 0x19e   : > { %10886 = vst [vmem:[#allocation107_spill] sm:$0xff] %v7414_v5  ;;  %10896 = vst [vmem:[#allocation114_spill] sm:$0xff] %v7458_v41  ;;  %v1843_v4 = vrot.slane %v10897_v49, 1  ;;  %v4679_v38 = vmax.bf16 %v7458_v41, %v7452_v51  ;;  %vm399_vm5 = vcmp.lt.s32.totalorder %v371_v53, 18  ;;  %v1511_v59 = vsel %vm7164_vm9, %v7239_v29, 0.0 }
 0x19f   : > { %v7427_v57 = vpop.permute.xlu1 %2044  ;;  %2119 = vrot.lane.b32.xlu0 %v6650_v13, %s10816_s26  ;;  %10898 = vst [vmem:[#allocation115_spill] sm:$0xff] %v7474_v30  ;;  %vm7483_vm11 = vmand %vm387_vm4, %vm399_vm5  ;;  %v4678_v43 = vmax.bf16 %v4649_v23, %v4640_v20  ;;  %v7487_v14 = vmax.bf16 %v4754_v16, %v4649_v23  ;;  %v7491_v19 = vsel %vm10902_vm1, %v1950_v33, %v7446_v39  ;;  %vm10904_vm6 = vcmp.ge.s32.totalorder %v6016_v6, 2  ;;  %v5744_v53 = vld [vmem:[%s6021_s22 + $0x7c] sm:$0xf] }
 0x1a0   : > { %10903 = vst [vmem:[#allocation117_spill] sm:$0xff] %v7491_v19  ;;  %vm7497_vm10 = vmand %vm7483_vm11, %vm10904_vm6  ;;  %vm10908_vm9 = vsmask.f32 7424  ;;  %v7512_v49 = vpack.c.bf16 %v1511_v59, %v1511_v59  ;;  %vm10913_vm1 = vcmp.lt.s32.totalorder %v6193_v45, 18  ;;  %v10921_v58 = vrot.slane %v7403_v50, 5 }
 0x1a1   : > { %v7441_v55 = vpop.permute.xlu0 %2765  ;;  %1907 = vrot.lane.b32.xlu1 %v7421_v34, %s10893_s24  ;;  %10901 = vst [vmem:[#allocation116_spill] sm:$0xff] %v7487_v14  ;;  %v7506_v20 = vsel %vm10908_vm9, %v1839_v36, %v1843_v4  ;;  %vm4120_vm4 = vmpackc.low %vm7497_vm10, %vm7497_vm10  ;;  %v10934_v60 = vshll.u32 %v7323_v3, 16 }
 0x1a2   : > { %10892 = vst [vmem:[#allocation112_spill] sm:$0xff] %v7441_v55  ;;  %v1250_v55 = vadd.f32 %v7086_v1, %v1249_v62  ;;  %10909 = vst [vmem:[#allocation119_spill] sm:$0xff] %v7506_v20  ;;  %v7560_v26 = vrot.slane %v10921_v58, 4 }
 0x1a3   : > { %v7463_v7 = vpop.permute.xlu1 %2079  ;;  %2901 = vrot.lane.b32.xlu0 %v6650_v13, %s10862_s21  ;;  %10910 = vst [vmem:[#allocation120_spill] sm:$0xff] %v7512_v49  ;;  %vm4121_vm5 = vmpackc.low %vm7483_vm11, %vm7483_vm11 }
 0x1a4   : > { %v1294_v29 = vmax.f32 %v1250_v55, 0.0  ;;  %v5743_v55 = vld [vmem:[%s6021_s22 + $0x78] sm:$0xf]  ;;  %v4151_v36 = vsel %vm4121_vm5, %v5744_v53, 4286644096  ;;  %vm7534_vm6 = vmand %vm7483_vm11, %vm10913_vm1  ;;  %v7539_v53 = vshrl.u32 %v7512_v49, 16 }
 0x1a5   : > { %v7476_v21 = vpop.permute.xlu0 %2042  ;;  %1980 = vrot.lane.b32.xlu1 %v7446_v39, %s10516_s20  ;;  %v4150_v51 = vsel %vm4120_vm4, %v5743_v55, 4286644096  ;;  %v4715_v14 = vshll.u32 %v4151_v36, 16  ;;  %v4765_v17 = vrot.slane %v4151_v36, 5  ;;  %vm4122_vm9 = vmpackc.low %vm7534_vm6, %vm7534_vm6  ;;  %10922 = vst [vmem:[#allocation126_spill] sm:$0xff] %v7560_v26  ;;  %vm10958_vm5 = vcmp.ge.s32.totalorder %v6016_v6, 2 }
 0x1a6   : > { %v4702_v23 = vmax.bf16 %v4678_v43, %v4150_v51  ;;  %v4706_v59 = vshrl.u32 %v4150_v51, 16  ;;  %v1354_v2 = vcombine.high %v1294_v29, %v1294_v29  ;;  %v4709_v41 = vshll.u32 %v4150_v51, 16  ;;  %10916 = vst [vmem:[#allocation123_spill] sm:$0xff] %v7539_v53 }
 0x1a7   : > { %v7501_v52 = vpop.permute.xlu1 %1893  ;;  %1978 = vrot.lane.b32.xlu0 %v7491_v19, %s10516_s20  ;;  %v5376_v24 = vrot.slane %v4150_v51, 9  ;;  %v4717_v4 = vrot.slane %v4715_v14, 5  ;;  %v10917_v51 = vmax.bf16 %v7360_v40, %v7403_v50  ;;  %v5745_v14 = vld [vmem:[%s6021_s22 + $0x80] sm:$0x3]  ;;  %v1353_v40 = vcombine.high %v7376_v22, %v7376_v22  ;;  %s10923_s20 = smov 32  }
 0x1a8   : > { %10907 = vst [vmem:[#allocation118_spill] sm:$0xff] %v7501_v52  ;;  %v4708_v55 = vrot.slane %v4706_v59, 4  ;;  %v4711_v16 = vrot.slane %v4709_v41, 5  ;;  %v10918_v59 = vrot.slane %v7474_v30, 4  ;;  %v7556_v52 = vsel %vm4122_vm9, %v5745_v14, 4286644096 }
 0x1a9   : > { %v7519_v33 = vpop.permute.xlu0 %2840  ;;  %2056 = vrot.lane.b32.xlu1 %v7421_v34, %s10862_s21  ;;  %v4766_v41 = vsel %vm6424_vm3, %v5376_v24, %v4765_v17  ;;  %10920 = vst [vmem:[#allocation125_spill] sm:$0xff] %v7556_v52  ;;  %v4703_v30 = vmax.bf16 %v4679_v38, %v4151_v36  ;;  %v1457_v24 = vcombine.low %v1294_v29, %v1354_v2  ;;  %v4729_v22 = vshrl.u32 %v7556_v52, 16 }
 0x1aa   : > { %10911 = vst [vmem:[#allocation121_spill] sm:$0xff] %v7519_v33  ;;  %v4719_v33 = vshrl.u32 %v4151_v36, 16  ;;  %v1953_v6 = vrot.slane %v6697_v37, 1  ;;  %vm10966_vm9 = vcmp.lt.s32.totalorder %v6193_v45, 18 }
 0x1ab   : > { %v7526_v13 = vpop.permute.xlu1 %2002  ;;  %2089 = vrot.lane.b32.xlu0 %v7491_v19, %s10867_s14 }
 0x1ac   : > { %10912 = vst [vmem:[#allocation122_spill] sm:$0xff] %v7526_v13  ;;  %v4642_v13 = vmax.bf16 %v10918_v59, %v10917_v51  ;;  %v4721_v8 = vrot.slane %v4719_v33, 4  ;;  %v4712_v51 = vor.u32 %v4711_v16, %v4708_v55  ;;  %v1254_v59 = vpop.f32.mrf.mxu0  ;;  %v4767_v16 = vrot.slane %v4765_v17, 4 }
 0x1ad   : > { %v7549_v35 = vpop.permute.xlu0 %2000  ;;  %2091 = vrot.lane.b32.xlu1 %v7446_v39, %s10867_s14  ;;  %v1255_v33 = vadd.f32 %v7086_v1, %v1254_v59 }
 0x1ae   : > { %10919 = vst [vmem:[#allocation124_spill] sm:$0xff] %v7549_v35  ;;  %v4725_v35 = vshll.u32 %v7556_v52, 16  ;;  %v4680_v50 = vmax.bf16 %v7560_v26, %v4642_v13  ;;  %v4722_v58 = vor.u32 %v4721_v8, %v4717_v4  ;;  %v4713_v14 = vrot.slane %v4712_v51, 4  ;;  %v5518_v56 = vpop.f32.mrf.mxu0 }
 0x1af   : > { %v7565_v15 = vpop.permute.xlu1 %2113  ;;  %2200 = vrot.lane.b32.xlu0 %v7491_v19, %s10923_s20  ;;  %v1295_v36 = vmax.f32 %v1255_v33, 0.0  ;;  %v1514_v13 = vsel %vm7372_vm13, %v1353_v40, 0.0  ;;  %v7581_v56 = vshrl.u32 %v7260_v48, 16  ;;  %vm10947_vm13 = vsmask.f32 6400 }
 0x1b0   : > { %v4727_v5 = vrot.slane %v4725_v35, 5  ;;  %v4704_v55 = vmax.bf16 %v4680_v50, %v7556_v52  ;;  %v4723_v29 = vrot.slane %v4722_v58, 4  ;;  %v7584_v35 = vshll.u32 %v7260_v48, 16  ;;  %v1257_v8 = vpop.f32.mrf.mxu0 }
 0x1b1   : > { %v7572_v38 = vpop.permute.xlu0 %2111  ;;  %2167 = vrot.lane.b32.xlu1 %v7421_v34, %s10840_s13  ;;  %10924 = vst [vmem:[#allocation127_spill] sm:$0xff] %v7581_v56  ;;  %v4718_v17 = vsel %vm6380_vm8, %v4713_v14, %v4717_v4  ;;  %v1355_v33 = vcombine.high %v1295_v36, %v1295_v36  ;;  %v1258_v42 = vadd.f32 %v7086_v1, %v1257_v8  ;;  %v10522_v50 = vshll.u32 %v7512_v49, 16 }
 0x1b2   : > { %v4757_v59 = vmax.bf16 %v4718_v17, %v4702_v23  ;;  %v4728_v40 = vsel %vm6380_vm8, %v4723_v29, %v4727_v5  ;;  %v7598_v2 = vmax.bf16 %v4729_v22, %v4704_v55  ;;  %v10928_v4 = vrot.slane %v7556_v52, 5  ;;  %v5519_v26 = vpop.f32.mrf.mxu0 }
 0x1b3   : > { %v7588_v51 = vpop.permute.xlu1 %2735  ;;  %1905 = vrot.lane.b32.xlu0 %v7506_v20, %s10893_s24  ;;  %v7596_v58 = vmax.bf16 %v4728_v40, %v4703_v30  ;;  %v1515_v5 = vsel %vm7497_vm10, %v1457_v24, 0.0  ;;  %v1458_v30 = vcombine.low %v1295_v36, %v1355_v33  ;;  %v7614_v22 = vmax.f32 %v1258_v42, 0.0 }
 0x1b4   : > { %10925 = vst [vmem:[#allocation128_spill] sm:$0xff] %v7588_v51  ;;  %10927 = vst [vmem:[#allocation130_spill] sm:$0xff] %v7598_v2  ;;  %v7604_v14 = vsel %vm6424_vm3, %v4767_v16, %v10928_v4  ;;  %v7612_v29 = vmax.bf16 %v4766_v41, %v4757_v59  ;;  %v7617_v55 = vrot.slane %v7421_v34, 1  ;;  %v7619_v17 = vpack.c.bf16 %v1514_v13, %v1514_v13 }
 0x1b5   : > { %10926 = vst [vmem:[#allocation129_spill] sm:$0xff] %v7596_v58  ;;  %10929 = vst [vmem:[#allocation131_spill] sm:$0xff] %v7604_v14  ;;  %v7606_v23 = vpop.permute.xlu0 %3343  ;;  %2202 = vrot.lane.b32.xlu1 %v7446_v39, %s10923_s20  ;;  %v10521_v26 = vrot.slane %v7581_v56, 7  ;;  %v2941_v16 = vrot.slane %v7581_v56, 1  ;;  %v2819_v41 = vrot.slane %v10934_v60, 2  ;;  %v1516_v24 = vsel %vm7483_vm11, %v1458_v30, 0.0 }
 0x1b6   : > { %10930 = vst [vmem:[#allocation132_spill] sm:$0xff] %v7606_v23  ;;  %10931 = vst [vmem:[#allocation133_spill] sm:$0xff] %v7612_v29  ;;  %v1517_v36 = vsel %vm7534_vm6, %v7614_v22, 0.0  ;;  %v2942_v13 = vrot.slane %v7584_v35, 2  ;;  %v7635_v59 = vpack.c.bf16 %v1516_v24, %v1515_v5  ;;  %v7640_v42 = vshrl.u32 %v7418_v47, 16 }
 0x1b7   : > { %10932 = vst [vmem:[#allocation134_spill] sm:$0xff] %v7617_v55  ;;  %10933 = vst [vmem:[#allocation135_spill] sm:$0xff] %v7619_v17  ;;  %v7623_v8 = vpop.permute.xlu1 %1899  ;;  %2054 = vrot.lane.b32.xlu0 %v7506_v20, %s10862_s21  ;;  %v7637_v33 = vpack.c.bf16 %v1517_v36, %v1517_v36  ;;  %v7649_v62 = vor.u32 %v10521_v26, %v7584_v35  ;;  %v7652_v4 = vrot.slane %v7539_v53, 1  ;;  %v2945_v5 = vrot.slane %v10522_v50, 2 }
 0x1b8   : > { %10935 = vst [vmem:[#allocation136_spill] sm:$0xff] %v7635_v59  ;;  %v2943_v43 = vor.u32 %v2942_v13, %v2941_v16  ;;  %v1505_v30 = vsel %vm6624_vm15, %v6693_v31, 0.0  ;;  %v10940_v60 = vrot.slane %v7449_v44, 7  ;;  %v7663_v36 = vshrl.u32 %v7619_v17, 16  ;;  %vm10951_vm11 = vmmov %vm10947_vm13 }
 0x1b9   : > { %10936 = vst [vmem:[#allocation137_spill] sm:$0xff] %v7637_v33  ;;  %v7642_v40 = vpop.permute.xlu0 %3365  ;;  %2771 = vrot.lane.b32.xlu1 %v7491_v19, %s10893_s24  ;;  %10938 = vst [vmem:[#allocation139_spill] sm:$0xff] %v7649_v62  ;;  %v372_v26 = vadd.s32 11, %v6172_v32  ;;  %v10942_v13 = vrot.slane %v7449_v44, 1  ;;  %v10943_v50 = vrot.slane %v7397_v12, 2  ;;  %v2820_v31 = vor.u32 %v2819_v41, %v7617_v55  ;;  %v11023_v55 = vld [vmem:[#allocation124_spill] sm:$0xff] }
 0x1ba   : > { %10937 = vst [vmem:[#allocation138_spill] sm:$0xff] %v7642_v40  ;;  %10939 = vst [vmem:[#allocation140_spill] sm:$0xff] %v7652_v4  ;;  %v3419_v24 = vor.u32 %v10940_v60, %v7397_v12  ;;  %v7676_v29 = vshll.u32 %v7418_v47, 16  ;;  %v1356_v32 = vcombine.high %v7614_v22, %v7614_v22  ;;  %v7682_v2 = vshrl.u32 %v7637_v33, 16 }
 0x1bb   : > { %10941 = vst [vmem:[#allocation141_spill] sm:$0xff] %v7663_v36  ;;  %v7666_v16 = vpop.permute.xlu1 %1972  ;;  %2165 = vrot.lane.b32.xlu0 %v7506_v20, %s10840_s13  ;;  %v2817_v28 = vor.u32 %v10943_v50, %v10942_v13  ;;  %v7685_v14 = vshrl.u32 %v7635_v59, 16  ;;  %v7688_v58 = vshll.u32 %v7635_v59, 16  ;;  %vm388_vm15 = vcmp.ge.s32.totalorder %v372_v26, 2  ;;  %v1262_v50 = vpop.f32.mrf.mxu0  ;;  %vm10961_vm6 = vmmov %vm10951_vm11 }
 0x1bc   : > { %10944 = vst [vmem:[#allocation142_spill] sm:$0xff] %v7682_v2  ;;  %vm400_vm10 = vcmp.lt.s32.totalorder %v372_v26, 18  ;;  %v2946_v41 = vor.u32 %v2945_v5, %v7652_v4  ;;  %v10532_v22 = vrot.slane %v7640_v42, 7  ;;  %v1263_v13 = vadd.f32 %v7086_v1, %v1262_v50 }
 0x1bd   : > { %10945 = vst [vmem:[#allocation143_spill] sm:$0xff] %v7685_v14  ;;  %v7690_v12 = vpop.permute.xlu0 %1970  ;;  %3441 = vrot.lane.b32.xlu1 %v3419_v24, %s10533_s17  ;;  %v3031_v60 = vrot.slane %v7640_v42, 1  ;;  %v3032_v52 = vrot.slane %v7676_v29, 2  ;;  %v7699_v54 = vrot.slane %v7663_v36, 1  ;;  %v5522_v24 = vpop.f32.mrf.mxu0  ;;  %v10950_v23 = vshll.u32 %v7619_v17, 16  ;;  %vm7721_vm4 = vmand %vm388_vm15, %vm400_vm10 }
 0x1be   : > { %v7707_v5 = vsel %vm10947_vm13, %v2943_v43, %v2946_v41  ;;  %v7712_v50 = vor.u32 %v10532_v22, %v7676_v29  ;;  %v7717_v4 = vsel %vm10951_vm11, %v2817_v28, %v2820_v31  ;;  %v1297_v40 = vmax.f32 %v1263_v13, 0.0  ;;  %vm7749_vm1 = vmand %vm7721_vm4, %vm10958_vm5 }
 0x1bf   : > { %10946 = vst [vmem:[#allocation144_spill] sm:$0xff] %v7699_v54  ;;  %v7701_v11 = vpop.permute.xlu1 %2048  ;;  %2012 = vrot.lane.b32.xlu0 %v6697_v37, %s10533_s17  ;;  %10948 = vst [vmem:[#allocation145_spill] sm:$0xff] %v7707_v5  ;;  %v3035_v51 = vrot.slane %v10950_v23, 2  ;;  %v3033_v43 = vor.u32 %v3032_v52, %v3031_v60  ;;  %v10535_v41 = vrot.slane %v7685_v14, 7  ;;  %v7726_v5 = vpack.c.bf16 %v1505_v30, %v1505_v30  ;;  %s10956_s17 = smov 8   ;;  %v1265_v23 = vpop.f32.mrf.mxu0 }
 0x1c0   : > { %10949 = vst [vmem:[#allocation146_spill] sm:$0xff] %v7712_v50  ;;  %10952 = vst [vmem:[#allocation147_spill] sm:$0xff] %v7717_v4  ;;  %v3387_v26 = vrot.slane %v7685_v14, 1  ;;  %v3388_v31 = vrot.slane %v7688_v58, 2  ;;  %v1357_v50 = vcombine.high %v1297_v40, %v1297_v40  ;;  %v1459_v62 = vcombine.low %v1356_v32, %v1297_v40 }
 0x1c1   : > { %10955 = vst [vmem:[#allocation148_spill] sm:$0xff] %v7726_v5  ;;  %v7728_v22 = vpop.permute.xlu0 %2081  ;;  %2846 = vrot.lane.b32.xlu1 %v7717_v4, %s10956_s17  ;;  %v3036_v28 = vor.u32 %v3035_v51, %v7699_v54  ;;  %v1266_v52 = vadd.f32 %v7086_v1, %v1265_v23  ;;  %v7739_v30 = vor.u32 %v10535_v41, %v7688_v58  ;;  %v5523_v40 = vpop.f32.mrf.mxu0  ;;  %v7757_v13 = vrot.slane %v7682_v2, 1  ;;  %vm490_vm15 = vmand %vm7721_vm4, %vm10966_vm9 }
 0x1c2   : > { %v3389_v32 = vor.u32 %v3388_v31, %v3387_v26  ;;  %v10964_v23 = vshll.u32 %v7637_v33, 16  ;;  %v1518_v26 = vsel %vm7749_vm1, %v1459_v62, 0.0  ;;  %vm10968_vm10 = vmmov %vm10961_vm6  ;;  %vm2256_vm13 = vcmask 64512  }
 0x1c3   : > { %10957 = vst [vmem:[#allocation149_spill] sm:$0xff] %v7739_v30  ;;  %v7741_v60 = vpop.permute.xlu1 %2083  ;;  %2123 = vrot.lane.b32.xlu0 %v6697_v37, %s10816_s26  ;;  %v7754_v1 = vsel %vm10961_vm6, %v3033_v43, %v3036_v28  ;;  %10963 = vst [vmem:[#allocation151_spill] sm:$0xff] %v7757_v13  ;;  %v1298_v30 = vmax.f32 %v1266_v52, 0.0  ;;  %v7772_v28 = vrot.slane %v7726_v5, 1  ;;  %vm10973_vm11 = vcmask 31744  }
 0x1c4   : > { %10962 = vst [vmem:[#allocation150_spill] sm:$0xff] %v7754_v1  ;;  %v3391_v41 = vrot.slane %v10964_v23, 2  ;;  %vm10974_vm5 = vcmask 1046528   ;;  %vm10976_vm1 = vmmov %vm10973_vm11  ;;  %vm2322_vm6 = vcmask 130048   ;;  %vm2355_vm9 = vcmask 162816  }
 0x1c5   : > { %v7761_v54 = vpop.permute.xlu0 %2192  ;;  %2014 = vrot.lane.b32.xlu1 %v7726_v5, %s10965_s0  ;;  %10967 = vst [vmem:[#allocation152_spill] sm:$0xff] %v7772_v28  ;;  %v1358_v31 = vcombine.high %v1298_v30, %v1298_v30  ;;  %v1460_v52 = vcombine.low %v1357_v50, %v1298_v30  ;;  %v2227_v50 = vsel %vm10973_vm11, %v6324_v27, %v7194_v10  ;;  %vm10641_vm11 = vcmask 261120  }
 0x1c6   : > { %v3392_v43 = vor.u32 %v3391_v41, %v7757_v13  ;;  %v7796_v30 = vsel %vm10974_vm5, %v1953_v6, %v7772_v28  ;;  %v2225_v24 = vsel %vm10976_vm1, %v6322_v25, %v7254_v63  ;;  %v2260_v27 = vsel %vm2256_vm13, %v2227_v50, %v7173_v18 }
 0x1c7   : > { %v2160_v40 = vpop.permute.xlu1 %2159  ;;  %2741 = vrot.lane.b32.xlu0 %v6697_v37, %s10887_s25  ;;  %v1519_v45 = vsel %vm7721_vm4, %v1460_v52, 0.0  ;;  %v1520_v1 = vsel %vm490_vm15, %v1358_v31, 0.0  ;;  %10975 = vst [vmem:[#allocation157_spill] sm:$0xff] %v7796_v30  ;;  %vm2289_vm4 = vcmask 97280   ;;  %vm10647_vm15 = vcmask 195584  }
 0x1c8   : > { %v7779_v23 = vsel %vm10968_vm10, %v3389_v32, %v3392_v43  ;;  %v7787_v51 = vpack.c.bf16 %v1519_v45, %v1518_v26  ;;  %v7789_v62 = vpack.c.bf16 %v1520_v1, %v1520_v1  ;;  %v7804_v1 = vshrl.u32 %v7726_v5, 16 }
 0x1c9   : > { %10969 = vst [vmem:[#allocation153_spill] sm:$0xff] %v7779_v23  ;;  %v7783_v41 = vpop.permute.xlu0 %3394  ;;  %2125 = vrot.lane.b32.xlu1 %v7726_v5, %s10816_s26  ;;  %vm2421_vm10 = vcmask 228352   ;;  %v2258_v31 = vsel %vm2256_vm13, %v2225_v24, %v7222_v0  ;;  %vm10985_vm1 = vsmask.f32 7424 }
 0x1ca   : > { %10970 = vst [vmem:[#allocation154_spill] sm:$0xff] %v7783_v41  ;;  %10971 = vst [vmem:[#allocation155_spill] sm:$0xff] %v7787_v51  ;;  %v7807_v43 = vshll.u32 %v7787_v51, 16  ;;  %v7816_v63 = vshrl.u32 %v7787_v51, 16  ;;  %v3496_v26 = vshll.u32 %v7789_v62, 16  ;;  %v3524_v52 = vrot.slane %v7787_v51, 1 }
 0x1cb   : > { %10972 = vst [vmem:[#allocation156_spill] sm:$0xff] %v7789_v62  ;;  %v2195_v32 = vpop.permute.xlu1 %2194  ;;  %1982 = vrot.lane.b32.xlu0 %v7796_v30, %s10956_s17  ;;  %10977 = vst [vmem:[#allocation158_spill] sm:$0xff] %v7804_v1  ;;  %v2291_v50 = vsel %vm2289_vm4, %v2258_v31, %v7303_v61  ;;  %v2293_v41 = vsel %vm2289_vm4, %v2260_v27, %v7325_v46  ;;  %v10981_v18 = vrot.slane %v7789_v62, 1  ;;  %v10983_v61 = vshrl.u32 %v7789_v62, 16  ;;  %v10988_v62 = vld [vmem:[#allocation107_spill] sm:$0xff] }
 0x1cc   : > { %10978 = vst [vmem:[#allocation159_spill] sm:$0xff] %v7807_v43  ;;  %10979 = vst [vmem:[#allocation160_spill] sm:$0xff] %v7816_v63  ;;  %v3493_v6 = vrot.slane %v7807_v43, 1  ;;  %v2326_v24 = vsel %vm2322_vm6, %v2293_v41, %v7427_v57  ;;  %v3498_v45 = vrot.slane %v3496_v26, 1  ;;  %v2324_v27 = vsel %vm2322_vm6, %v2291_v50, %v7476_v21 }
 0x1cd   : > { %v7811_v10 = vpop.permute.xlu0 %1897  ;;  %1911 = vrot.lane.b32.xlu1 %v7804_v1, %s10893_s24  ;;  %v7839_v51 = vsel %vm10974_vm5, %v3524_v52, %v10981_v18  ;;  %v7843_v46 = vrot.slane %v10983_v61, 1  ;;  %v3549_v57 = vrot.slane %v7816_v63, 1  ;;  %v3550_v41 = vrot.slane %v7807_v43, 2 }
 0x1ce   : > { %v3494_v0 = vor.u32 %v3493_v6, %v7816_v63  ;;  %10982 = vst [vmem:[#allocation162_spill] sm:$0xff] %v7839_v51  ;;  %v3553_v6 = vrot.slane %v3496_v26, 2  ;;  %v2359_v52 = vsel %vm2355_vm9, %v2326_v24, %v7463_v7  ;;  %v1852_v18 = vrot.slane %v6979_v9, 1 }
 0x1cf   : > { %v7829_v25 = vpop.permute.xlu1 %2767  ;;  %2093 = vrot.lane.b32.xlu0 %v7796_v30, %s10867_s14  ;;  %10984 = vst [vmem:[#allocation163_spill] sm:$0xff] %v7843_v46  ;;  %v1855_v61 = vshll.u32 %v7726_v5, 16  ;;  %v2392_v21 = vsel %vm10647_vm15, %v2359_v52, %v7565_v15  ;;  %v3551_v51 = vor.u32 %v3550_v41, %v3549_v57  ;;  %v2357_v7 = vsel %vm2355_vm9, %v2324_v27, %v10988_v62  ;;  %v10991_v41 = vld [vmem:[#allocation65_spill] sm:$0xff] }
 0x1d0   : > { %10980 = vst [vmem:[#allocation161_spill] sm:$0xff] %v7829_v25  ;;  %v7858_v25 = vsel %vm10985_vm1, %v3494_v0, %v3498_v45  ;;  %v3554_v26 = vor.u32 %v3553_v6, %v7843_v46  ;;  %v2425_v24 = vsel %vm2421_vm10, %v2392_v21, %v2160_v40  ;;  %v2390_v45 = vsel %vm10647_vm15, %v2357_v7, %v7572_v38  ;;  %v11007_v46 = vld [vmem:[#allocation71_spill] sm:$0xff]  ;;  %v11020_v5 = vld [vmem:[#allocation105_spill] sm:$0xff] }
 0x1d1   : > { %v7847_v31 = vpop.permute.xlu0 %2046  ;;  %1984 = vrot.lane.b32.xlu1 %v7772_v28, %s10956_s17  ;;  %10986 = vst [vmem:[#allocation164_spill] sm:$0xff] %v7858_v25  ;;  %v2458_v0 = vsel %vm10641_vm11, %v2425_v24, %v2195_v32  ;;  %vm10989_vm5 = vsmask.f32 6400  ;;  %v1853_v6 = vor.u32 %v1852_v18, %v10991_v41  ;;  %v1857_v52 = vrot.slane %v1855_v61, 1 }
 0x1d2   : > { %v7876_v15 = vsel %vm10989_vm5, %v3551_v51, %v3554_v26  ;;  %v2493_v38 = vshll.u32 %v2458_v0, 16  ;;  %vm10565_vm5 = vcmask 293888   ;;  %v2822_v0 = vrot.slane %v10991_v41, 1  ;;  %v11012_v41 = vld [vmem:[#allocation27_spill] sm:$0xff] }
 0x1d3   : > { %v7862_v50 = vpop.permute.xlu1 %2842  ;;  %2204 = vrot.lane.b32.xlu0 %v7796_v30, %s10923_s20  ;;  %10990 = vst [vmem:[#allocation107_spill] sm:$0xff] %v7876_v15  ;;  %v7891_v18 = vsel %vm10985_vm1, %v1853_v6, %v1857_v52  ;;  %v2823_v6 = vrot.slane %v6979_v9, 2  ;;  %v7907_v52 = vrot.slane %v7804_v1, 1  ;;  %v1866_v13 = vrot.slane %v11007_v46, 1 }
 0x1d4   : > { %10987 = vst [vmem:[#allocation165_spill] sm:$0xff] %v7862_v50  ;;  %10992 = vst [vmem:[#allocation166_spill] sm:$0xff] %v7891_v18  ;;  %v2495_v7 = vrot.slane %v2493_v38, 1 }
 0x1d5   : > { %v2158_v25 = vpop.permute.xlu0 %2157  ;;  %2060 = vrot.lane.b32.xlu1 %v7804_v1, %s10862_s21  ;;  %v2824_v9 = vor.u32 %v2823_v6, %v2822_v0 }
 0x1d6   : > { %v2423_v57 = vsel %vm2421_vm10, %v2390_v45, %v2158_v25 }
 0x1d7   : > { %v2456_v40 = vsel %vm10641_vm11, %v2423_v57, %v7761_v54  ;;  %v7882_v62 = vpop.permute.xlu1 %2006  ;;  %2773 = vrot.lane.b32.xlu0 %v7796_v30, %s10893_s24  ;;  %v10993_v54 = vld [vmem:[#allocation52_spill] sm:$0xff]  ;;  %v11011_v30 = vld [vmem:[#allocation118_spill] sm:$0xff] }
 0x1d8   : > { %v2489_v32 = vshll.u32 %v2456_v40, 16  ;;  %v2487_v51 = vshrl.u32 %v2456_v40, 16  ;;  %v1348_v26 = vcombine.high %v10993_v54, %v10993_v54  ;;  %10994 = vst [vmem:[#allocation52_spill] sm:$0xff] %v7907_v52  ;;  %v2826_v40 = vrot.slane %v1855_v61, 2 }
 0x1d9   : > { %v7886_v27 = vpop.permute.xlu0 %2004  ;;  %2095 = vrot.lane.b32.xlu1 %v7772_v28, %s10867_s14 }
 0x1da   : > { %v2491_v25 = vrot.slane %v2489_v32, 1  ;;  %v2827_v54 = vor.u32 %v2826_v40, %v7907_v52  ;;  %v11002_v40 = vld [vmem:[#allocation57_spill] sm:$0xff]  ;;  %v11015_v52 = vld [vmem:[#allocation28_spill] sm:$0xff] }
 0x1db   : > { %v7893_v21 = vpop.permute.xlu1 %2117  ;;  %1909 = vrot.lane.b32.xlu0 %v7891_v18, %s10893_s24 }
 0x1dc   : > { %v2492_v24 = vor.u32 %v2491_v25, %v2487_v51  ;;  %v1508_v51 = vsel %vm6786_vm7, %v1348_v26, 0.0  ;;  %vm11000_vm7 = vsmask.f32 6400 }
 0x1dd   : > { %v7899_v45 = vpop.permute.xlu0 %2115  ;;  %2171 = vrot.lane.b32.xlu1 %v7804_v1, %s10840_s13  ;;  %v7932_v26 = vsel %vm11000_vm7, %v2824_v9, %v2827_v54  ;;  %vm11013_vm7 = vcmask 31744  }
 0x1de   : > { %v2496_v57 = vsel %vm10985_vm1, %v2492_v24, %v2495_v7  ;;  %v7921_v7 = vpack.c.bf16 %v1508_v51, %v1508_v51  ;;  %11001 = vst [vmem:[#allocation170_spill] sm:$0xff] %v7932_v26  ;;  %v1956_v51 = vrot.slane %v11002_v40, 1  ;;  %vm11004_vm1 = vcmask 1046528  }
 0x1df   : > { %5548 = vmatprep.mubr.msk.bf16.mxu1 %vm10565_vm5, %v2496_v57  ;;  %v7910_v38 = vpop.permute.xlu1 %3345  ;;  %2058 = vrot.lane.b32.xlu0 %v7891_v18, %s10862_s21  ;;  %vm11017_vm5 = vsmask.f32 7424 }
 0x1e0   : > { %10995 = vst [vmem:[#allocation167_spill] sm:$0xff] %v7910_v38  ;;  %10998 = vst [vmem:[#allocation168_spill] sm:$0xff] %v7921_v7  ;;  %v7952_v9 = vrot.slane %v7921_v7, 1  ;;  %v1869_v43 = vshll.u32 %v7921_v7, 16 }
 0x1e1   : > { %v7916_v25 = vpop.permute.xlu0 %2737  ;;  %2206 = vrot.lane.b32.xlu1 %v7772_v28, %s10923_s20 }
 0x1e2   : > { %10997 = vst [vmem:[#allocation55_spill] sm:$0xff] %v7916_v25  ;;  %v7965_v38 = vsel %vm11004_vm1, %v1956_v51, %v7952_v9  ;;  %v11009_v51 = vld [vmem:[#allocation67_spill] sm:$0xff]  ;;  %vm11016_vm1 = vmmov %vm11013_vm7 }
 0x1e3   : > { %v7923_v61 = vpop.permute.xlu1 %1903  ;;  %2169 = vrot.lane.b32.xlu0 %v7891_v18, %s10840_s13  ;;  %11005 = vst [vmem:[#allocation172_spill] sm:$0xff] %v7965_v38  ;;  %v1867_v1 = vor.u32 %v1866_v13, %v11009_v51 }
 0x1e5   : > { %v7927_v24 = vpop.permute.xlu0 %2899  ;;  %2018 = vrot.lane.b32.xlu1 %v7921_v7, %s10965_s0 }
 0x1e6   : > { %10999 = vst [vmem:[#allocation169_spill] sm:$0xff] %v7927_v24  ;;  %v7959_v24 = vshrl.u32 %v7921_v7, 16 }
 0x1e7   : > { %v7934_v57 = vpop.permute.xlu1 %1976  ;;  %2848 = vrot.lane.b32.xlu0 %v7932_v26, %s10956_s17  ;;  %v1871_v26 = vrot.slane %v1869_v43, 1 }
 0x1e8   : > { %11003 = vst [vmem:[#allocation171_spill] sm:$0xff] %v7959_v24 }
 0x1e9   : > { %v7938_v0 = vpop.permute.xlu0 %1974  ;;  %2129 = vrot.lane.b32.xlu1 %v7921_v7, %s10816_s26  ;;  %v2229_v7 = vsel %vm11013_vm7, %v11012_v41, %v11011_v30  ;;  %v7997_v13 = vsel %vm11017_vm5, %v1867_v1, %v1871_v26  ;;  %v11022_v30 = vld [vmem:[#allocation122_spill] sm:$0xff]  ;;  %vm11026_vm5 = vsmask.f32 6400  ;;  %vm11028_vm7 = vsmask.f32 7424 }
 0x1ea   : > { %11018 = vst [vmem:[#allocation118_spill] sm:$0xff] %v7997_v13  ;;  %v2262_v37 = vsel %vm2256_vm13, %v2229_v7, %v11020_v5 }
 0x1eb   : > { %v7942_v6 = vpop.permute.xlu1 %2052  ;;  %2016 = vrot.lane.b32.xlu0 %v11002_v40, %s10965_s0 }
 0x1ed   : > { %v7946_v32 = vpop.permute.xlu0 %2085  ;;  %2743 = vrot.lane.b32.xlu1 %v11002_v40, %s10887_s25 }
 0x1ef   : > { %v7954_v54 = vpop.permute.xlu1 %2087  ;;  %2127 = vrot.lane.b32.xlu0 %v11002_v40, %s10816_s26 }
 0x1f1   : > { %v2197_v25 = vpop.permute.xlu0 %2196  ;;  %1915 = vrot.lane.b32.xlu1 %v7959_v24, %s10893_s24 }
 0x1f3   : > { %v2164_v50 = vpop.permute.xlu1 %2163  ;;  %1986 = vrot.lane.b32.xlu0 %v7965_v38, %s10956_s17 }
 0x1f5   : > { %v7969_v15 = vpop.permute.xlu0 %2769  ;;  %1988 = vrot.lane.b32.xlu1 %v7952_v9, %s10956_s17 }
 0x1f6   : > { %11006 = vst [vmem:[#allocation173_spill] sm:$0xff] %v7969_v15 }
 0x1f7   : > { %v2199_v63 = vpop.permute.xlu1 %2198  ;;  %2097 = vrot.lane.b32.xlu0 %v7965_v38, %s10867_s14 }
 0x1f9   : > { %v7977_v23 = vpop.permute.xlu0 %3396  ;;  %2064 = vrot.lane.b32.xlu1 %v7959_v24, %s10862_s21 }
 0x1fa   : > { %11008 = vst [vmem:[#allocation71_spill] sm:$0xff] %v7977_v23  ;;  %v11014_v23 = vld [vmem:[#allocation104_spill] sm:$0xff] }
 0x1fb   : > { %v7982_v15 = vpop.permute.xlu1 %3367  ;;  %2208 = vrot.lane.b32.xlu0 %v7965_v38, %s10923_s20  ;;  %v2231_v28 = vsel %vm11016_vm1, %v11015_v52, %v11014_v23  ;;  %v2295_v23 = vsel %vm2289_vm4, %v2262_v37, %v11023_v55  ;;  %v8029_v37 = vrot.slane %v7959_v24, 1  ;;  %vm11029_vm1 = vcmask 293888  }
 0x1fc   : > { %11010 = vst [vmem:[#allocation67_spill] sm:$0xff] %v7982_v15  ;;  %v11019_v15 = vld [vmem:[#allocation106_spill] sm:$0xff] }
 0x1fd   : > { %v7989_v18 = vpop.permute.xlu0 %1901  ;;  %2099 = vrot.lane.b32.xlu1 %v7952_v9, %s10867_s14  ;;  %v2264_v40 = vsel %vm2256_vm13, %v2231_v28, %v11019_v15  ;;  %v2328_v28 = vsel %vm2322_vm6, %v2295_v23, %v7847_v31 }
 0x1fe   : > { %v2297_v41 = vsel %vm2289_vm4, %v2264_v40, %v11022_v30  ;;  %v2361_v55 = vsel %vm2355_vm9, %v2328_v28, %v7728_v22 }
 0x1ff   : > { %v8003_v39 = vpop.permute.xlu1 %3437  ;;  %1913 = vrot.lane.b32.xlu0 %v7997_v13, %s10893_s24  ;;  %v2330_v1 = vsel %vm2322_vm6, %v2297_v41, %v7701_v11  ;;  %v2829_v11 = vrot.slane %v11009_v51, 1  ;;  %v2833_v41 = vrot.slane %v1869_v43, 2 }
 0x200   : > { %11021 = vst [vmem:[#allocation104_spill] sm:$0xff] %v8003_v39  ;;  %v2363_v5 = vsel %vm2355_vm9, %v2330_v1, %v7741_v60  ;;  %v2830_v60 = vrot.slane %v11007_v46, 2 }
 0x201   : > { %v8015_v15 = vpop.permute.xlu0 %2050  ;;  %2175 = vrot.lane.b32.xlu1 %v7959_v24, %s10840_s13  ;;  %v2396_v7 = vsel %vm10647_vm15, %v2363_v5, %v7893_v21  ;;  %v2394_v21 = vsel %vm10647_vm15, %v2361_v55, %v7899_v45 }
 0x202   : > { %v2429_v31 = vsel %vm2421_vm10, %v2396_v7, %v2164_v50  ;;  %v2831_v46 = vor.u32 %v2830_v60, %v2829_v11  ;;  %v2834_v50 = vor.u32 %v2833_v41, %v8029_v37  ;;  %v1959_v60 = vrot.slane %v7260_v48, 1 }
 0x203   : > { %v8023_v26 = vpop.permute.xlu1 %2915  ;;  %2062 = vrot.lane.b32.xlu0 %v7997_v13, %s10862_s21  ;;  %v2462_v40 = vsel %vm10641_vm11, %v2429_v31, %v2199_v63  ;;  %v8063_v41 = vrot.slane %v7512_v49, 1 }
 0x204   : > { %11024 = vst [vmem:[#allocation106_spill] sm:$0xff] %v8023_v26  ;;  %v2503_v22 = vshll.u32 %v2462_v40, 16  ;;  %v8054_v31 = vsel %vm11026_vm5, %v2831_v46, %v2834_v50  ;;  %vm11031_vm5 = vcmask 1046528  }
 0x205   : > { %v2162_v30 = vpop.permute.xlu0 %2161  ;;  %2210 = vrot.lane.b32.xlu1 %v7952_v9, %s10923_s20  ;;  %11027 = vst [vmem:[#allocation122_spill] sm:$0xff] %v8054_v31 }
 0x206   : > { %v2427_v23 = vsel %vm2421_vm10, %v2394_v21, %v2162_v30 }
 0x207   : > { %v2460_v1 = vsel %vm10641_vm11, %v2427_v23, %v2197_v25  ;;  %v8042_v5 = vpop.permute.xlu1 %2010  ;;  %2173 = vrot.lane.b32.xlu0 %v7997_v13, %s10840_s13  ;;  %v2505_v25 = vrot.slane %v2503_v22, 1  ;;  %v8074_v23 = vsel %vm11031_vm5, %v1959_v60, %v8063_v41 }
 0x208   : > { %v2499_v43 = vshll.u32 %v2460_v1, 16  ;;  %v2497_v63 = vshrl.u32 %v2460_v1, 16  ;;  %11032 = vst [vmem:[#allocation174_spill] sm:$0xff] %v8074_v23 }
 0x209   : > { %v8047_v45 = vpop.permute.xlu0 %2844  ;;  %2775 = vrot.lane.b32.xlu1 %v7965_v38, %s10893_s24 }
 0x20a   : > { %11025 = vst [vmem:[#allocation105_spill] sm:$0xff] %v8047_v45  ;;  %v2501_v28 = vrot.slane %v2499_v43, 1  ;;  %v1880_v43 = vrot.slane %v7584_v35, 1 }
 0x20b   : > { %v2122_v7 = vpop.permute.xlu1 %2121  ;;  %2020 = vrot.lane.b32.xlu0 %v7260_v48, %s10965_s0 }
 0x20c   : > { %v2502_v55 = vor.u32 %v2501_v28, %v2497_v63  ;;  %v1881_v63 = vor.u32 %v1880_v43, %v7581_v56  ;;  %v11034_v28 = vshll.u32 %v7512_v49, 16 }
 0x20d   : > { %v8056_v21 = vpop.permute.xlu0 %2008  ;;  %2850 = vrot.lane.b32.xlu1 %v8054_v31, %s10956_s17 }
 0x20e   : > { %v2506_v11 = vsel %vm11028_vm7, %v2502_v55, %v2505_v25  ;;  %v1885_v25 = vrot.slane %v11034_v28, 1 }
 0x20f   : > { %5549 = vmatmul.mubr.msk.bf16.vlgmr.msra.gmra.mxu1 %vm11029_vm1, %v2506_v11  ;;  %v8066_v40 = vpop.permute.xlu1 %2739  ;;  %2131 = vrot.lane.b32.xlu0 %v7260_v48, %s10816_s26  ;;  %vm11037_vm1 = vcmask 31744  }
 0x210   : > { %11030 = vst [vmem:[#allocation124_spill] sm:$0xff] %v8066_v40  ;;  %v8105_v11 = vsel %vm11028_vm7, %v1881_v63, %v1885_v25  ;;  %v11036_v40 = vld [vmem:[#allocation47_spill] sm:$0xff]  ;;  %v11038_v63 = vld [vmem:[#allocation46_spill] sm:$0xff]  ;;  %vm11039_vm5 = vmmov %vm11037_vm1  ;;  %vm11043_vm7 = vcmask 1046528  }
 0x211   : > { %v2120_v30 = vpop.permute.xlu0 %2119  ;;  %2022 = vrot.lane.b32.xlu1 %v7512_v49, %s10965_s0  ;;  %11035 = vst [vmem:[#allocation176_spill] sm:$0xff] %v8105_v11  ;;  %v2235_v25 = vsel %vm11039_vm5, %v11038_v63, %v7623_v8  ;;  %vm11048_vm5 = vcmask 293888  }
 0x212   : > { %v2268_v45 = vsel %vm2256_vm13, %v2235_v25, %v7666_v16 }
 0x213   : > { %v8076_v1 = vpop.permute.xlu1 %1907  ;;  %1990 = vrot.lane.b32.xlu0 %v8074_v23, %s10956_s17 }
 0x215   : > { %v8080_v22 = vpop.permute.xlu0 %2901  ;;  %2133 = vrot.lane.b32.xlu1 %v7512_v49, %s10816_s26 }
 0x216   : > { %11033 = vst [vmem:[#allocation175_spill] sm:$0xff] %v8080_v22  ;;  %v2233_v22 = vsel %vm11037_vm1, %v11036_v40, %v7811_v10  ;;  %v2301_v10 = vsel %vm2289_vm4, %v2268_v45, %v7882_v62  ;;  %vm11046_vm1 = vsmask.f32 7424 }
 0x217   : > { %v8085_v46 = vpop.permute.xlu1 %1980  ;;  %2101 = vrot.lane.b32.xlu0 %v8074_v23, %s10867_s14  ;;  %v2266_v39 = vsel %vm2256_vm13, %v2233_v22, %v7690_v12  ;;  %v2334_v56 = vsel %vm2322_vm6, %v2301_v10, %v7942_v6 }
 0x218   : > { %v2299_v40 = vsel %vm2289_vm4, %v2266_v39, %v7886_v27  ;;  %v2367_v12 = vsel %vm2355_vm9, %v2334_v56, %v7954_v54  ;;  %v2074_v54 = vrot.slane %v7418_v47, 1 }
 0x219   : > { %v8089_v50 = vpop.permute.xlu0 %1978  ;;  %1919 = vrot.lane.b32.xlu1 %v7539_v53, %s10893_s24  ;;  %v2332_v8 = vsel %vm2322_vm6, %v2299_v40, %v8015_v15  ;;  %v2400_v22 = vsel %vm10647_vm15, %v2367_v12, %v2122_v7  ;;  %v8160_v7 = vrot.slane %v7619_v17, 1 }
 0x21a   : > { %v2365_v39 = vsel %vm2355_vm9, %v2332_v8, %v7946_v32 }
 0x21b   : > { %v8096_v55 = vpop.permute.xlu1 %2056  ;;  %2212 = vrot.lane.b32.xlu0 %v8074_v23, %s10923_s20  ;;  %v2398_v6 = vsel %vm10647_vm15, %v2365_v39, %v2120_v30  ;;  %11041 = vst [vmem:[#allocation178_spill] sm:$0xff] %v8160_v7  ;;  %v8173_v8 = vsel %vm11043_vm7, %v2074_v54, %v8160_v7  ;;  %vm11050_vm7 = vmmov %vm11046_vm1 }
 0x21c   : > { %11044 = vst [vmem:[#allocation180_spill] sm:$0xff] %v8173_v8 }
 0x21d   : > { %v8100_v35 = vpop.permute.xlu0 %2089  ;;  %1992 = vrot.lane.b32.xlu1 %v8063_v41, %s10956_s17 }
 0x21f   : > { %v8107_v60 = vpop.permute.xlu1 %2091  ;;  %1917 = vrot.lane.b32.xlu0 %v8105_v11, %s10893_s24 }
 0x221   : > { %v2201_v43 = vpop.permute.xlu0 %2200  ;;  %2068 = vrot.lane.b32.xlu1 %v7539_v53, %s10862_s21 }
 0x223   : > { %v2168_v28 = vpop.permute.xlu1 %2167  ;;  %2066 = vrot.lane.b32.xlu0 %v8105_v11, %s10862_s21 }
 0x224   : > { %v2433_v27 = vsel %vm2421_vm10, %v2400_v22, %v2168_v28 }
 0x225   : > { %v8118_v26 = vpop.permute.xlu0 %1905  ;;  %2103 = vrot.lane.b32.xlu1 %v8063_v41, %s10867_s14 }
 0x227   : > { %v2203_v52 = vpop.permute.xlu1 %2202  ;;  %2177 = vrot.lane.b32.xlu0 %v8105_v11, %s10840_s13 }
 0x228   : > { %v2466_v15 = vsel %vm10641_vm11, %v2433_v27, %v2203_v52 }
 0x229   : > { %v8139_v16 = vpop.permute.xlu0 %2054  ;;  %2179 = vrot.lane.b32.xlu1 %v7539_v53, %s10840_s13  ;;  %v2513_v30 = vshll.u32 %v2466_v15, 16 }
 0x22b   : > { %v8146_v62 = vpop.permute.xlu1 %2771  ;;  %2024 = vrot.lane.b32.xlu0 %v7418_v47, %s10965_s0  ;;  %v2515_v22 = vrot.slane %v2513_v30, 1 }
 0x22c   : > { %11040 = vst [vmem:[#allocation177_spill] sm:$0xff] %v8146_v62  ;;  %v11054_v62 = vshll.u32 %v7637_v33, 16 }
 0x22d   : > { %v2166_v45 = vpop.permute.xlu0 %2165  ;;  %2214 = vrot.lane.b32.xlu1 %v8063_v41, %s10923_s20 }
 0x22e   : > { %v2431_v56 = vsel %vm2421_vm10, %v2398_v6, %v2166_v45  ;;  %v11047_v45 = vshll.u32 %v7619_v17, 16 }
 0x22f   : > { %v2464_v40 = vsel %vm10641_vm11, %v2431_v56, %v2201_v43  ;;  %v8163_v32 = vpop.permute.xlu1 %3441  ;;  %2135 = vrot.lane.b32.xlu0 %v7418_v47, %s10816_s26  ;;  %v2033_v43 = vrot.slane %v7676_v29, 1 }
 0x230   : > { %11042 = vst [vmem:[#allocation179_spill] sm:$0xff] %v8163_v32  ;;  %v2509_v52 = vshll.u32 %v2464_v40, 16  ;;  %v2507_v25 = vshrl.u32 %v2464_v40, 16  ;;  %v2038_v56 = vrot.slane %v11047_v45, 1  ;;  %v2153_v32 = vrot.slane %v11054_v62, 1 }
 0x231   : > { %v8167_v28 = vpop.permute.xlu0 %2012  ;;  %2026 = vrot.lane.b32.xlu1 %v7619_v17, %s10965_s0  ;;  %v2034_v15 = vor.u32 %v2033_v43, %v7640_v42 }
 0x232   : > { %v2511_v10 = vrot.slane %v2509_v52, 1 }
 0x233   : > { %v8176_v12 = vpop.permute.xlu1 %2846  ;;  %2105 = vrot.lane.b32.xlu0 %v8173_v8, %s10867_s14  ;;  %v8196_v40 = vsel %vm11050_vm7, %v2034_v15, %v2038_v56  ;;  %v2148_v15 = vrot.slane %v7688_v58, 1 }
 0x234   : > { %11045 = vst [vmem:[#allocation181_spill] sm:$0xff] %v8176_v12  ;;  %v2512_v39 = vor.u32 %v2511_v10, %v2507_v25  ;;  %11051 = vst [vmem:[#allocation183_spill] sm:$0xff] %v8196_v40 }
 0x235   : > { %v2124_v27 = vpop.permute.xlu0 %2123  ;;  %2137 = vrot.lane.b32.xlu1 %v7619_v17, %s10816_s26  ;;  %v2149_v12 = vor.u32 %v2148_v15, %v7685_v14 }
 0x236   : > { %v2516_v6 = vsel %vm11046_vm1, %v2512_v39, %v2515_v22  ;;  %v2189_v39 = vrot.slane %v7635_v59, 1  ;;  %vm11053_vm1 = vcmask 1046528  }
 0x237   : > { %5552 = vmatprep.mubr.msk.bf16.mxu1 %vm11048_vm5, %v2516_v6  ;;  %v8187_v29 = vpop.permute.xlu1 %2014  ;;  %2216 = vrot.lane.b32.xlu0 %v8173_v8, %s10923_s20  ;;  %v8220_v6 = vrot.slane %v7637_v33, 1  ;;  %vm11056_vm5 = vcmask 31744  }
 0x238   : > { %vm11058_vm7 = vmmov %vm11056_vm5 }
 0x239   : > { %v8191_v54 = vpop.permute.xlu0 %2741  ;;  %2072 = vrot.lane.b32.xlu1 %v7663_v36, %s10862_s21 }
 0x23a   : > { %11049 = vst [vmem:[#allocation182_spill] sm:$0xff] %v8191_v54  ;;  %v8233_v54 = vsel %vm11053_vm1, %v2189_v39, %v8220_v6  ;;  %v11057_v39 = vld [vmem:[#allocation68_spill] sm:$0xff]  ;;  %vm11059_vm1 = vsmask.f32 7424 }
 0x23b   : > { %v2126_v30 = vpop.permute.xlu1 %2125  ;;  %2070 = vrot.lane.b32.xlu0 %v8196_v40, %s10862_s21  ;;  %v2239_v15 = vsel %vm11058_vm7, %v11057_v39, %v7923_v61  ;;  %v8253_v62 = vsel %vm11059_vm1, %v2149_v12, %v2153_v32  ;;  %vm11067_vm7 = vcmask 293888  }
 0x23c   : > { %11060 = vst [vmem:[#allocation68_spill] sm:$0xff] %v8253_v62  ;;  %v2272_v14 = vsel %vm2256_vm13, %v2239_v15, %v7934_v57 }
 0x23d   : > { %v8200_v52 = vpop.permute.xlu0 %1982  ;;  %2107 = vrot.lane.b32.xlu1 %v8160_v7, %s10867_s14 }
 0x23f   : > { %v8204_v25 = vpop.permute.xlu1 %1911  ;;  %2181 = vrot.lane.b32.xlu0 %v8196_v40, %s10840_s13 }
 0x241   : > { %v8208_v10 = vpop.permute.xlu0 %2093  ;;  %2183 = vrot.lane.b32.xlu1 %v7663_v36, %s10840_s13 }
 0x243   : > { %v8212_v43 = vpop.permute.xlu1 %1984  ;;  %2139 = vrot.lane.b32.xlu0 %v7635_v59, %s10816_s26 }
 0x245   : > { %v2205_v22 = vpop.permute.xlu0 %2204  ;;  %2218 = vrot.lane.b32.xlu1 %v8160_v7, %s10923_s20 }
 0x247   : > { %v8223_v45 = vpop.permute.xlu1 %2060  ;;  %2917 = vrot.lane.b32.xlu0 %v7506_v20, %s10867_s14  ;;  %v11055_v20 = vld [vmem:[#allocation70_spill] sm:$0xff] }
 0x249   : > { %v8227_v56 = vpop.permute.xlu0 %2773  ;;  %2141 = vrot.lane.b32.xlu1 %v7637_v33, %s10816_s26 }
 0x24a   : > { %11052 = vst [vmem:[#allocation184_spill] sm:$0xff] %v8227_v56  ;;  %v2237_v56 = vsel %vm11056_vm5, %v11055_v20, %v7989_v18  ;;  %v2305_v18 = vsel %vm2289_vm4, %v2272_v14, %v8042_v5  ;;  %v11061_v14 = vrot.slane %v7449_v44, 7  ;;  %vm11066_vm5 = vmmov %vm11059_vm1  ;;  %vm11076_vm1 = vcmask 31744  }
 0x24b   : > { %v8238_v58 = vpop.permute.xlu1 %2095  ;;  %2220 = vrot.lane.b32.xlu0 %v8233_v54, %s10923_s20  ;;  %v2270_v33 = vsel %vm2256_vm13, %v2237_v56, %v7938_v0  ;;  %v2338_v61 = vsel %vm2322_vm6, %v2305_v18, %v8096_v55 }
 0x24c   : > { %v2303_v20 = vsel %vm2289_vm4, %v2270_v33, %v8056_v21  ;;  %v2371_v0 = vsel %vm2355_vm9, %v2338_v61, %v8107_v60 }
 0x24d   : > { %v8245_v63 = vpop.permute.xlu0 %1909  ;;  %2187 = vrot.lane.b32.xlu1 %v7682_v2, %s10840_s13  ;;  %v2336_v32 = vsel %vm2322_vm6, %v2303_v20, %v8139_v16  ;;  %v2404_v12 = vsel %vm10647_vm15, %v2371_v0, %v2126_v30  ;;  %v11062_v16 = vld [vmem:[#allocation77_spill] sm:$0xff] }
 0x24e   : > { %v2369_v33 = vsel %vm2355_vm9, %v2336_v32, %v8100_v35  ;;  %v11063_v60 = vrot.slane %v11062_v16, 7 }
 0x24f   : > { %v2172_v7 = vpop.permute.xlu1 %2171  ;;  %2185 = vrot.lane.b32.xlu0 %v8253_v62, %s10840_s13  ;;  %v2402_v20 = vsel %vm10647_vm15, %v2369_v33, %v2124_v27  ;;  %v11065_v27 = vld [vmem:[#allocation76_spill] sm:$0xff] }
 0x250   : > { %v2437_v5 = vsel %vm2421_vm10, %v2404_v12, %v2172_v7 }
 0x251   : > { %v2059_v57 = vpop.permute.xlu0 %2058  ;;  %2222 = vrot.lane.b32.xlu1 %v8220_v6, %s10923_s20 }
 0x253   : > { %v2207_v56 = vpop.permute.xlu1 %2206  ;;  %3443 = vrot.lane.b32.xlu0 %v11061_v14, %s10965_s0 }
 0x254   : > { %v2470_v21 = vsel %vm10641_vm11, %v2437_v5, %v2207_v56 }
 0x255   : > { %v2170_v55 = vpop.permute.xlu0 %2169  ;;  %3439 = vrot.lane.b32.xlu1 %v11063_v60, %s10965_s0  ;;  %v2523_v35 = vshll.u32 %v2470_v21, 16  ;;  %v11071_v60 = vld [vmem:[#allocation73_spill] sm:$0xff] }
 0x256   : > { %v2435_v30 = vsel %vm2421_vm10, %v2402_v20, %v2170_v55  ;;  %v11069_v20 = vld [vmem:[#allocation102_spill] sm:$0xff] }
 0x257   : > { %v2468_v15 = vsel %vm10641_vm11, %v2435_v30, %v2205_v22  ;;  %v8287_v44 = vpop.permute.xlu1 %2018  ;;  %2933 = vrot.lane.b32.xlu0 %v7491_v19, %s10816_s26  ;;  %v2525_v12 = vrot.slane %v2523_v35, 1  ;;  %v11070_v55 = vld [vmem:[#allocation74_spill] sm:$0xff] }
 0x258   : > { %v2519_v7 = vshll.u32 %v2468_v15, 16  ;;  %v2517_v61 = vshrl.u32 %v2468_v15, 16  ;;  %v11072_v15 = vld [vmem:[#allocation83_spill] sm:$0xff] }
 0x259   : > { %v8291_v18 = vpop.permute.xlu0 %2848  ;;  %2931 = vrot.lane.b32.xlu1 %v11065_v27, %s10816_s26 }
 0x25a   : > { %11064 = vst [vmem:[#allocation77_spill] sm:$0xff] %v8291_v18  ;;  %v2521_v32 = vrot.slane %v2519_v7, 1  ;;  %v11078_v18 = vld [vmem:[#allocation48_spill] sm:$0xff] }
 0x25b   : > { %v2130_v0 = vpop.permute.xlu1 %2129  ;;  %3473 = vrot.lane.b32.xlu0 %v7323_v3, %s10862_s21 }
 0x25c   : > { %v2522_v22 = vor.u32 %v2521_v32, %v2517_v61  ;;  %v11073_v61 = vld [vmem:[#allocation134_spill] sm:$0xff] }
 0x25d   : > { %v8297_v56 = vpop.permute.xlu0 %2016  ;;  %3471 = vrot.lane.b32.xlu1 %v11057_v39, %s10862_s21 }
 0x25e   : > { %v2526_v14 = vsel %vm11066_vm5, %v2522_v22, %v2525_v12  ;;  %v11074_v12 = vld [vmem:[#allocation113_spill] sm:$0xff]  ;;  %vm11077_vm5 = vmmov %vm11076_vm1 }
 0x25f   : > { %5553 = vmatmul.mubr.msk.bf16.gmra.mxu1 %vm11067_vm7, %v2526_v14  ;;  %v8303_v33 = vpop.permute.xlu1 %2743  ;;  %2956 = vrot.lane.b32.xlu0 %v7717_v4, %s10840_s13  ;;  %v11075_v14 = vld [vmem:[#allocation42_spill] sm:$0xff]  ;;  %vm11087_vm7 = vsmask.f32 7424 }
 0x260   : > { %11068 = vst [vmem:[#allocation76_spill] sm:$0xff] %v8303_v33  ;;  %v2243_v33 = vsel %vm11077_vm5, %v7323_v3, %v8076_v1 }
 0x261   : > { %v2128_v5 = vpop.permute.xlu0 %2127  ;;  %2954 = vrot.lane.b32.xlu1 %v11069_v20, %s10840_s13  ;;  %v2276_v20 = vsel %vm2256_vm13, %v2243_v33, %v8085_v46  ;;  %v11079_v46 = vld [vmem:[#allocation148_spill] sm:$0xff] }
 0x262   : > { %v2309_v19 = vsel %vm2289_vm4, %v2276_v20, %v8187_v29  ;;  %v11082_v20 = vld [vmem:[#allocation57_spill] sm:$0xff] }
 0x263   : > { %v8309_v21 = vpop.permute.xlu1 %1915  ;;  %3527 = vrot.lane.b32.xlu0 %v11070_v55, %s10816_s26  ;;  %v2241_v55 = vsel %vm11076_vm1, %v11075_v14, %v8118_v26  ;;  %vm11088_vm1 = vcmask 293888  }
 0x264   : > { %v2274_v4 = vsel %vm2256_vm13, %v2241_v55, %v8089_v50 }
 0x265   : > { %v8313_v16 = vpop.permute.xlu0 %1986  ;;  %3502 = vrot.lane.b32.xlu1 %v11071_v60, %s10867_s14  ;;  %v2307_v26 = vsel %vm2289_vm4, %v2274_v4, %v8167_v28 }
 0x266   : > { %v2340_v1 = vsel %vm2322_vm6, %v2307_v26, %v2059_v57  ;;  %v11080_v57 = vld [vmem:[#allocation69_spill] sm:$0xff] }
 0x267   : > { %v8317_v30 = vpop.permute.xlu1 %1988  ;;  %3556 = vrot.lane.b32.xlu0 %v11072_v15, %s10840_s13  ;;  %v2373_v4 = vsel %vm2355_vm9, %v2340_v1, %v8208_v10 }
 0x268   : > { %v2406_v28 = vsel %vm10647_vm15, %v2373_v4, %v2128_v5  ;;  %v11083_v5 = vld [vmem:[#allocation152_spill] sm:$0xff] }
 0x269   : > { %v8321_v35 = vpop.permute.xlu0 %2097  ;;  %3504 = vrot.lane.b32.xlu1 %v7421_v34, %s10867_s14  ;;  %v2342_v34 = vsel %vm2322_vm6, %v2309_v19, %v8223_v45 }
 0x26a   : > { %v2375_v50 = vsel %vm2355_vm9, %v2342_v34, %v8238_v58 }
 0x26b   : > { %v8325_v7 = vpop.permute.xlu1 %2064  ;;  %3558 = vrot.lane.b32.xlu0 %v11073_v61, %s10840_s13  ;;  %v2408_v33 = vsel %vm10647_vm15, %v2375_v50, %v2130_v0 }
 0x26d   : > { %v2209_v32 = vpop.permute.xlu0 %2208  ;;  %3529 = vrot.lane.b32.xlu1 %v11074_v12, %s10816_s26 }
 0x26f   : > { %v8331_v22 = vpop.permute.xlu1 %2099  ;;  %3369 = vrot.lane.b32.xlu0 %v11074_v12, %s10893_s24 }
 0x271   : > { %v8338_v15 = vpop.permute.xlu0 %1913  ;;  %3347 = vrot.lane.b32.xlu1 %v7323_v3, %s10887_s25 }
 0x273   : > { %v2176_v12 = vpop.permute.xlu1 %2175  ;;  %2903 = vrot.lane.b32.xlu0 %v11078_v18, %s10862_s21 }
 0x274   : > { %v2441_v19 = vsel %vm2421_vm10, %v2408_v33, %v2176_v12  ;;  %v11085_v33 = vld [vmem:[#allocation52_spill] sm:$0xff] }
 0x275   : > { %v2063_v3 = vpop.permute.xlu0 %2062  ;;  %3349 = vrot.lane.b32.xlu1 %v11079_v46, %s10887_s25 }
 0x277   : > { %v2211_v55 = vpop.permute.xlu1 %2210  ;;  %3398 = vrot.lane.b32.xlu0 %v11073_v61, %s10956_s17 }
 0x278   : > { %v2474_v29 = vsel %vm10641_vm11, %v2441_v19, %v2211_v55  ;;  %v11086_v19 = vld [vmem:[#allocation72_spill] sm:$0xff] }
 0x279   : > { %v2174_v45 = vpop.permute.xlu0 %2173  ;;  %3445 = vrot.lane.b32.xlu1 %v11080_v57, %s10965_s0  ;;  %v2533_v10 = vshll.u32 %v2474_v29, 16  ;;  %v11089_v57 = vld [vmem:[#allocation166_spill] sm:$0xff] }
 0x27a   : > { %v2439_v34 = vsel %vm2421_vm10, %v2406_v28, %v2174_v45 }
 0x27b   : > { %v2472_v58 = vsel %vm10641_vm11, %v2439_v34, %v2209_v32  ;;  %v8374_v0 = vpop.permute.xlu1 %2775  ;;  %2905 = vrot.lane.b32.xlu0 %v11082_v20, %s10862_s21  ;;  %v2535_v32 = vrot.slane %v2533_v10, 1 }
 0x27c   : > { %11081 = vst [vmem:[#allocation74_spill] sm:$0xff] %v8374_v0  ;;  %v2529_v61 = vshll.u32 %v2472_v58, 16  ;;  %v2527_v26 = vshrl.u32 %v2472_v58, 16  ;;  %v11090_v58 = vrot.slane %v11009_v51, 7  ;;  %v11094_v51 = vld [vmem:[#allocation168_spill] sm:$0xff] }
 0x27d   : > { %v8378_v12 = vpop.permute.xlu0 %2020  ;;  %3371 = vrot.lane.b32.xlu1 %v11083_v5, %s10893_s24 }
 0x27e   : > { %v2531_v1 = vrot.slane %v2529_v61, 1  ;;  %v11091_v61 = vld [vmem:[#allocation65_spill] sm:$0xff] }
 0x27f   : > { %v8382_v50 = vpop.permute.xlu1 %2850  ;;  %3400 = vrot.lane.b32.xlu0 %v11085_v33, %s10956_s17 }
 0x280   : > { %11084 = vst [vmem:[#allocation73_spill] sm:$0xff] %v8382_v50  ;;  %v2532_v55 = vor.u32 %v2531_v1, %v2527_v26  ;;  %v11092_v26 = vrot.slane %v11091_v61, 7 }
 0x281   : > { %v2132_v4 = vpop.permute.xlu0 %2131  ;;  %3449 = vrot.lane.b32.xlu1 %v11086_v19, %s10965_s0 }
 0x282   : > { %v2536_v28 = vsel %vm11087_vm7, %v2532_v55, %v2535_v32  ;;  %v11093_v55 = vld [vmem:[#allocation157_spill] sm:$0xff]  ;;  %vm11096_vm7 = vmmov %vm11077_vm5 }
 0x283   : > { %5556 = vmatprep.mubr.msk.bf16.mxu1 %vm11088_vm1, %v2536_v28  ;;  %v8390_v29 = vpop.permute.xlu1 %2022  ;;  %2921 = vrot.lane.b32.xlu0 %v7997_v13, %s10867_s14  ;;  %v2245_v28 = vsel %vm11077_vm5, %v11078_v18, %v8245_v63  ;;  %v11095_v63 = vld [vmem:[#allocation170_spill] sm:$0xff]  ;;  %vm11098_vm1 = vsmask.f32 7424  ;;  %vm11099_vm5 = vcmask 293888  }
 0x284   : > { %v2278_v61 = vsel %vm2256_vm13, %v2245_v28, %v8200_v52  ;;  %v2247_v28 = vsel %vm11096_vm7, %v11079_v46, %v8204_v25 }
 0x285   : > { %v8394_v45 = vpop.permute.xlu0 %1990  ;;  %2919 = vrot.lane.b32.xlu1 %v11089_v57, %s10867_s14  ;;  %v2311_v50 = vsel %vm2289_vm4, %v2278_v61, %v8297_v56 }
 0x286   : > { %v2344_v0 = vsel %vm2322_vm6, %v2311_v50, %v2063_v3  ;;  %v11097_v3 = vld [vmem:[#allocation158_spill] sm:$0xff]  ;;  %v2280_v50 = vsel %vm2256_vm13, %v2247_v28, %v8212_v43 }
 0x287   : > { %v2134_v34 = vpop.permute.xlu1 %2133  ;;  %3451 = vrot.lane.b32.xlu0 %v11090_v58, %s10965_s0  ;;  %v2377_v52 = vsel %vm2355_vm9, %v2344_v0, %v8321_v35 }
 0x288   : > { %v2410_v56 = vsel %vm10647_vm15, %v2377_v52, %v2132_v4 }
 0x289   : > { %v8401_v10 = vpop.permute.xlu0 %2101  ;;  %3447 = vrot.lane.b32.xlu1 %v11092_v26, %s10965_s0 }
 0x28b   : > { %v8406_v1 = vpop.permute.xlu1 %1919  ;;  %2937 = vrot.lane.b32.xlu0 %v7965_v38, %s10816_s26 }
 0x28d   : > { %v2213_v32 = vpop.permute.xlu0 %2212  ;;  %2935 = vrot.lane.b32.xlu1 %v11093_v55, %s10816_s26  ;;  %v11190_v55 = vld [vmem:[#allocation132_spill] sm:$0xff] }
 0x28f   : > { %v8412_v19 = vpop.permute.xlu1 %1992  ;;  %3477 = vrot.lane.b32.xlu0 %v11094_v51, %s10862_s21 }
 0x291   : > { %v8419_v58 = vpop.permute.xlu0 %1917  ;;  %3475 = vrot.lane.b32.xlu1 %v11079_v46, %s10862_s21 }
 0x293   : > { %v8425_v26 = vpop.permute.xlu1 %2068  ;;  %2960 = vrot.lane.b32.xlu0 %v8054_v31, %s10840_s13 }
 0x295   : > { %v2067_v13 = vpop.permute.xlu0 %2066  ;;  %2958 = vrot.lane.b32.xlu1 %v11095_v63, %s10840_s13 }
 0x297   : > { %v8434_v38 = vpop.permute.xlu1 %2103  ;;  %3531 = vrot.lane.b32.xlu0 %v11083_v5, %s10816_s26  ;;  %v2313_v5 = vsel %vm2289_vm4, %v2280_v50, %v8287_v44 }
 0x298   : > { %v2346_v25 = vsel %vm2322_vm6, %v2313_v5, %v8325_v7 }
 0x299   : > { %v2178_v61 = vpop.permute.xlu0 %2177  ;;  %3506 = vrot.lane.b32.xlu1 %v11097_v3, %s10867_s14  ;;  %v2379_v52 = vsel %vm2355_vm9, %v2346_v25, %v8331_v22  ;;  %v2249_v25 = vsel %vm11096_vm7, %v11082_v20, %v8338_v15  ;;  %v11193_v20 = vld [vmem:[#allocation161_spill] sm:$0xff] }
 0x29a   : > { %v2443_v63 = vsel %vm2421_vm10, %v2410_v56, %v2178_v61  ;;  %v2412_v43 = vsel %vm10647_vm15, %v2379_v52, %v2134_v34  ;;  %v2282_v52 = vsel %vm2256_vm13, %v2249_v25, %v8313_v16 }
 0x29b   : > { %v2476_v35 = vsel %vm10641_vm11, %v2443_v63, %v2213_v32  ;;  %v2180_v0 = vpop.permute.xlu1 %2179  ;;  %3533 = vrot.lane.b32.xlu0 %v7952_v9, %s10816_s26 }
 0x29c   : > { %v2539_v4 = vshll.u32 %v2476_v35, 16  ;;  %v2445_v32 = vsel %vm2421_vm10, %v2412_v43, %v2180_v0  ;;  %v2537_v28 = vshrl.u32 %v2476_v35, 16  ;;  %v11100_v43 = vld [vmem:[#allocation139_spill] sm:$0xff] }
 0x29d   : > { %v8458_v31 = vpop.permute.xlu0 %2024  ;;  %3508 = vrot.lane.b32.xlu1 %v7959_v24, %s10867_s14 }
 0x29e   : > { %v2541_v44 = vrot.slane %v2539_v4, 1 }
 0x29f   : > { %v2215_v63 = vpop.permute.xlu1 %2214  ;;  %3351 = vrot.lane.b32.xlu0 %v11094_v51, %s10887_s25 }
 0x2a0   : > { %v2478_v7 = vsel %vm10641_vm11, %v2445_v32, %v2215_v63  ;;  %v2542_v22 = vor.u32 %v2541_v44, %v2537_v28  ;;  %v2315_v44 = vsel %vm2289_vm4, %v2282_v52, %v8378_v12 }
 0x2a1   : > { %v2543_v56 = vshll.u32 %v2478_v7, 16  ;;  %v2136_v61 = vpop.permute.xlu0 %2135  ;;  %3353 = vrot.lane.b32.xlu1 %v7260_v48, %s10887_s25 }
 0x2a3   : > { %v2545_v50 = vrot.slane %v2543_v56, 1  ;;  %v2027_v5 = vpop.permute.xlu1 %2026  ;;  %3562 = vrot.lane.b32.xlu0 %v8029_v37, %s10840_s13 }
 0x2a5   : > { %v8471_v34 = vpop.permute.xlu0 %2105  ;;  %3560 = vrot.lane.b32.xlu1 %v11085_v33, %s10840_s13  ;;  %v2546_v0 = vsel %vm11098_vm1, %v2542_v22, %v2545_v50  ;;  %vm11101_vm1 = vmmov %vm11096_vm7 }
 0x2a6   : > { %5557 = vmatmul.mubr.msk.bf16.gmra.mxu1 %vm11099_vm5, %v2546_v0  ;;  %v2251_v63 = vsel %vm11101_vm1, %v11094_v51, %v8309_v21  ;;  %v11103_v0 = vld [vmem:[#allocation146_spill] sm:$0xff]  ;;  %vm11105_vm5 = vmmov %vm11101_vm1 }
 0x2a7   : > { %v2138_v35 = vpop.permute.xlu1 %2137  ;;  %3373 = vrot.lane.b32.xlu0 %v7952_v9, %s10893_s24  ;;  %v2348_v9 = vsel %vm2322_vm6, %v2315_v44, %v2067_v13  ;;  %v11102_v13 = vld [vmem:[#allocation145_spill] sm:$0xff]  ;;  %v2284_v28 = vsel %vm2256_vm13, %v2251_v63, %v8317_v30  ;;  %v11104_v44 = vld [vmem:[#allocation140_spill] sm:$0xff]  ;;  %vm11107_vm7 = vmmov %vm11101_vm1  ;;  %vm11108_vm1 = vsmask.f32 7424 }
 0x2a8   : > { %v2381_v16 = vsel %vm2355_vm9, %v2348_v9, %v8401_v10  ;;  %v2317_v22 = vsel %vm2289_vm4, %v2284_v28, %v8390_v29 }
 0x2a9   : > { %v2217_v4 = vpop.permute.xlu0 %2216  ;;  %3375 = vrot.lane.b32.xlu1 %v8074_v23, %s10893_s24  ;;  %v2414_v7 = vsel %vm10647_vm15, %v2381_v16, %v2136_v61  ;;  %v2350_v21 = vsel %vm2322_vm6, %v2317_v22, %v8425_v26  ;;  %v2253_v26 = vsel %vm11105_vm5, %v7260_v48, %v8419_v58  ;;  %vm11109_vm5 = vcmask 293888  }
 0x2aa   : > { %v2383_v25 = vsel %vm2355_vm9, %v2350_v21, %v8434_v38 }
 0x2ab   : > { %v2073_v33 = vpop.permute.xlu1 %2072  ;;  %3453 = vrot.lane.b32.xlu0 %v11100_v43, %s10965_s0  ;;  %v2416_v30 = vsel %vm10647_vm15, %v2383_v25, %v2138_v35  ;;  %v2286_v35 = vsel %vm2256_vm13, %v2253_v26, %v8394_v45 }
 0x2ac   : > { %v2319_v58 = vsel %vm2289_vm4, %v2286_v35, %v8458_v31 }
 0x2ad   : > { %v2071_v32 = vpop.permute.xlu0 %2070  ;;  %3355 = vrot.lane.b32.xlu1 %v7512_v49, %s10887_s25 }
 0x2ae   : > { %v2352_v22 = vsel %vm2322_vm6, %v2319_v58, %v2071_v32 }
 0x2af   : > { %v2108_v15 = vpop.permute.xlu1 %2107  ;;  %3377 = vrot.lane.b32.xlu0 %v8063_v41, %s10893_s24  ;;  %v2385_v32 = vsel %vm2355_vm9, %v2352_v22, %v8471_v34 }
 0x2b1   : > { %v2182_v12 = vpop.permute.xlu0 %2181  ;;  %3404 = vrot.lane.b32.xlu1 %v11102_v13, %s10956_s17 }
 0x2b2   : > { %v2447_v56 = vsel %vm2421_vm10, %v2414_v7, %v2182_v12 }
 0x2b3   : > { %v2480_v10 = vsel %vm10641_vm11, %v2447_v56, %v2217_v4  ;;  %v2184_v50 = vpop.permute.xlu1 %2183  ;;  %3457 = vrot.lane.b32.xlu0 %v11103_v0, %s10965_s0  ;;  %v2255_v56 = vsel %vm11107_vm7, %v7512_v49, %v8406_v1  ;;  %v11110_v0 = vrot.slane %v7640_v42, 7  ;;  %vm11114_vm7 = vmmov %vm11108_vm1 }
 0x2b4   : > { %v2549_v61 = vshll.u32 %v2480_v10, 16  ;;  %v2449_v4 = vsel %vm2421_vm10, %v2416_v30, %v2184_v50  ;;  %v2547_v38 = vshrl.u32 %v2480_v10, 16  ;;  %v2288_v45 = vsel %vm2256_vm13, %v2255_v56, %v8412_v19  ;;  %v11111_v19 = vld [vmem:[#allocation127_spill] sm:$0xff] }
 0x2b5   : > { %v2140_v52 = vpop.permute.xlu0 %2139  ;;  %2907 = vrot.lane.b32.xlu1 %v7260_v48, %s10862_s21  ;;  %v2321_v50 = vsel %vm2289_vm4, %v2288_v45, %v2027_v5  ;;  %v11112_v25 = vrot.slane %v11111_v19, 7  ;;  %v11121_v19 = vld [vmem:[#allocation144_spill] sm:$0xff] }
 0x2b6   : > { %v2551_v29 = vrot.slane %v2549_v61, 1  ;;  %v2354_v1 = vsel %vm2322_vm6, %v2321_v50, %v2073_v33  ;;  %v2418_v61 = vsel %vm10647_vm15, %v2385_v32, %v2140_v52 }
 0x2b7   : > { %v2219_v43 = vpop.permute.xlu1 %2218  ;;  %3406 = vrot.lane.b32.xlu0 %v11104_v44, %s10956_s17  ;;  %v2387_v21 = vsel %vm2355_vm9, %v2354_v1, %v2108_v15 }
 0x2b8   : > { %v2482_v9 = vsel %vm10641_vm11, %v2449_v4, %v2219_v43  ;;  %v2552_v7 = vor.u32 %v2551_v29, %v2547_v38 }
 0x2b9   : > { %v2553_v16 = vshll.u32 %v2482_v9, 16  ;;  %v8525_v63 = vpop.permute.xlu0 %2917  ;;  %3402 = vrot.lane.b32.xlu1 %v8029_v37, %s10956_s17 }
 0x2ba   : > { %11106 = vst [vmem:[#allocation83_spill] sm:$0xff] %v8525_v63 }
 0x2bb   : > { %v2555_v12 = vrot.slane %v2553_v16, 1  ;;  %v2142_v28 = vpop.permute.xlu1 %2141  ;;  %3481 = vrot.lane.b32.xlu0 %v7418_v47, %s10862_s21 }
 0x2bc   : > { %v2420_v5 = vsel %vm10647_vm15, %v2387_v21, %v2142_v28  ;;  %v11120_v21 = vld [vmem:[#allocation178_spill] sm:$0xff] }
 0x2bd   : > { %v2221_v10 = vpop.permute.xlu0 %2220  ;;  %2923 = vrot.lane.b32.xlu1 %v8105_v11, %s10867_s14  ;;  %v2556_v37 = vsel %vm11108_vm1, %v2552_v7, %v2555_v12  ;;  %vm11116_vm1 = vmmov %vm11109_vm5  ;;  %v11157_v11 = vld [vmem:[#allocation11_spill] sm:$0xff] }
 0x2be   : > { %5560 = vmatprep.mubr.msk.bf16.mxu1 %vm11109_vm5, %v2556_v37  ;;  %v11119_v37 = vld [vmem:[#allocation150_spill] sm:$0xff]  ;;  %vm11167_vm5 = vcmask 1045504  }
 0x2bf   : > { %v2188_v31 = vpop.permute.xlu1 %2187  ;;  %3459 = vrot.lane.b32.xlu0 %v11110_v0, %s10965_s0 }
 0x2c0   : > { %v2453_v42 = vsel %vm2421_vm10, %v2420_v5, %v2188_v31 }
 0x2c1   : > { %3455 = vrot.lane.b32.xlu1 %v11112_v25, %s10965_s0  ;;  %v2186_v30 = vpop.permute.xlu0 %2185 }
 0x2c2   : > { %v2451_v29 = vsel %vm2421_vm10, %v2418_v61, %v2186_v30 }
 0x2c3   : > { %v2484_v33 = vsel %vm10641_vm11, %v2451_v29, %v2221_v10  ;;  %v2223_v4 = vpop.permute.xlu1 %2222  ;;  %3512 = vrot.lane.b32.xlu0 %v8196_v40, %s10867_s14  ;;  %v11123_v29 = vld [vmem:[#allocation149_spill] sm:$0xff] }
 0x2c4   : > { %v2559_v34 = vshll.u32 %v2484_v33, 16  ;;  %v2486_v15 = vsel %vm10641_vm11, %v2453_v42, %v2223_v4  ;;  %v2557_v26 = vshrl.u32 %v2484_v33, 16  ;;  %v11124_v42 = vld [vmem:[#allocation137_spill] sm:$0xff] }
 0x2c5   : > { %v2563_v52 = vshll.u32 %v2486_v15, 16  ;;  %2939 = vrot.lane.b32.xlu1 %v8074_v23, %s10816_s26  ;;  %v8566_v43 = vpop.permute.xlu0 %3443  ;;  %v11134_v23 = vld [vmem:[#allocation151_spill] sm:$0xff] }
 0x2c6   : > { %v2561_v9 = vrot.slane %v2559_v34, 1  ;;  %v11126_v34 = vld [vmem:[#allocation153_spill] sm:$0xff] }
 0x2c7   : > { %v2565_v38 = vrot.slane %v2563_v52, 1  ;;  %v8568_v16 = vpop.permute.xlu1 %3439  ;;  %3483 = vrot.lane.b32.xlu0 %v7619_v17, %s10862_s21 }
 0x2c8   : > { %v2562_v35 = vor.u32 %v2561_v9, %v2557_v26  ;;  %v11127_v26 = vld [vmem:[#allocation160_spill] sm:$0xff] }
 0x2c9   : > { %3479 = vrot.lane.b32.xlu1 %v7512_v49, %s10862_s21  ;;  %v8574_v7 = vpop.permute.xlu0 %2933  ;;  %v3433_v9 = vrot.slane %v11127_v26, 7 }
 0x2ca   : > { %11113 = vst [vmem:[#allocation134_spill] sm:$0xff] %v8574_v7  ;;  %v2566_v12 = vsel %vm11114_vm7, %v2562_v35, %v2565_v38  ;;  %vm11178_vm7 = vcmask 1041408  }
 0x2cb   : > { %v8577_v28 = vpop.permute.xlu1 %2931  ;;  %3537 = vrot.lane.b32.xlu0 %v8173_v8, %s10816_s26  ;;  %5561 = vmatmul.mubr.msk.bf16.gmra.mxu1 %vm11116_vm1, %v2566_v12  ;;  %v11130_v12 = vld [vmem:[#allocation143_spill] sm:$0xff]  ;;  %vm11179_vm1 = vmmov %vm11178_vm7 }
 0x2cc   : > { %11115 = vst [vmem:[#allocation113_spill] sm:$0xff] %v8577_v28 }
 0x2cd   : > { %2962 = vrot.lane.b32.xlu1 %v11102_v13, %s10840_s13  ;;  %v8584_v58 = vpop.permute.xlu0 %3473 }
 0x2cf   : > { %v8586_v56 = vpop.permute.xlu1 %3471  ;;  %3514 = vrot.lane.b32.xlu0 %v7663_v36, %s10867_s14  ;;  %v11139_v36 = vld [vmem:[#allocation164_spill] sm:$0xff] }
 0x2d1   : > { %3510 = vrot.lane.b32.xlu1 %v7539_v53, %s10867_s14  ;;  %v8592_v22 = vpop.permute.xlu0 %2956 }
 0x2d2   : > { %11117 = vst [vmem:[#allocation42_spill] sm:$0xff] %v8592_v22 }
 0x2d3   : > { %v8594_v10 = vpop.permute.xlu1 %2954  ;;  %3566 = vrot.lane.b32.xlu0 %v11119_v37, %s10840_s13 }
 0x2d4   : > { %11118 = vst [vmem:[#allocation69_spill] sm:$0xff] %v8594_v10 }
 0x2d5   : > { %3357 = vrot.lane.b32.xlu1 %v7418_v47, %s10887_s25  ;;  %v8600_v45 = vpop.permute.xlu0 %3527 }
 0x2d7   : > { %v8602_v50 = vpop.permute.xlu1 %3502  ;;  %3379 = vrot.lane.b32.xlu0 %v8173_v8, %s10893_s24  ;;  %v11141_v8 = vld [vmem:[#allocation156_spill] sm:$0xff] }
 0x2d9   : > { %3535 = vrot.lane.b32.xlu1 %v8063_v41, %s10816_s26  ;;  %v8608_v31 = vpop.permute.xlu0 %3556 }
 0x2db   : > { %v8610_v0 = vpop.permute.xlu1 %3504  ;;  %3564 = vrot.lane.b32.xlu0 %v11104_v44, %s10840_s13 }
 0x2dd   : > { %3361 = vrot.lane.b32.xlu1 %v7635_v59, %s10887_s25  ;;  %v8616_v1 = vpop.permute.xlu0 %3558 }
 0x2df   : > { %v8618_v32 = vpop.permute.xlu1 %3529  ;;  %3383 = vrot.lane.b32.xlu0 %v8233_v54, %s10893_s24 }
 0x2e1   : > { %3539 = vrot.lane.b32.xlu1 %v11120_v21, %s10816_s26  ;;  %v8624_v41 = vpop.permute.xlu0 %3369 }
 0x2e3   : > { %v8626_v61 = vpop.permute.xlu1 %3347  ;;  %3568 = vrot.lane.b32.xlu0 %v11121_v19, %s10840_s13 }
 0x2e5   : > { %3359 = vrot.lane.b32.xlu1 %v7619_v17, %s10887_s25  ;;  %v8632_v44 = vpop.permute.xlu0 %2903 }
 0x2e6   : > { %11122 = vst [vmem:[#allocation152_spill] sm:$0xff] %v8632_v44 }
 0x2e7   : > { %v8634_v25 = vpop.permute.xlu1 %3349  ;;  %3381 = vrot.lane.b32.xlu0 %v11120_v21, %s10893_s24  ;;  %v11131_v21 = vrot.slane %v11130_v12, 7 }
 0x2e9   : > { %3408 = vrot.lane.b32.xlu1 %v11119_v37, %s10956_s17  ;;  %v8640_v30 = vpop.permute.xlu0 %3398 }
 0x2eb   : > { %v8642_v5 = vpop.permute.xlu1 %3445  ;;  %3461 = vrot.lane.b32.xlu0 %v11123_v29, %s10965_s0 }
 0x2ed   : > { %3363 = vrot.lane.b32.xlu1 %v11124_v42, %s10887_s25  ;;  %v8648_v33 = vpop.permute.xlu0 %2905  ;;  %s10616_s25 = smov 36  }
 0x2ee   : > { %11125 = vst [vmem:[#allocation52_spill] sm:$0xff] %v8648_v33 }
 0x2ef   : > { %v8650_v4 = vpop.permute.xlu1 %3371  ;;  %3410 = vrot.lane.b32.xlu0 %v11121_v19, %s10956_s17  ;;  %v11132_v19 = vld [vmem:[#allocation159_spill] sm:$0xff] }
 0x2f0   : > { %v3436_v29 = vor.u32 %v11132_v19, %v3433_v9 }
 0x2f1   : > { %3412 = vrot.lane.b32.xlu1 %v11126_v34, %s10956_s17  ;;  %v8656_v15 = vpop.permute.xlu0 %3400 }
 0x2f3   : > { %v8658_v52 = vpop.permute.xlu1 %3449  ;;  %3485 = vrot.lane.b32.xlu0 %v7635_v59, %s10862_s21 }
 0x2f5   : > { %3385 = vrot.lane.b32.xlu1 %v8220_v6, %s10893_s24  ;;  %v8665_v38 = vpop.permute.xlu0 %2921 }
 0x2f6   : > { %11128 = vst [vmem:[#allocation72_spill] sm:$0xff] %v8665_v38 }
 0x2f7   : > { %v8667_v35 = vpop.permute.xlu1 %2919  ;;  %3463 = vrot.lane.b32.xlu0 %v11131_v21, %s10965_s0  ;;  %v11136_v21 = vld [vmem:[#allocation155_spill] sm:$0xff] }
 0x2f8   : > { %11129 = vst [vmem:[#allocation166_spill] sm:$0xff] %v8667_v35 }
 0x2f9   : > { %v8673_v13 = vpop.permute.xlu0 %3451  ;;  %3465 = vrot.lane.b32.xlu1 %v3436_v29, %s10965_s0 }
 0x2fb   : > { %v8676_v59 = vpop.permute.xlu1 %3447  ;;  %3516 = vrot.lane.b32.xlu0 %v8253_v62, %s10867_s14  ;;  %v11147_v62 = vshrl.u32 %v11141_v8, 16 }
 0x2fd   : > { %v8680_v26 = vpop.permute.xlu0 %2937  ;;  %3414 = vrot.lane.b32.xlu1 %v11134_v23, %s10956_s17 }
 0x2fe   : > { %11133 = vst [vmem:[#allocation65_spill] sm:$0xff] %v8680_v26 }
 0x2ff   : > { %v8684_v37 = vpop.permute.xlu1 %2935  ;;  %3487 = vrot.lane.b32.xlu0 %v11124_v42, %s10862_s21 }
 0x300   : > { %11135 = vst [vmem:[#allocation158_spill] sm:$0xff] %v8684_v37 }
 0x301   : > { %v8688_v12 = vpop.permute.xlu0 %3477  ;;  %3489 = vrot.lane.b32.xlu1 %v11136_v21, %s10862_s21 }
 0x303   : > { %v8692_v19 = vpop.permute.xlu1 %3475  ;;  %3541 = vrot.lane.b32.xlu0 %v8233_v54, %s10816_s26 }
 0x305   : > { %v8696_v29 = vpop.permute.xlu0 %2960  ;;  %3467 = vrot.lane.b32.xlu1 %v3433_v9, %s10965_s0 }
 0x306   : > { %11137 = vst [vmem:[#allocation139_spill] sm:$0xff] %v8696_v29 }
 0x307   : > { %v8699_v17 = vpop.permute.xlu1 %2958  ;;  %3518 = vrot.lane.b32.xlu0 %v7682_v2, %s10867_s14  ;;  %v11143_v2 = vld [vmem:[#allocation162_spill] sm:$0xff] }
 0x308   : > { %11138 = vst [vmem:[#allocation146_spill] sm:$0xff] %v8699_v17 }
 0x309   : > { %v8703_v42 = vpop.permute.xlu0 %3531  ;;  %3520 = vrot.lane.b32.xlu1 %v11139_v36, %s10867_s14 }
 0x30b   : > { %v8707_v21 = vpop.permute.xlu1 %3506  ;;  %3570 = vrot.lane.b32.xlu0 %v11126_v34, %s10840_s13  ;;  %v11145_v34 = vrot.slane %v11141_v8, 1 }
 0x30d   : > { %v8711_v54 = vpop.permute.xlu0 %3533  ;;  %3491 = vrot.lane.b32.xlu1 %v11141_v8, %s10862_s21 }
 0x30e   : > { %11140 = vst [vmem:[#allocation140_spill] sm:$0xff] %v8711_v54 }
 0x30f   : > { %v8715_v9 = vpop.permute.xlu1 %3508  ;;  %3543 = vrot.lane.b32.xlu0 %v8220_v6, %s10816_s26  ;;  %v11148_v6 = vld [vmem:[#allocation163_spill] sm:$0xff] }
 0x311   : > { %v8719_v40 = vpop.permute.xlu0 %3351  ;;  %3545 = vrot.lane.b32.xlu1 %v11143_v2, %s10816_s26  ;;  %v11150_v2 = vld [vmem:[#allocation107_spill] sm:$0xff] }
 0x312   : > { %11142 = vst [vmem:[#allocation127_spill] sm:$0xff] %v8719_v40 }
 0x313   : > { %v8723_v36 = vpop.permute.xlu1 %3353  ;;  %3547 = vrot.lane.b32.xlu0 %v11145_v34, %s10816_s26  ;;  %v11152_v34 = vld [vmem:[#allocation27_spill] sm:$0xff] }
 0x314   : > { %11144 = vst [vmem:[#allocation178_spill] sm:$0xff] %v8723_v36 }
 0x315   : > { %v8728_v47 = vpop.permute.xlu0 %3562  ;;  %3522 = vrot.lane.b32.xlu1 %v11147_v62, %s10867_s14  ;;  %v11155_v62 = vld [vmem:[#allocation41_spill] sm:$0xff] }
 0x316   : > { %11146 = vst [vmem:[#allocation144_spill] sm:$0xff] %v8728_v47  ;;  %v11195_v47 = vld [vmem:[#allocation66_spill] sm:$0xff] }
 0x317   : > { %v8733_v49 = vpop.permute.xlu1 %3560  ;;  %3576 = vrot.lane.b32.xlu0 %v11148_v6, %s10840_s13 }
 0x319   : > { %v8737_v48 = vpop.permute.xlu0 %3373  ;;  %3574 = vrot.lane.b32.xlu1 %v11150_v2, %s10840_s13 }
 0x31a   : > { %11149 = vst [vmem:[#allocation149_spill] sm:$0xff] %v8737_v48 }
 0x31b   : > { %v8741_v53 = vpop.permute.xlu1 %3375  ;;  %2895 = vrot.lane.b32.xlu0 %v11152_v34, %s10862_s21 }
 0x31c   : > { %11151 = vst [vmem:[#allocation137_spill] sm:$0xff] %v8741_v53  ;;  %v11159_v53 = vld [vmem:[#allocation35_spill] sm:$0xff] }
 0x31d   : > { %v8745_v36 = vpop.permute.xlu0 %3453  ;;  %3572 = vrot.lane.b32.xlu1 %v11134_v23, %s10840_s13  ;;  %v2859_v23 = vrot.slane %v11152_v34, 2 }
 0x31e   : > { %11153 = vst [vmem:[#allocation153_spill] sm:$0xff] %v8745_v36  ;;  %v11161_v36 = vld [vmem:[#allocation25_spill] sm:$0xff] }
 0x31f   : > { %v8749_v8 = vpop.permute.xlu1 %3355  ;;  %2911 = vrot.lane.b32.xlu0 %v11155_v62, %s10867_s14 }
 0x320   : > { %11154 = vst [vmem:[#allocation160_spill] sm:$0xff] %v8749_v8  ;;  %v11162_v8 = vld [vmem:[#allocation28_spill] sm:$0xff] }
 0x321   : > { %v8753_v6 = vpop.permute.xlu0 %3377  ;;  %2893 = vrot.lane.b32.xlu1 %v11157_v11, %s10862_s21  ;;  %v2860_v51 = vrot.slane %v11162_v8, 2  ;;  %v11170_v8 = vld [vmem:[#allocation26_spill] sm:$0xff] }
 0x322   : > { %11156 = vst [vmem:[#allocation143_spill] sm:$0xff] %v8753_v6  ;;  %v11164_v6 = vld [vmem:[#allocation45_spill] sm:$0xff] }
 0x323   : > { %v8757_v2 = vpop.permute.xlu1 %3404  ;;  %2927 = vrot.lane.b32.xlu0 %v11159_v53, %s10816_s26  ;;  %v8776_v24 = vsel %vm11167_vm5, %v2859_v23, %v2860_v51  ;;  %v11174_v51 = vld [vmem:[#allocation20_spill] sm:$0xff] }
 0x324   : > { %11158 = vst [vmem:[#allocation159_spill] sm:$0xff] %v8757_v2  ;;  %v11166_v2 = vld [vmem:[#allocation15_spill] sm:$0xff] }
 0x325   : > { %v8761_v48 = vpop.permute.xlu0 %3457  ;;  %2909 = vrot.lane.b32.xlu1 %v11161_v36, %s10867_s14 }
 0x326   : > { %11160 = vst [vmem:[#allocation151_spill] sm:$0xff] %v8761_v48 }
 0x327   : > { %v8767_v40 = vpop.permute.xlu1 %2907  ;;  %2950 = vrot.lane.b32.xlu0 %v11164_v6, %s10840_s13 }
 0x328   : > { %11163 = vst [vmem:[#allocation155_spill] sm:$0xff] %v8767_v40 }
 0x329   : > { %v8771_v11 = vpop.permute.xlu0 %3406  ;;  %2925 = vrot.lane.b32.xlu1 %v11166_v2, %s10816_s26 }
 0x32a   : > { %11165 = vst [vmem:[#allocation164_spill] sm:$0xff] %v8771_v11  ;;  %v11172_v11 = vld [vmem:[#allocation47_spill] sm:$0xff] }
 0x32b   : > { %v8778_v48 = vpop.permute.xlu1 %3402  ;;  %2969 = vrot.lane.b32.xlu0 %v8776_v24, %s10923_s20 }
 0x32c   : > { %11168 = vst [vmem:[#allocation156_spill] sm:$0xff] %v8778_v48  ;;  %v11184_v48 = vld [vmem:[#allocation63_spill] sm:$0xff] }
 0x32d   : > { %v8782_v36 = vpop.permute.xlu0 %3481  ;;  %2948 = vrot.lane.b32.xlu1 %v11170_v8, %s10840_s13  ;;  %v5711_v8 = vld [vmem:[%s10350_s5 + $0x30] ss:$0 sps:$4 sm:$0x33]  }
 0x32e   : > { %11169 = vst [vmem:[#allocation162_spill] sm:$0xff] %v8782_v36  ;;  %5614 = vmatprep.subr.msk.bf16.mxu1 %vm11178_vm7, %v5711_v8  ;;  %vm11188_vm7 = vcmask 31744  }
 0x32f   : > { %v8786_v40 = vpop.permute.xlu1 %2923  ;;  %2985 = vrot.lane.b32.xlu0 %v11172_v11, %s10616_s25 }
 0x330   : > { %11171 = vst [vmem:[#allocation163_spill] sm:$0xff] %v8786_v40 }
 0x331   : > { %v8790_v2 = vpop.permute.xlu0 %3459  ;;  %2967 = vrot.lane.b32.xlu1 %v11174_v51, %s10923_s20  ;;  %v3978_v51 = vsel %vm11179_vm1, %v5711_v8, 0  ;;  %v11182_v8 = vld [vmem:[#allocation46_spill] sm:$0xff]  ;;  %vm11191_vm1 = vmmov %vm11188_vm7 }
 0x332   : > { %11173 = vst [vmem:[#allocation107_spill] sm:$0xff] %v8790_v2  ;;  %5565 = vmatpush3.bf16.msra.mxu1 %v3978_v51 }
 0x333   : > { %v8794_v23 = vpop.permute.xlu1 %3455  ;;  %2881 = vrot.lane.b32.xlu0 %v8776_v24, %s10965_s0 }
 0x334   : > { %11175 = vst [vmem:[#allocation27_spill] sm:$0xff] %v8794_v23  ;;  %v5713_v23 = vld [vmem:[%s10350_s5 + $0x20] sm:$0xff]  }
 0x335   : > { %v8798_v36 = vpop.permute.xlu0 %3512  ;;  %2983 = vrot.lane.b32.xlu1 %v11152_v34, %s10616_s25  ;;  %s5883_s25 = smov 40  }
 0x336   : > { %11176 = vst [vmem:[#allocation11_spill] sm:$0xff] %v8798_v36  ;;  %v5712_v36 = vld [vmem:[%s10350_s5 + $0x28] sm:$0xff]  }
 0x337   : > { %v8805_v40 = vpop.permute.xlu1 %2939  ;;  %3015 = vrot.lane.b32.xlu0 %v11159_v53, %s5882_s2  ;;  %5566 = vmatprep.subr.bf16.mxu1 %v5712_v36  ;;  %v2862_v53 = vrot.slane %v11172_v11, 2 }
 0x338   : > { %11177 = vst [vmem:[#allocation35_spill] sm:$0xff] %v8805_v40  ;;  %v2863_v40 = vrot.slane %v11182_v8, 2  ;;  %5567 = vmatpush3.bf16.msra.mxu1 %v5712_v36  ;;  %v5714_v8 = vld [vmem:[%s10350_s5 + $0x18] sm:$0xff]  }
 0x339   : > { %v8814_v2 = vpop.permute.xlu0 %3483  ;;  %2999 = vrot.lane.b32.xlu1 %v11155_v62, %s5883_s25  ;;  %5568 = vmatprep.subr.bf16.mxu1 %v5713_v23  ;;  %v11187_v36 = vld [vmem:[#allocation128_spill] sm:$0xff] }
 0x33a   : > { %11180 = vst [vmem:[#allocation28_spill] sm:$0xff] %v8814_v2  ;;  %v8836_v62 = vsel %vm11167_vm5, %v2862_v53, %v2863_v40  ;;  %v11192_v40 = vld [vmem:[#allocation138_spill] sm:$0xff]  ;;  %vm11203_vm5 = vmmov %vm11191_vm1 }
 0x33b   : > { %v8818_v34 = vpop.permute.xlu1 %3479  ;;  %2897 = vrot.lane.b32.xlu0 %v11172_v11, %s10862_s21  ;;  %s5887_s21 = smov 64  }
 0x33c   : > { %11181 = vst [vmem:[#allocation45_spill] sm:$0xff] %v8818_v34  ;;  %5569 = vmatpush3.bf16.msra.mxu1 %v5713_v23  ;;  %v11196_v23 = vld [vmem:[#allocation154_spill] sm:$0xff] }
 0x33d   : > { %v8827_v2 = vpop.permute.xlu0 %3537  ;;  %3001 = vrot.lane.b32.xlu1 %v11184_v48, %s5883_s25  ;;  %5570 = vmatprep.subr.bf16.mxu1 %v5714_v8 }
 0x33e   : > { %11183 = vst [vmem:[#allocation15_spill] sm:$0xff] %v8827_v2  ;;  %v3100_v2 = vsel %vm11188_vm7, %v11187_v36, %v11184_v48  ;;  %v11197_v36 = vld [vmem:[#allocation165_spill] sm:$0xff]  ;;  %vm11206_vm7 = vmmov %vm11191_vm1 }
 0x33f   : > { %v8831_v51 = vpop.permute.xlu1 %2962  ;;  %3038 = vrot.lane.b32.xlu0 %v11164_v6, %s5884_s4  ;;  %v3120_v46 = vsel %vm2256_vm13, %v3100_v2, %v11193_v20 }
 0x340   : > { %11185 = vst [vmem:[#allocation26_spill] sm:$0xff] %v8831_v51  ;;  %v11189_v51 = vld [vmem:[#allocation53_spill] sm:$0xff]  ;;  %v8863_v18 = vsel %vm2289_vm4, %v3120_v46, %v11197_v36  ;;  %5571 = vmatpush3.bf16.msra.mxu1 %v5714_v8  ;;  %v11202_v46 = vld [vmem:[#allocation167_spill] sm:$0xff] }
 0x341   : > { %v8841_v34 = vpop.permute.xlu0 %3514  ;;  %2883 = vrot.lane.b32.xlu1 %v8836_v62, %s10965_s0  ;;  %v3580_v6 = vsel %vm11191_vm1, %v11190_v55, %v11189_v51  ;;  %11198 = vst [vmem:[#allocation46_spill] sm:$0xff] %v8863_v18  ;;  %v5715_v55 = vld [vmem:[%s10350_s5 + $0x10] sm:$0xff]   ;;  %v11199_v51 = vld [vmem:[#allocation104_spill] sm:$0xff]  ;;  %vm11217_vm1 = vcmask 1045504  }
 0x342   : > { %11186 = vst [vmem:[#allocation47_spill] sm:$0xff] %v8841_v34  ;;  %v3612_v53 = vsel %vm2256_vm13, %v3580_v6, %v11192_v40  ;;  %v3656_v20 = vsel %vm2322_vm6, %v8863_v18, %v11199_v51  ;;  %v11201_v40 = vld [vmem:[#allocation59_spill] sm:$0xff]  ;;  %5572 = vmatprep.subr.bf16.mxu1 %v5715_v55  ;;  %v11207_v18 = vld [vmem:[#allocation173_spill] sm:$0xff] }
 0x343   : > { %v8855_v34 = vpop.permute.xlu1 %3510  ;;  %3040 = vrot.lane.b32.xlu0 %v11195_v47, %s5884_s4  ;;  %v3634_v54 = vsel %vm2289_vm4, %v3612_v53, %v11196_v23  ;;  %v3583_v53 = vsel %vm11203_vm5, %v11202_v46, %v11071_v60  ;;  %v11204_v23 = vld [vmem:[#allocation84_spill] sm:$0xff]  ;;  %v11205_v36 = vld [vmem:[#allocation55_spill] sm:$0xff]  ;;  %v11209_v60 = vld [vmem:[#allocation169_spill] sm:$0xff]  ;;  %vm11218_vm5 = vsmask.f32 7424 }
 0x344   : > { %11194 = vst [vmem:[#allocation20_spill] sm:$0xff] %v8855_v34  ;;  %v3658_v2 = vsel %vm2322_vm6, %v3634_v54, %v8568_v16  ;;  %v3103_v34 = vsel %vm11206_vm7, %v11205_v36, %v11204_v23  ;;  %v11208_v54 = vld [vmem:[#allocation67_spill] sm:$0xff]  ;;  %v3687_v46 = vsel %vm2355_vm9, %v3656_v20, %v11209_v60  ;;  %v11210_v36 = vld [vmem:[#allocation105_spill] sm:$0xff]  ;;  %5573 = vmatpush3.bf16.msra.mxu1 %v5715_v55  ;;  %vm11220_vm7 = vmmov %vm11218_vm5 }
 0x345   : > { %v8873_v6 = vpop.permute.xlu0 %3566  ;;  %3017 = vrot.lane.b32.xlu1 %v11201_v40, %s5882_s2  ;;  %v3689_v51 = vsel %vm2355_vm9, %v3658_v2, %v8586_v56  ;;  %v3122_v16 = vsel %vm2256_vm13, %v3103_v34, %v11207_v18  ;;  %v5716_v18 = vld [vmem:[%s10350_s5 + $0x8] sm:$0xff]   ;;  %v11214_v20 = vld [vmem:[#allocation71_spill] sm:$0xff] }
 0x346   : > { %11200 = vst [vmem:[#allocation63_spill] sm:$0xff] %v8873_v6  ;;  %v3614_v6 = vsel %vm2256_vm13, %v3583_v53, %v11208_v54  ;;  %v3716_v8 = vsel %vm10647_vm15, %v3689_v51, %v8602_v50  ;;  %v8899_v56 = vsel %vm2289_vm4, %v3122_v16, %v11210_v36  ;;  %v11212_v34 = vld [vmem:[#allocation106_spill] sm:$0xff]  ;;  %v11213_v50 = vld [vmem:[#allocation179_spill] sm:$0xff]  ;;  %5574 = vmatprep.subr.bf16.mxu1 %v5716_v18 }
 0x347   : > { %v8891_v29 = vpop.permute.xlu1 %3357  ;;  %2929 = vrot.lane.b32.xlu0 %v11201_v40, %s10816_s26  ;;  %11211 = vst [vmem:[#allocation128_spill] sm:$0xff] %v8899_v56  ;;  %v3714_v2 = vsel %vm10647_vm15, %v3687_v46, %v11212_v34  ;;  %v3660_v53 = vsel %vm2322_vm6, %v8899_v56, %v11213_v50  ;;  %v3636_v40 = vsel %vm2289_vm4, %v3614_v6, %v11214_v20  ;;  %v11304_v34 = vld [vmem:[#allocation142_spill] sm:$0xff]  ;;  %s5396_s26 = sshll.u32 %s5855_s9, 5 }
 0x348   : > { %v3741_v16 = vsel %vm2421_vm10, %v3714_v2, %v8577_v28  ;;  %v3743_v54 = vsel %vm2421_vm10, %v3716_v8, %v8600_v45  ;;  %v3662_v46 = vsel %vm2322_vm6, %v3636_v40, %v8566_v43  ;;  %v5717_v45 = vld [vmem:[%s10350_s5] sm:$0xff]   ;;  %5575 = vmatpush3.bf16.msra.mxu1 %v5716_v18 }
 0x349   : > { %v8909_v51 = vpop.permute.xlu0 %3379  ;;  %2913 = vrot.lane.b32.xlu1 %v11184_v48, %s10867_s14  ;;  %v3768_v36 = vsel %vm10641_vm11, %v3741_v16, %v8594_v10  ;;  %s5885_s14 = smov 56   ;;  %v11215_v48 = vld [vmem:[#allocation175_spill] sm:$0xff]  ;;  %v3692_v6 = vsel %vm2355_vm9, %v3662_v46, %v8584_v58  ;;  %v3770_v8 = vsel %vm10641_vm11, %v3743_v54, %v8608_v31  ;;  %5576 = vmatprep.subr.bf16.mxu1 %v5717_v45 }
 0x34a   : > { %v3690_v55 = vsel %vm2355_vm9, %v3660_v53, %v11215_v48  ;;  %v3719_v2 = vsel %vm10647_vm15, %v3692_v6, %v8610_v0  ;;  %v3797_v53 = vshll.u32 %v3768_v36, 16  ;;  %v11216_v0 = vld [vmem:[#allocation70_spill] sm:$0xff]  ;;  %v3801_v16 = vshll.u32 %v3770_v8, 16  ;;  %v11272_v48 = vld [vmem:[#allocation159_spill] sm:$0xff] }
 0x34b   : > { %v8923_v50 = vpop.permute.xlu1 %3535  ;;  %3073 = vrot.lane.b32.xlu0 %v11172_v11, %s5885_s14  ;;  %v3717_v43 = vsel %vm10647_vm15, %v3690_v55, %v8525_v63  ;;  %v3746_v20 = vsel %vm2421_vm10, %v3719_v2, %v8618_v32  ;;  %v2865_v46 = vrot.slane %v11216_v0, 2  ;;  %v2866_v55 = vrot.slane %v11057_v39, 2  ;;  %v11269_v63 = vld [vmem:[#allocation153_spill] sm:$0xff] }
 0x34c   : > { %v3744_v58 = vsel %vm2421_vm10, %v3717_v43, %v8574_v7  ;;  %5577 = vmatpush3.bf16.msra.mxu1 %v5717_v45  ;;  %v3799_v54 = vrot.slane %v3797_v53, 1  ;;  %v3795_v43 = vshrl.u32 %v3768_v36, 16  ;;  %v3803_v8 = vrot.slane %v3801_v16, 1  ;;  %v11232_v7 = vld [vmem:[#allocation100_spill] sm:$0xff] }
 0x34d   : > { %v8940_v11 = vpop.permute.xlu0 %3564  ;;  %3057 = vrot.lane.b32.xlu1 %v8776_v24, %s5886_s3  ;;  %v3771_v31 = vsel %vm10641_vm11, %v3744_v58, %v8592_v22  ;;  %v3773_v24 = vsel %vm10641_vm11, %v3746_v20, %v8616_v1  ;;  %v8971_v53 = vsel %vm11217_vm1, %v2865_v46, %v2866_v55  ;;  %vm11223_vm1 = vcmask 31744  }
 0x34e   : > { %v3807_v32 = vshll.u32 %v3771_v31, 16  ;;  %v3811_v1 = vshll.u32 %v3773_v24, 16  ;;  %v3800_v58 = vor.u32 %v3799_v54, %v3795_v43  ;;  %v3805_v39 = vshrl.u32 %v3771_v31, 16 }
 0x34f   : > { %v8950_v40 = vpop.permute.xlu1 %3361  ;;  %3075 = vrot.lane.b32.xlu0 %v11216_v0, %s5885_s14  ;;  %v2868_v22 = vrot.slane %v11075_v14, 2 }
 0x350   : > { %v3809_v45 = vrot.slane %v3807_v32, 1  ;;  %v3804_v36 = vsel %vm11218_vm5, %v3800_v58, %v3803_v8  ;;  %v11221_v8 = vld [vmem:[#allocation119_spill] sm:$0xff]  ;;  %v11224_v58 = vld [vmem:[#allocation109_spill] sm:$0xff]  ;;  %vm11225_vm5 = vmmov %vm11223_vm1 }
 0x351   : > { %v8956_v18 = vpop.permute.xlu0 %3383  ;;  %3059 = vrot.lane.b32.xlu1 %v8836_v62, %s5886_s3 }
 0x353   : > { %v8962_v6 = vpop.permute.xlu1 %3539  ;;  %2971 = vrot.lane.b32.xlu0 %v8836_v62, %s10923_s20  ;;  %v3813_v62 = vrot.slane %v3811_v1, 1  ;;  %v11222_v1 = vld [vmem:[#allocation124_spill] sm:$0xff] }
 0x355   : > { %v8966_v2 = vpop.permute.xlu0 %3568  ;;  %2952 = vrot.lane.b32.xlu1 %v11195_v47, %s10840_s13  ;;  %v3810_v47 = vor.u32 %v3809_v45, %v3805_v39  ;;  %s11219_s13 = smov 36   ;;  %v3106_v45 = vsel %vm11223_vm1, %v11222_v1, %v11221_v8  ;;  %v3586_v39 = vsel %vm11225_vm5, %v8626_v61, %v11224_v58  ;;  %v2869_v61 = vrot.slane %v11232_v7, 2  ;;  %v11233_v58 = vld [vmem:[#allocation184_spill] sm:$0xff] }
 0x356   : > { %v3589_v7 = vsel %vm11223_vm1, %v8634_v25, %v11097_v3  ;;  %vm11237_vm5 = vcmask 1045504  }
 0x357   : > { %v8973_v20 = vpop.permute.xlu1 %3359  ;;  %2973 = vrot.lane.b32.xlu0 %v8971_v53, %s10923_s20  ;;  %v3814_v32 = vsel %vm11220_vm7, %v3810_v47, %v3813_v62  ;;  %v11226_v62 = vld [vmem:[#allocation177_spill] sm:$0xff]  ;;  %vm11231_vm7 = vmmov %vm11223_vm1  ;;  %vm11245_vm1 = vsmask.f32 7424 }
 0x358   : > { %v11228_v47 = vld [vmem:[#allocation181_spill] sm:$0xff] }
 0x359   : > { %v8978_v16 = vpop.permute.xlu0 %3381  ;;  %3875 = vrot.lane.b32.xlu1 %v3804_v36, %s5887_s21 }
 0x35b   : > { %v8981_v24 = vpop.permute.xlu1 %3408  ;;  %2989 = vrot.lane.b32.xlu0 %v11075_v14, %s11219_s13 }
 0x35d   : > { %v8986_v54 = vpop.permute.xlu0 %3461  ;;  %3877 = vrot.lane.b32.xlu1 %v3814_v32, %s5887_s21 }
 0x35f   : > { %v8989_v31 = vpop.permute.xlu1 %3363  ;;  %2885 = vrot.lane.b32.xlu0 %v8971_v53, %s10965_s0 }
 0x361   : > { %v8993_v46 = vpop.permute.xlu0 %3410  ;;  %2987 = vrot.lane.b32.xlu1 %v11216_v0, %s11219_s13  ;;  %v3124_v0 = vsel %vm2256_vm13, %v3106_v45, %v11226_v62  ;;  %v3616_v62 = vsel %vm2256_vm13, %v3586_v39, %v8624_v41  ;;  %v3618_v39 = vsel %vm2256_vm13, %v3589_v7, %v8650_v4 }
 0x362   : > { %v9019_v32 = vsel %vm2289_vm4, %v3124_v0, %v11228_v47  ;;  %v11234_v47 = vld [vmem:[#allocation77_spill] sm:$0xff]  ;;  %v3638_v41 = vsel %vm2289_vm4, %v3616_v62, %v8640_v30  ;;  %v2870_v30 = vsel %vm11237_vm5, %v2868_v22, %v2869_v61 }
 0x363   : > { %v8997_v55 = vpop.permute.xlu1 %3412  ;;  %3019 = vrot.lane.b32.xlu0 %v11065_v27, %s5882_s2  ;;  %v11227_v27 = vld [vmem:[#allocation117_spill] sm:$0xff]  ;;  %11229 = vst [vmem:[#allocation53_spill] sm:$0xff] %v9019_v32 }
 0x365   : > { %v9001_v43 = vpop.permute.xlu0 %3485  ;;  %3003 = vrot.lane.b32.xlu1 %v11204_v23, %s5883_s25  ;;  %v11230_v23 = vld [vmem:[#allocation182_spill] sm:$0xff] }
 0x366   : > { %v3109_v1 = vsel %vm11231_vm7, %v11230_v23, %v11089_v57  ;;  %vm11244_vm7 = vmmov %vm11237_vm5 }
 0x367   : > { %v9013_v36 = vpop.permute.xlu1 %3385  ;;  %3021 = vrot.lane.b32.xlu0 %v11227_v27, %s5882_s2  ;;  %v3126_v45 = vsel %vm2256_vm13, %v3109_v1, %v11233_v58  ;;  %v3664_v27 = vsel %vm2322_vm6, %v9019_v32, %v8642_v5  ;;  %v11236_v58 = vld [vmem:[#allocation147_spill] sm:$0xff]  ;;  %vm11247_vm5 = vmmov %vm11245_vm1 }
 0x368   : > { %v9039_v23 = vsel %vm2289_vm4, %v3126_v45, %v11234_v47  ;;  %v3693_v3 = vsel %vm2355_vm9, %v3664_v27, %v8632_v44  ;;  %v3640_v45 = vsel %vm2289_vm4, %v3618_v39, %v8656_v15  ;;  %v11238_v39 = vld [vmem:[#allocation102_spill] sm:$0xff] }
 0x369   : > { %v9033_v0 = vpop.permute.xlu0 %3463  ;;  %3005 = vrot.lane.b32.xlu1 %v11221_v8, %s5883_s25  ;;  %11235 = vst [vmem:[#allocation132_spill] sm:$0xff] %v9039_v23  ;;  %v3668_v5 = vsel %vm2322_vm6, %v9039_v23, %v8658_v52  ;;  %v3666_v8 = vsel %vm2322_vm6, %v3638_v41, %v8676_v59  ;;  %v3720_v4 = vsel %vm10647_vm15, %v3693_v3, %v8667_v35  ;;  %v11240_v3 = vld [vmem:[#allocation48_spill] sm:$0xff]  ;;  %v11271_v44 = vld [vmem:[#allocation122_spill] sm:$0xff] }
 0x36a   : > { %v3695_v25 = vsel %vm2355_vm9, %v3666_v8, %v8692_v19  ;;  %v3696_v62 = vsel %vm2355_vm9, %v3668_v5, %v8648_v33  ;;  %v3747_v19 = vsel %vm2421_vm10, %v3720_v4, %v8684_v37  ;;  %v3670_v22 = vsel %vm2322_vm6, %v3640_v45, %v8673_v13  ;;  %v11239_v8 = vld [vmem:[#allocation139_spill] sm:$0xff]  ;;  %v11242_v4 = vld [vmem:[#allocation144_spill] sm:$0xff] }
 0x36b   : > { %v9053_v1 = vpop.permute.xlu1 %3465  ;;  %3044 = vrot.lane.b32.xlu0 %v11236_v58, %s5884_s4  ;;  %v3722_v52 = vsel %vm10647_vm15, %v3695_v25, %v8707_v21  ;;  %v3774_v61 = vsel %vm10641_vm11, %v3747_v19, %v8699_v17  ;;  %v3698_v27 = vsel %vm2355_vm9, %v3670_v22, %v8688_v12  ;;  %v3723_v47 = vsel %vm10647_vm15, %v3696_v62, %v8665_v38  ;;  %v11258_v38 = vld [vmem:[#allocation149_spill] sm:$0xff]  ;;  %v11265_v37 = vld [vmem:[#allocation160_spill] sm:$0xff] }
 0x36c   : > { %v3749_v15 = vsel %vm2421_vm10, %v3722_v52, %v8703_v42  ;;  %v3725_v7 = vsel %vm10647_vm15, %v3698_v27, %v8715_v9  ;;  %v3750_v12 = vsel %vm2421_vm10, %v3723_v47, %v8680_v26  ;;  %v3817_v5 = vshll.u32 %v3774_v61, 16  ;;  %v11241_v9 = vld [vmem:[#allocation140_spill] sm:$0xff]  ;;  %v11257_v26 = vld [vmem:[#allocation74_spill] sm:$0xff] }
 0x36d   : > { %v9066_v59 = vpop.permute.xlu0 %3516  ;;  %2887 = vrot.lane.b32.xlu1 %v2870_v30, %s10965_s0  ;;  %v3776_v13 = vsel %vm10641_vm11, %v3749_v15, %v8733_v49  ;;  %v3777_v42 = vsel %vm10641_vm11, %v3750_v12, %v11239_v8  ;;  %v3752_v49 = vsel %vm2421_vm10, %v3725_v7, %v11241_v9  ;;  %v2871_v22 = vrot.slane %v11240_v3, 2  ;;  %v11243_v27 = vld [vmem:[#allocation148_spill] sm:$0xff] }
 0x36e   : > { %v3821_v25 = vshll.u32 %v3776_v13, 16  ;;  %v3779_v52 = vsel %vm10641_vm11, %v3752_v49, %v11242_v4  ;;  %v3827_v62 = vshll.u32 %v3777_v42, 16  ;;  %v3819_v19 = vrot.slane %v3817_v5, 1 }
 0x36f   : > { %v9079_v21 = vpop.permute.xlu1 %3414  ;;  %3063 = vrot.lane.b32.xlu0 %v2870_v30, %s5886_s3  ;;  %v2872_v15 = vrot.slane %v11243_v27, 2  ;;  %v3815_v7 = vshrl.u32 %v3774_v61, 16  ;;  %v3831_v13 = vshll.u32 %v3779_v52, 16  ;;  %v3825_v4 = vshrl.u32 %v3777_v42, 16 }
 0x370   : > { %v3829_v9 = vrot.slane %v3827_v62, 1 }
 0x371   : > { %v9092_v41 = vpop.permute.xlu0 %3487  ;;  %3042 = vrot.lane.b32.xlu1 %v11238_v39, %s5884_s4  ;;  %v3823_v39 = vrot.slane %v3821_v25, 1  ;;  %v9122_v5 = vsel %vm11244_vm7, %v2871_v22, %v2872_v15  ;;  %v11248_v15 = vld [vmem:[#allocation157_spill] sm:$0xff]  ;;  %vm11252_vm7 = vcmask 31744  }
 0x372   : > { %v3830_v52 = vor.u32 %v3829_v9, %v3825_v4  ;;  %v11251_v4 = vld [vmem:[#allocation76_spill] sm:$0xff] }
 0x373   : > { %v9100_v58 = vpop.permute.xlu1 %3489  ;;  %3079 = vrot.lane.b32.xlu0 %v11240_v3, %s5885_s14 }
 0x375   : > { %v9108_v45 = vpop.permute.xlu0 %3541  ;;  %3061 = vrot.lane.b32.xlu1 %v8971_v53, %s5886_s3  ;;  %v3820_v53 = vor.u32 %v3819_v19, %v3815_v7 }
 0x377   : > { %v9114_v47 = vpop.permute.xlu1 %3467  ;;  %2975 = vrot.lane.b32.xlu0 %v2870_v30, %s10923_s20  ;;  %v3833_v30 = vrot.slane %v3831_v13, 1  ;;  %v3824_v61 = vsel %vm11245_vm1, %v3820_v53, %v3823_v39  ;;  %v11249_v39 = vld [vmem:[#allocation172_spill] sm:$0xff]  ;;  %v11250_v53 = vld [vmem:[#allocation118_spill] sm:$0xff]  ;;  %vm11255_vm1 = vmmov %vm11252_vm7 }
 0x379   : > { %v9117_v12 = vpop.permute.xlu0 %3518  ;;  %3077 = vrot.lane.b32.xlu1 %v11075_v14, %s5885_s14  ;;  %v11246_v14 = vld [vmem:[#allocation57_spill] sm:$0xff]  ;;  %v3834_v19 = vsel %vm11247_vm5, %v3830_v52, %v3833_v30  ;;  %v3112_v30 = vsel %vm11252_vm7, %v11251_v4, %v11250_v53  ;;  %vm11263_vm5 = vmmov %vm11255_vm1 }
 0x37a   : > { %v11259_v4 = vld [vmem:[#allocation73_spill] sm:$0xff]  ;;  %vm11266_vm7 = vmmov %vm11255_vm1 }
 0x37b   : > { %2977 = vrot.lane.b32.xlu0 %v9122_v5, %s10923_s20  ;;  %v9126_v49 = vpop.permute.xlu1 %3520 }
 0x37d   : > { %v9129_v25 = vpop.permute.xlu0 %3570  ;;  %3879 = vrot.lane.b32.xlu1 %v3824_v61, %s5887_s21  ;;  %v11254_v61 = vld [vmem:[#allocation127_spill] sm:$0xff] }
 0x37f   : > { %2993 = vrot.lane.b32.xlu0 %v11246_v14, %s11219_s13  ;;  %v9134_v62 = vpop.permute.xlu1 %3491 }
 0x381   : > { %v9137_v22 = vpop.permute.xlu0 %3543  ;;  %3881 = vrot.lane.b32.xlu1 %v3834_v19, %s5887_s21  ;;  %v2874_v19 = vrot.slane %v11246_v14, 2 }
 0x383   : > { %2889 = vrot.lane.b32.xlu0 %v9122_v5, %s10965_s0  ;;  %v9142_v42 = vpop.permute.xlu1 %3545 }
 0x385   : > { %v9144_v27 = vpop.permute.xlu0 %3547  ;;  %2991 = vrot.lane.b32.xlu1 %v11240_v3, %s11219_s13  ;;  %v11253_v3 = vld [vmem:[#allocation171_spill] sm:$0xff] }
 0x386   : > { %v3592_v52 = vsel %vm11255_vm1, %v11254_v61, %v11253_v3  ;;  %v11261_v3 = vld [vmem:[#allocation176_spill] sm:$0xff]  ;;  %v11262_v61 = vld [vmem:[#allocation178_spill] sm:$0xff]  ;;  %vm11275_vm1 = vcmask 1045504  }
 0x387   : > { %3023 = vrot.lane.b32.xlu0 %v11248_v15, %s5882_s2  ;;  %v9150_v7 = vpop.permute.xlu1 %3522  ;;  %v11256_v15 = vld [vmem:[#allocation168_spill] sm:$0xff]  ;;  %v3595_v17 = vsel %vm11263_vm5, %v11262_v61, %v11261_v3  ;;  %vm4093_vm5 = vmpackc.low %vm6291_vm0, %vm6291_vm0  ;;  %vm11296_vm0 = vsmask.f32 7424 }
 0x388   : > { %v2875_v8 = vrot.slane %v11256_v15, 2  ;;  %v11264_v15 = vld [vmem:[#allocation123_spill] sm:$0xff] }
 0x389   : > { %v9152_v13 = vpop.permute.xlu0 %3576  ;;  %3007 = vrot.lane.b32.xlu1 %v11089_v57, %s5883_s25  ;;  %v3128_v57 = vsel %vm2256_vm13, %v3112_v30, %v11257_v26  ;;  %v3598_v26 = vsel %vm11266_vm7, %v11265_v37, %v11264_v15  ;;  %v11267_v30 = vld [vmem:[#allocation156_spill] sm:$0xff]  ;;  %v11273_v15 = vld [vmem:[#allocation155_spill] sm:$0xff]  ;;  %vm11295_vm7 = vcmask 1041408  }
 0x38a   : > { %v9178_v23 = vsel %vm2289_vm4, %v3128_v57, %v11259_v4  ;;  %v11270_v57 = vld [vmem:[#allocation27_spill] sm:$0xff] }
 0x38b   : > { %3025 = vrot.lane.b32.xlu0 %v11249_v39, %s5882_s2  ;;  %v9158_v9 = vpop.permute.xlu1 %3574  ;;  %v3620_v39 = vsel %vm2256_vm13, %v3592_v52, %v11258_v38  ;;  %11260 = vst [vmem:[#allocation138_spill] sm:$0xff] %v9178_v23  ;;  %v11268_v52 = vld [vmem:[#allocation137_spill] sm:$0xff] }
 0x38c   : > { %v3642_v38 = vsel %vm2289_vm4, %v3620_v39, %v11267_v30  ;;  %v3622_v35 = vsel %vm2256_vm13, %v3595_v17, %v11268_v52  ;;  %v11274_v30 = vld [vmem:[#allocation45_spill] sm:$0xff]  ;;  %v2876_v52 = vsel %vm11275_vm1, %v2874_v19, %v2875_v8  ;;  %v11281_v19 = vld [vmem:[#allocation151_spill] sm:$0xff] }
 0x38d   : > { %v9172_v33 = vpop.permute.xlu0 %2895  ;;  %3009 = vrot.lane.b32.xlu1 %v11250_v53, %s5883_s25  ;;  %v3672_v53 = vsel %vm2322_vm6, %v9178_v23, %v11269_v63  ;;  %v3674_v4 = vsel %vm2322_vm6, %v3642_v38, %v11270_v57  ;;  %v3644_v37 = vsel %vm2289_vm4, %v3622_v35, %v11272_v48  ;;  %v11276_v63 = vld [vmem:[#allocation143_spill] sm:$0xff]  ;;  %v11279_v35 = vld [vmem:[#allocation164_spill] sm:$0xff] }
 0x38e   : > { %v3699_v39 = vsel %vm2355_vm9, %v3672_v53, %v11273_v15  ;;  %v3701_v17 = vsel %vm2355_vm9, %v3674_v4, %v11274_v30  ;;  %v3624_v23 = vsel %vm2256_vm13, %v3598_v26, %v11276_v63  ;;  %v11277_v38 = vld [vmem:[#allocation163_spill] sm:$0xff]  ;;  %v3676_v26 = vsel %vm2322_vm6, %v3644_v37, %v11281_v19 }
 0x38f   : > { %3048 = vrot.lane.b32.xlu0 %v11271_v44, %s5884_s4  ;;  %v9197_v61 = vpop.permute.xlu1 %3572  ;;  %v3726_v57 = vsel %vm10647_vm15, %v3699_v39, %v11277_v38  ;;  %v11278_v44 = vld [vmem:[#allocation20_spill] sm:$0xff]  ;;  %v3646_v48 = vsel %vm2289_vm4, %v3624_v23, %v11279_v35  ;;  %v11280_v53 = vld [vmem:[#allocation35_spill] sm:$0xff]  ;;  %v11284_v23 = vld [vmem:[#allocation162_spill] sm:$0xff] }
 0x390   : > { %v3728_v32 = vsel %vm10647_vm15, %v3701_v17, %v11278_v44  ;;  %v3753_v4 = vsel %vm2421_vm10, %v3726_v57, %v11280_v53  ;;  %v11282_v39 = vld [vmem:[#allocation107_spill] sm:$0xff]  ;;  %v11283_v17 = vld [vmem:[#allocation26_spill] sm:$0xff]  ;;  %v3703_v35 = vsel %vm2355_vm9, %v3676_v26, %v11284_v23  ;;  %v11285_v57 = vld [vmem:[#allocation28_spill] sm:$0xff] }
 0x391   : > { %v9212_v56 = vpop.permute.xlu0 %2911  ;;  %2891 = vrot.lane.b32.xlu1 %v2876_v52, %s10965_s0  ;;  %v3755_v8 = vsel %vm2421_vm10, %v3728_v32, %v8923_v50  ;;  %v3678_v30 = vsel %vm2322_vm6, %v3646_v48, %v11282_v39  ;;  %v3780_v63 = vsel %vm10641_vm11, %v3753_v4, %v11283_v17  ;;  %v11286_v50 = vld [vmem:[#allocation11_spill] sm:$0xff]  ;;  %v11288_v39 = vld [vmem:[#allocation170_spill] sm:$0xff] }
 0x392   : > { %v3705_v53 = vsel %vm2355_vm9, %v3678_v30, %v11285_v57  ;;  %v3730_v32 = vsel %vm10647_vm15, %v3703_v35, %v11286_v50  ;;  %v11287_v37 = vld [vmem:[#allocation47_spill] sm:$0xff]  ;;  %v3782_v48 = vsel %vm10641_vm11, %v3755_v8, %v8940_v11  ;;  %v3837_v23 = vshll.u32 %v3780_v63, 16 }
 0x393   : > { %3067 = vrot.lane.b32.xlu0 %v2876_v52, %s5886_s3  ;;  %v9228_v44 = vpop.permute.xlu1 %2893  ;;  %v3732_v19 = vsel %vm10647_vm15, %v3705_v53, %v11287_v37  ;;  %v11289_v17 = vld [vmem:[#allocation15_spill] sm:$0xff]  ;;  %v11291_v53 = vld [vmem:[#allocation94_spill] sm:$0xff]  ;;  %v3841_v11 = vshll.u32 %v3782_v48, 16  ;;  %v3835_v48 = vshrl.u32 %v3780_v63, 16 }
 0x394   : > { %v3757_v26 = vsel %vm2421_vm10, %v3730_v32, %v11289_v17  ;;  %v3759_v30 = vsel %vm2421_vm10, %v3732_v19, %v8962_v6  ;;  %v11290_v57 = vld [vmem:[#allocation63_spill] sm:$0xff]  ;;  %v3839_v17 = vrot.slane %v3837_v23, 1  ;;  %v2964_v6 = vrot.slane %v11291_v53, 2  ;;  %v11292_v19 = vld [vmem:[#allocation120_spill] sm:$0xff] }
 0x395   : > { %v9240_v4 = vpop.permute.xlu0 %2927  ;;  %3046 = vrot.lane.b32.xlu1 %v11288_v39, %s5884_s4  ;;  %v3784_v35 = vsel %vm10641_vm11, %v3757_v26, %v11290_v57  ;;  %v3786_v8 = vsel %vm10641_vm11, %v3759_v30, %v8966_v2  ;;  %v2965_v39 = vrot.slane %v11292_v19, 2  ;;  %v3843_v57 = vrot.slane %v3841_v11, 1  ;;  %v9268_v2 = vld [vmem:[%s10351_s6] sm:$0x3] }
 0x396   : > { %v3847_v32 = vshll.u32 %v3784_v35, 16  ;;  %v3851_v38 = vshll.u32 %v3786_v8, 16  ;;  %11293 = vst [vmem:[#allocation161_spill] sm:$0xff] %v9268_v2  ;;  %5615 = vmatprep.subr.msk.bf16.mxu1 %vm11295_vm7, %v9268_v2  ;;  %v5746_v8 = vld [vmem:[%s6021_s22 + $0xc] sm:$0xf]  ;;  %vm11300_vm11 = vcmask 31744  }
 0x397   : > { %3083 = vrot.lane.b32.xlu0 %v11291_v53, %s5885_s14  ;;  %v9252_v50 = vpop.permute.xlu1 %2909  ;;  %v9280_v30 = vsel %vm11275_vm1, %v2964_v6, %v2965_v39  ;;  %v9287_v19 = vsel %vm4093_vm5, %v5746_v8, 4286644096  ;;  %v11299_v6 = vld [vmem:[#allocation68_spill] sm:$0xff]  ;;  %vm4104_vm5 = vmpackc.low %vm6941_vm14, %vm6941_vm14 }
 0x398   : > { %v3849_v63 = vrot.slane %v3847_v32, 1  ;;  %v3853_v15 = vrot.slane %v3851_v38, 1  ;;  %v3607_v39 = vsel %vm11300_vm11, %v8950_v40, %v11299_v6  ;;  %v5748_v38 = vld [vmem:[%s6021_s22 + $0x38] sm:$0x3]  ;;  %vm11305_vm14 = vmmov %vm11300_vm11 }
 0x399   : > { %v9256_v37 = vpop.permute.xlu0 %2950  ;;  %3065 = vrot.lane.b32.xlu1 %v9122_v5, %s5886_s3  ;;  %v3845_v5 = vshrl.u32 %v3784_v35, 16  ;;  %v4157_v35 = vshrl.u32 %v9287_v19, 16  ;;  %v3630_v40 = vsel %vm2256_vm13, %v3607_v39, %v8956_v18  ;;  %v9319_v28 = vsel %vm4104_vm5, %v5748_v38, 4286644096 }
 0x39a   : > { %v3610_v2 = vsel %vm11305_vm14, %v8989_v31, %v11304_v34  ;;  %v4264_v18 = vshrl.u32 %v9319_v28, 16 }
 0x39b   : > { %2979 = vrot.lane.b32.xlu0 %v2876_v52, %s10923_s20  ;;  %v9263_v26 = vpop.permute.xlu1 %2925  ;;  %v3840_v52 = vor.u32 %v3839_v17, %v3835_v48  ;;  %v11297_v17 = vld [vmem:[#allocation6_spill] sm:$0xff]  ;;  %v3850_v32 = vor.u32 %v3849_v63, %v3845_v5  ;;  %v11302_v48 = vld [vmem:[#allocation108_spill] sm:$0xff]  ;;  %v11303_v63 = vld [vmem:[#allocation7_spill] sm:$0xff]  ;;  %v3632_v39 = vsel %vm2256_vm13, %v3610_v2, %v9013_v36 }
 0x39c   : > { %vm11298_vm7 = vnez %v11297_v17  ;;  %v4254_v5 = vshrl.u32 %v11303_v63, 16  ;;  %v5747_v17 = vld [vmem:[%s6021_s22 + $0x10] sm:$0xf]  ;;  %v3654_v31 = vsel %vm2289_vm4, %v3632_v39, %v9079_v21  ;;  %v11309_v39 = vld [vmem:[#allocation10_spill] sm:$0xff] }
 0x39d   : > { %v9273_v23 = vpop.permute.xlu0 %2969  ;;  %3081 = vrot.lane.b32.xlu1 %v11246_v14, %s5885_s14  ;;  %v3844_v14 = vsel %vm11296_vm0, %v3840_v52, %v3843_v57  ;;  %vm4094_vm1 = vmpackc.low %vm11298_vm7, %vm11298_vm7  ;;  %v4160_v52 = vshll.u32 %v9287_v19, 16  ;;  %v3854_v8 = vsel %vm11296_vm0, %v3850_v32, %v3853_v15  ;;  %v3652_v15 = vsel %vm2289_vm4, %v3630_v40, %v8997_v55 }
 0x39e   : > { %v9316_v6 = vsel %vm4094_vm1, %v5747_v17, 4286644096  ;;  %v9326_v32 = vrot.slane %v4157_v35, 4  ;;  %v11306_v17 = vld [vmem:[#allocation183_spill] sm:$0xff]  ;;  %v3686_v2 = vsel %vm2322_vm6, %v3654_v31, %v9114_v47  ;;  %vm11307_vm7 = vcmask 261120   ;;  %vm11312_vm0 = vmmov %vm11300_vm11 }
 0x39f   : > { %2981 = vrot.lane.b32.xlu0 %v9280_v30, %s10923_s20  ;;  %v9284_v11 = vpop.permute.xlu1 %2948  ;;  %v9337_v60 = vrot.slane %v4160_v52, 5  ;;  %v3601_v34 = vsel %vm11300_vm11, %v8891_v29, %v11306_v17  ;;  %v4166_v36 = vshll.u32 %v9316_v6, 16  ;;  %v3713_v21 = vsel %vm2355_vm9, %v3686_v2, %v9134_v62  ;;  %vm11316_vm14 = vmmov %vm11307_vm7  ;;  %v11334_v29 = vld [vmem:[#allocation18_spill] sm:$0xff]  ;;  %s310_s20 = sand.u32 1, %s5843_s28  }
 0x3a0   : > { %v3626_v47 = vsel %vm2256_vm13, %v3601_v34, %v8909_v51  ;;  %v4170_v62 = vshrl.u32 %v9316_v6, 16  ;;  %vm11310_vm1 = vnez %v11309_v39  ;;  %v4260_v51 = vshll.u32 %v9319_v28, 16  ;;  %v11313_v34 = vld [vmem:[#allocation13_spill] sm:$0xff]  ;;  %s10293_s0 = scalar_lea.sflag [#allocation3], %s310_s20 }
 0x3a1   : > { %v9290_v10 = vpop.permute.xlu0 %2985  ;;  %3883 = vrot.lane.b32.xlu1 %v3844_v14, %s5887_s21  ;;  %vm4095_vm5 = vmpackc.low %vm11310_vm1, %vm11310_vm1  ;;  %vm11318_vm11 = vcmask 1045504  }
 0x3a2   : > { %vm11322_vm1 = vmmov %vm11307_vm7 }
 0x3a3   : > { %2997 = vrot.lane.b32.xlu0 %v11302_v48, %s11219_s13  ;;  %v9305_v57 = vpop.permute.xlu1 %2967 }
 0x3a5   : > { %v9312_v14 = vpop.permute.xlu0 %2881  ;;  %3885 = vrot.lane.b32.xlu1 %v3854_v8, %s5887_s21  ;;  %v3684_v8 = vsel %vm2322_vm6, %v3652_v15, %v9053_v1  ;;  %v4256_v1 = vrot.slane %v4254_v5, 4  ;;  %v4266_v5 = vrot.slane %v4264_v18, 4  ;;  %v4163_v18 = vor.u32 %v9337_v60, %v9326_v32  ;;  %v5749_v60 = vld [vmem:[%s6021_s22 + $0x14] sm:$0x3] }
 0x3a6   : > { %v3711_v55 = vsel %vm2355_vm9, %v3684_v8, %v9100_v58  ;;  %v9382_v8 = vrot.slane %v4166_v36, 5  ;;  %v9395_v32 = vsel %vm4095_vm5, %v5749_v60, 4286644096  ;;  %vm11327_vm5 = vmmov %vm11312_vm0 }
 0x3a7   : > { %3013 = vrot.lane.b32.xlu0 %v11306_v17, %s5883_s25  ;;  %v9335_v38 = vpop.permute.xlu1 %2983  ;;  %v3738_v35 = vsel %vm10647_vm15, %v3711_v55, %v9126_v49  ;;  %v3740_v49 = vsel %vm10647_vm15, %v3713_v21, %v9150_v7  ;;  %v10644_v17 = vrot.slane %v9316_v6, 5  ;;  %v4257_v31 = vor.u32 %v4256_v1, %v11313_v34 }
 0x3a8   : > { %v3765_v58 = vsel %vm2421_vm10, %v3738_v35, %v9142_v42  ;;  %v11311_v42 = vld [vmem:[#allocation141_spill] sm:$0xff]  ;;  %v11314_v35 = vld [vmem:[#allocation135_spill] sm:$0xff]  ;;  %v9397_v36 = vrot.slane %v4266_v5, 4 }
 0x3a9   : > { %v9351_v52 = vpop.permute.xlu0 %3015  ;;  %2995 = vrot.lane.b32.xlu1 %v11291_v53, %s11219_s13  ;;  %v3792_v40 = vsel %vm11307_vm7, %v3765_v58, %v9158_v9  ;;  %v11308_v53 = vld [vmem:[#allocation180_spill] sm:$0xff]  ;;  %v3604_v7 = vsel %vm11312_vm0, %v8973_v20, %v11311_v42  ;;  %v3648_v9 = vsel %vm2289_vm4, %v3626_v47, %v8981_v24  ;;  %v3767_v20 = vsel %vm2421_vm10, %v3740_v49, %v9144_v27 }
 0x3aa   : > { %v3867_v2 = vshll.u32 %v3792_v40, 16  ;;  %v3054_v24 = vrot.slane %v11302_v48, 2  ;;  %v3055_v21 = vrot.slane %v11314_v35, 2  ;;  %v3628_v1 = vsel %vm2256_vm13, %v3604_v7, %v8978_v16 }
 0x3ab   : > { %3029 = vrot.lane.b32.xlu0 %v11308_v53, %s5882_s2  ;;  %v9368_v15 = vpop.permute.xlu1 %2999  ;;  %v3680_v58 = vsel %vm2322_vm6, %v3648_v9, %v8986_v54  ;;  %v4262_v47 = vrot.slane %v4260_v51, 5  ;;  %v4481_v49 = vrot.slane %v9319_v28, 5  ;;  %v3650_v53 = vsel %vm2289_vm4, %v3628_v1, %v8993_v46  ;;  %v11317_v51 = vld [vmem:[#allocation174_spill] sm:$0xff] }
 0x3ac   : > { %v3707_v5 = vsel %vm2355_vm9, %v3680_v58, %v9001_v43  ;;  %v4258_v39 = vrot.slane %v4257_v31, 4  ;;  %v3682_v16 = vsel %vm2322_vm6, %v3650_v53, %v9033_v0  ;;  %v3794_v42 = vsel %vm11316_vm14, %v3767_v20, %v9152_v13 }
 0x3ad   : > { %v9386_v55 = vpop.permute.xlu0 %2897  ;;  %3011 = vrot.lane.b32.xlu1 %v11261_v3, %s5883_s25  ;;  %v11315_v3 = vld [vmem:[#allocation150_spill] sm:$0xff]  ;;  %v3734_v54 = vsel %vm10647_vm15, %v3707_v5, %v9066_v59  ;;  %v3709_v46 = vsel %vm2355_vm9, %v3682_v16, %v9092_v41  ;;  %v3869_v9 = vrot.slane %v3867_v2, 1  ;;  %v3056_v0 = vsel %vm11318_vm11, %v3054_v24, %v3055_v21  ;;  %s5287_s25 = sshll.u32 %s310_s20, 7 }
 0x3ae   : > { %v3761_v43 = vsel %vm2421_vm10, %v3734_v54, %v9108_v45  ;;  %v4415_v59 = vmax.bf16 %v9397_v36, %v9319_v28  ;;  %v9429_v34 = vrot.slane %v4481_v49, 4  ;;  %v3736_v13 = vsel %vm10647_vm15, %v3709_v46, %v9117_v12  ;;  %v11321_v12 = vld [vmem:[#allocation17_spill] sm:$0xff] }
 0x3af   : > { %3052 = vrot.lane.b32.xlu0 %v11315_v3, %s5884_s4  ;;  %v9405_v27 = vpop.permute.xlu1 %3001  ;;  %v3788_v31 = vsel %vm11307_vm7, %v3761_v43, %v9129_v25  ;;  %v9438_v20 = vrot.slane %v4170_v62, 4  ;;  %v3763_v45 = vsel %vm2421_vm10, %v3736_v13, %v9137_v22  ;;  %v3871_v2 = vshll.u32 %v3794_v42, 16  ;;  %v11323_v62 = vld [vmem:[#allocation145_spill] sm:$0xff]  ;;  %v11325_v42 = vld [vmem:[#allocation12_spill] sm:$0xff]  ;;  %v5528_v22 = vpop.f32.mrf.mxu1 }
 0x3b0   : > { %11319 = vst [vmem:[#allocation66_spill] sm:$0xff] %v9429_v34  ;;  %v3865_v24 = vshrl.u32 %v3792_v40, 16  ;;  %v4176_v35 = vshll.u32 %v9395_v32, 16  ;;  %v11320_v21 = vrot.slane %v11303_v63, 5  ;;  %v4282_v1 = vshrl.u32 %v11321_v12, 16  ;;  %v11328_v43 = vld [vmem:[#allocation136_spill] sm:$0xff] }
 0x3b1   : > { %v9418_v7 = vpop.permute.xlu0 %3038  ;;  %3027 = vrot.lane.b32.xlu1 %v11317_v51, %s5882_s2  ;;  %v3790_v25 = vsel %vm11322_vm1, %v3763_v45, %v9197_v61  ;;  %v9455_v40 = vsel %vm6380_vm8, %v4258_v39, %v4262_v47  ;;  %v3857_v53 = vshll.u32 %v3788_v31, 16  ;;  %v9457_v16 = vrot.slane %v4163_v18, 4  ;;  %v11326_v51 = vld [vmem:[#allocation75_spill] sm:$0xff]  ;;  %v11331_v39 = vld [vmem:[#allocation78_spill] sm:$0xff]  ;;  %vm11339_vm1 = vmmov %vm11327_vm5  ;;  %s5888_s2 = smov [#allocation2]  }
 0x3b2   : > { %v4480_v60 = vrot.slane %v11320_v21, 4  ;;  %v3870_v5 = vor.u32 %v3869_v9, %v3865_v24  ;;  %v9461_v54 = vrot.slane %v10644_v17, 4  ;;  %v4551_v61 = vmax.bf16 %v9429_v34, %v4415_v59  ;;  %v11329_v18 = vld [vmem:[#allocation23_spill] sm:$0xff]  ;;  %v11341_v3 = vld [vmem:[#allocation89_spill] sm:$0xff] }
 0x3b3   : > { %3071 = vrot.lane.b32.xlu0 %v3056_v0, %s5886_s3  ;;  %v9436_v41 = vpop.permute.xlu1 %2883  ;;  %v3091_v46 = vsel %vm11327_vm5, %v11326_v51, %v11325_v42  ;;  %vm11330_vm0 = vnez %v11329_v18  ;;  %v3873_v59 = vrot.slane %v3871_v2, 1  ;;  %v3861_v13 = vshll.u32 %v3790_v25, 16  ;;  %v11333_v42 = vld [vmem:[#allocation85_spill] sm:$0xff]  ;;  %v11336_v2 = vld [vmem:[#allocation34_spill] sm:$0xff] }
 0x3b4   : > { %vm4096_vm14 = vmpackc.low %vm11330_vm0, %vm11330_vm0  ;;  %v3114_v9 = vsel %vm2256_vm13, %v3091_v46, %v11331_v39  ;;  %v4414_v45 = vmax.bf16 %v9455_v40, %v11303_v63  ;;  %v9482_v21 = vsel %vm6424_vm3, %v4480_v60, %v4481_v49  ;;  %vm11335_vm11 = vnez %v11334_v29  ;;  %v11337_v46 = vld [vmem:[#allocation25_spill] sm:$0xff]  ;;  %v11338_v39 = vld [vmem:[#allocation82_spill] sm:$0xff] }
 0x3b5   : > { %v9448_v58 = vpop.permute.xlu0 %3040  ;;  %3050 = vrot.lane.b32.xlu1 %v11323_v62, %s5884_s4  ;;  %v4284_v62 = vrot.slane %v4282_v1, 4  ;;  %v3130_v51 = vsel %vm2289_vm4, %v3114_v9, %v11333_v42  ;;  %vm4097_vm7 = vmpackc.low %vm11335_vm11, %vm11335_vm11  ;;  %v4288_v25 = vshll.u32 %v11336_v2, 16  ;;  %v3094_v49 = vsel %vm11339_vm1, %v11338_v39, %v11337_v46  ;;  %v5750_v42 = vld [vmem:[%s6021_s22 + $0x18] sm:$0xf]  ;;  %s10211_s4 = scalar_lea.vmem [#allocation2], %s5287_s25 }
 0x3b6   : > { %v3859_v60 = vrot.slane %v3857_v53, 1  ;;  %vm11340_vm5 = vsmask.f32 7424  ;;  %v4575_v17 = vmax.bf16 %v4551_v61, %v11336_v2  ;;  %v3116_v47 = vsel %vm2256_vm13, %v3094_v49, %v11341_v3  ;;  %v11343_v9 = vld [vmem:[#allocation80_spill] sm:$0xff]  ;;  %v11344_v49 = vld [vmem:[#allocation29_spill] sm:$0xff]  ;;  %s5204_s9 = sshll.u32 %s10211_s4, 4  ;;  %s10280_s9 = int_to_ptr.vmem [resolvable:$true] %s5204_s9 }
 0x3b7   : > { %3087 = vrot.lane.b32.xlu0 %v11328_v43, %s5885_s14  ;;  %v9469_v0 = vpop.permute.xlu1 %3017  ;;  %v3874_v1 = vsel %vm11340_vm5, %v3870_v5, %v3873_v59  ;;  %v11342_v5 = vld [vmem:[#allocation96_spill] sm:$0xff]  ;;  %v3855_v46 = vshrl.u32 %v3788_v31, 16  ;;  %v3863_v39 = vrot.slane %v3861_v13, 1  ;;  %v3146_v18 = vsel %vm2322_vm6, %v3130_v51, %v11343_v9  ;;  %v11345_v9 = vld [vmem:[#allocation39_spill] sm:$0xff]  ;;  %vm11348_vm11 = vmmov %vm11340_vm5  ;;  %s5775_s24 = scalar_lea.vmem %s10280_s9, 2048 }
 0x3b8   : > { %v3132_v59 = vsel %vm2289_vm4, %v3116_v47, %v11342_v5  ;;  %v9517_v34 = vrot.slane %v4176_v35, 5  ;;  %v4550_v61 = vmax.bf16 %v9482_v21, %v4414_v45  ;;  %v3162_v47 = vsel %vm2355_vm9, %v3146_v18, %v9228_v44  ;;  %v11346_v45 = vld [vmem:[#allocation90_spill] sm:$0xff]  ;;  %p5776_p13 = scmp.ne.s32.totalorder %s10280_s9, %s5775_s24 }
 0x3b9   : > { %v9486_v43 = vpop.permute.xlu0 %2929  ;;  %3069 = vrot.lane.b32.xlu1 %v9280_v30, %s5886_s3  ;;  %v9505_v30 = vsel %vm4096_vm14, %v5750_v42, 4286644096  ;;  %v5751_v42 = vld [vmem:[%s6021_s22 + $0x1c] sm:$0xf]  ;;  %v4290_v35 = vrot.slane %v4288_v25, 5  ;;  %v3860_v13 = vor.u32 %v3859_v60, %v3855_v46  ;;  %v3178_v51 = vsel %vm10647_vm15, %v3162_v47, %v9252_v50 }
 0x3ba   : > { %v9525_v3 = vsel %vm4097_vm7, %v5751_v42, 4286644096  ;;  %v4285_v29 = vor.u32 %v4284_v62, %v11344_v49  ;;  %v4630_v5 = vmax.bf16 %v4575_v17, %v11345_v9  ;;  %v3148_v42 = vsel %vm2322_vm6, %v3132_v59, %v11346_v45  ;;  %p5777_p0 = pnand %p5776_p13, %p5986_p3 }
 0x3bb   : > { %3889 = vrot.lane.b32.xlu0 %v3874_v1, %s5887_s21  ;;  %v9511_v53 = vpop.permute.xlu1 %2913  ;;  %v4185_v1 = vshrl.u32 %v9505_v30, 16  ;;  %v3194_v44 = vsel %vm2421_vm10, %v3178_v51, %v9263_v26  ;;  %vm11347_vm0 = vcmask 261120   ;;  %vm10648_vm14 = vcmask 359424  }
 0x3bc   : > { %v3864_v25 = vsel %vm11348_vm11, %v3860_v13, %v3863_v39  ;;  %v4286_v50 = vrot.slane %v4285_v29, 4  ;;  %v3164_v62 = vsel %vm2355_vm9, %v3148_v42, %v9172_v33  ;;  %vm3241_vm7 = vcmask 326656   ;;  %p5778_p1 = pneg %p5777_p0 }
 0x3bd   : > { %v9530_v31 = vpop.permute.xlu0 %3073  ;;  %3085 = vrot.lane.b32.xlu1 %v11302_v48, %s5885_s14  ;;  %v3210_v48 = vsel %vm11347_vm0, %v3194_v44, %v9284_v11  ;;  %vm11349_vm1 = vcmask 293888   ;;  %v11350_v26 = vrot.slane %v11321_v12, 5  ;;  %v3180_v11 = vsel %vm10647_vm15, %v3164_v62, %v9212_v56  ;;  %v11352_v56 = vld [vmem:[#allocation43_spill] sm:$0xff]  ;;  %v11354_v44 = vld [vmem:[#allocation44_spill] sm:$0xff]  ;;  %s5401_s14 = sshll.u32 %s5851_s30, 4 }
 0x3be   : > { %v3226_v17 = vsel %vm11349_vm1, %v3210_v48, %v9305_v57  ;;  %v9561_v33 = vsel %vm6380_vm8, %v4286_v50, %v4290_v35  ;;  %v4574_v39 = vmax.bf16 %v4550_v61, %v11321_v12  ;;  %v11351_v57 = vld [vmem:[#allocation21_spill] sm:$0xff]  ;;  %v3196_v13 = vsel %vm2421_vm10, %v3180_v11, %v9240_v4  ;;  %v11396_v50 = vld [vmem:[#allocation88_spill] sm:$0xff]  ;;  %s5201_s30 = sadd.s32 %s5401_s14, %s5396_s26 }
 0x3bf   : > { %v3058_v18 = vpop.permute.xlu1 %3057  ;;  %v4488_v59 = vrot.slane %v11350_v26, 4  ;;  %v3243_v46 = vsel %vm3241_vm7, %v3226_v17, %v9335_v38  ;;  %v4310_v47 = vshrl.u32 %v11351_v57, 16  ;;  %vm10649_vm5 = vcmask 392192   ;;  %s5397_s1 = sshll.u32 %s5201_s30, 7 }
 0x3c0   : > { %v3260_v51 = vsel %vm10648_vm14, %v3243_v46, %v9368_v15  ;;  %v4316_v29 = vshll.u32 %v11352_v56, 16  ;;  %v3212_v38 = vsel %vm11347_vm0, %v3196_v13, %v9256_v37  ;;  %vm3292_vm11 = vcmask 424960   ;;  %v11356_v13 = vld [vmem:[#allocation101_spill] sm:$0xff]  ;;  %s10287_s13 = scalar_lea.hbm %s10353_s8, %s5397_s1 }
 0x3c1   : > { %v9550_v60 = vpop.permute.xlu0 %3075  ;;  %3887 = vrot.lane.b32.xlu1 %v3864_v25, %s5887_s21  ;;  %v4417_v35 = vmax.bf16 %v9561_v33, %v11321_v12  ;;  %v3228_v61 = vsel %vm11349_vm1, %v3212_v38, %v9273_v23  ;;  %vm3309_vm15 = vcmask 457728   ;;  %v11353_v4 = vrot.slane %v11336_v2, 5 }
 0x3c2   : > { %v4629_v42 = vmax.bf16 %v4574_v39, %v9561_v33  ;;  %v4188_v37 = vshll.u32 %v9505_v30, 16  ;;  %v4668_v48 = vmax.bf16 %v4630_v5, %v11354_v44  ;;  %v3245_v25 = vsel %vm3241_vm7, %v3228_v61, %v9290_v10  ;;  %v11359_v61 = vld [vmem:[#allocation30_spill] sm:$0xff]  ;;  %v11399_v44 = vld [vmem:[#allocation115_spill] sm:$0xff] }
 0x3c3   : > { %v3060_v49 = vpop.permute.xlu1 %3059  ;;  %v9582_v15 = vsel %vm6424_vm3, %v4488_v59, %v11353_v4  ;;  %v3277_v23 = vsel %vm10649_vm5, %v3260_v51, %v9351_v52  ;;  %v4312_v62 = vrot.slane %v4310_v47, 4  ;;  %v3262_v17 = vsel %vm10648_vm14, %v3245_v25, %v9405_v27  ;;  %v11355_v47 = vld [vmem:[#allocation41_spill] sm:$0xff]  ;;  %v11361_v25 = vld [vmem:[#allocation112_spill] sm:$0xff]  ;;  %v11391_v52 = vld [vmem:[#allocation62_spill] sm:$0xff] }
 0x3c4   : > { %v3294_v26 = vsel %vm3292_vm11, %v3277_v23, %v9418_v7  ;;  %v3279_v5 = vsel %vm10649_vm5, %v3262_v17, %v9469_v0  ;;  %vm3326_vm0 = vcmask 490496   ;;  %v4553_v10 = vmax.bf16 %v9582_v15, %v4417_v35  ;;  %v11358_v0 = vld [vmem:[#allocation46_spill] sm:$0xff] }
 0x3c5   : > { %v9576_v45 = vpop.permute.xlu0 %2971  ;;  %v3311_v11 = vsel %vm3309_vm15, %v3294_v26, %v3058_v18  ;;  %v4318_v46 = vrot.slane %v4316_v29, 5  ;;  %vm3891_vm1 = vcmask 523264   ;;  %v4667_v27 = vmax.bf16 %v4629_v42, %v9582_v15 }
 0x3c6   : > { %v4692_v7 = vmax.bf16 %v4668_v48, %v11352_v56  ;;  %vm11357_vm14 = vcmask 31744   ;;  %v3152_v18 = vsel %vm2322_vm6, %v11358_v0, %v9436_v41  ;;  %vm3960_vm5 = vcmask 818176   ;;  %v11365_v0 = vld [vmem:[#allocation169_spill] sm:$0xff] }
 0x3c7   : > { %v9596_v59 = vpop.permute.xlu1 %2952  ;;  %v3097_v51 = vsel %vm11357_vm14, %v11356_v13, %v11355_v47  ;;  %v3296_v38 = vsel %vm3292_vm11, %v3279_v5, %v9448_v58  ;;  %v3328_v29 = vsel %vm3326_vm0, %v3311_v11, %v9530_v31  ;;  %v4313_v4 = vor.u32 %v4312_v62, %v11359_v61  ;;  %v11362_v47 = vld [vmem:[#allocation121_spill] sm:$0xff] }
 0x3c8   : > { %v11360_v42 = vrot.slane %v11351_v57, 5  ;;  %v3118_v23 = vsel %vm2256_vm13, %v3097_v51, %v11361_v25  ;;  %v3313_v17 = vsel %vm3309_vm15, %v3296_v38, %v3060_v49  ;;  %v4577_v26 = vmax.bf16 %v4553_v10, %v11351_v57  ;;  %v11364_v49 = vld [vmem:[#allocation54_spill] sm:$0xff]  ;;  %v11370_v25 = vld [vmem:[#allocation37_spill] sm:$0xff] }
 0x3c9   : > { %v9603_v39 = vpop.permute.xlu0 %2973  ;;  %v3134_v58 = vsel %vm2289_vm4, %v3118_v23, %v11362_v47  ;;  %v4314_v31 = vrot.slane %v4313_v4, 4  ;;  %v11363_v62 = vrot.slane %v11352_v56, 5  ;;  %v4691_v13 = vmax.bf16 %v4667_v27, %v11351_v57  ;;  %v11371_v23 = vld [vmem:[#allocation32_spill] sm:$0xff] }
 0x3ca   : > { %v4496_v48 = vrot.slane %v11360_v42, 4  ;;  %v4338_v51 = vshrl.u32 %v11364_v49, 16  ;;  %v3150_v10 = vsel %vm2322_vm6, %v3134_v58, %v9312_v14  ;;  %v3168_v38 = vsel %vm2355_vm9, %v3152_v18, %v11365_v0  ;;  %v11368_v42 = vld [vmem:[#allocation49_spill] sm:$0xff] }
 0x3cb   : > { %v3876_v35 = vpop.permute.xlu1 %3875  ;;  %vm11367_vm13 = vcmask 1041408   ;;  %v3330_v61 = vsel %vm3326_vm0, %v3313_v17, %v9550_v60  ;;  %v4319_v4 = vsel %vm6380_vm8, %v4314_v31, %v4318_v46  ;;  %v4747_v27 = vmax.bf16 %v4692_v7, %v11368_v42  ;;  %v11373_v60 = vld [vmem:[#allocation58_spill] sm:$0xff] }
 0x3cc   : > { %v3893_v41 = vsel %vm3891_vm1, %v3328_v29, %v3876_v35  ;;  %v4498_v11 = vsel %vm6424_vm3, %v4496_v48, %v11363_v62  ;;  %v11366_v29 = vld [vmem:[#allocation161_spill] sm:$0xff]  ;;  %v11369_v48 = vld [vmem:[#allocation50_spill] sm:$0xff]  ;;  %v3166_v18 = vsel %vm2355_vm9, %v3150_v10, %v9386_v55  ;;  %v4420_v58 = vmax.bf16 %v4319_v4, %v11351_v57 }
 0x3cd   : > { %v9627_v5 = vpop.permute.xlu0 %2989  ;;  %5578 = vmatprep.mubr.msk.bf16.mxu1 %vm3960_vm5, %v3893_v41  ;;  %v5040_v35 = vsel %vm11367_vm13, %v11366_v29, 0  ;;  %v11372_v41 = vmax.bf16 %v11370_v25, %v11371_v23  ;;  %v4632_v62 = vmax.bf16 %v4577_v26, %v4319_v4  ;;  %v4344_v17 = vshll.u32 %v11373_v60, 16  ;;  %v11375_v29 = vld [vmem:[#allocation106_spill] sm:$0xff]  ;;  %vm4099_vm13 = vmpackc.low %vm6639_vm12, %vm6639_vm12  ;;  %v11380_v23 = vld [vmem:[#allocation113_spill] sm:$0xff] }
 0x3ce   : > { %vm11374_vm4 = vcmask 195584   ;;  %v4746_v7 = vmax.bf16 %v4691_v13, %v4319_v4  ;;  %v4556_v55 = vmax.bf16 %v4498_v11, %v4420_v58  ;;  %v9666_v26 = vrot.slane %v4185_v1, 4 }
 0x3cf   : > { %v3878_v56 = vpop.permute.xlu1 %3877  ;;  %v4783_v14 = vmax.bf16 %v11372_v41, %v11369_v48  ;;  %v3182_v46 = vsel %vm11374_vm4, %v3166_v18, %v9511_v53  ;;  %vm11376_vm14 = vmmov %vm11374_vm4  ;;  %v4670_v10 = vmax.bf16 %v4632_v62, %v4498_v11  ;;  %v9668_v53 = vrot.slane %v4188_v37, 5 }
 0x3d0   : > { %v3895_v47 = vsel %vm3891_vm1, %v3330_v61, %v3878_v56  ;;  %v3184_v42 = vsel %vm11376_vm14, %v3168_v38, %v11375_v29  ;;  %v11377_v61 = vld [vmem:[#allocation51_spill] sm:$0xff]  ;;  %v4340_v13 = vrot.slane %v4338_v51, 4  ;;  %v4784_v48 = vmax.bf16 %v4746_v7, %v4498_v11  ;;  %v5752_v51 = vld [vmem:[%s6021_s22 + $0x24] sm:$0xf] }
 0x3d1   : > { %v9658_v31 = vpop.permute.xlu0 %2885  ;;  %5579 = vmatmul.mubr.msk.bf16.vlgmr.msra.gmra.mxu1 %vm3960_vm5, %v3895_v47  ;;  %v4871_v0 = vshrl.u32 %v4783_v14, 16  ;;  %v4785_v57 = vmax.bf16 %v4747_v27, %v11377_v61  ;;  %v3198_v38 = vsel %vm2421_vm10, %v3182_v46, %v9486_v43  ;;  %v4874_v25 = vshll.u32 %v4783_v14, 16  ;;  %v11381_v14 = vld [vmem:[#allocation60_spill] sm:$0xff]  ;;  %v11383_v61 = vld [vmem:[#allocation69_spill] sm:$0xff] }
 0x3d2   : > { %5595 = vmatpush3.bf16.msra.mxu1 %v5040_v35  ;;  %v4580_v35 = vmax.bf16 %v4556_v55, %v11364_v49  ;;  %vm11379_vm4 = vcmask 261120   ;;  %v3200_v37 = vsel %vm2421_vm10, %v3184_v42, %v11380_v23  ;;  %v4880_v18 = vshll.u32 %v4784_v48, 16 }
 0x3d3   : > { %v2988_v4 = vpop.permute.xlu1 %2987  ;;  %v4873_v27 = vrot.slane %v4871_v0, 4  ;;  %v3214_v1 = vsel %vm11379_vm4, %v3198_v38, %v9596_v59  ;;  %v4884_v47 = vshrl.u32 %v4784_v48, 16  ;;  %v9683_v58 = vsel %vm4099_vm13, %v5752_v51, 4286644096  ;;  %vm11384_vm12 = vmmov %vm11379_vm4  ;;  %v11387_v51 = vld [vmem:[#allocation81_spill] sm:$0xff] }
 0x3d4   : > { %v4346_v11 = vrot.slane %v4344_v17, 5  ;;  %v4876_v62 = vrot.slane %v4874_v25, 5  ;;  %v4890_v43 = vshll.u32 %v4785_v57, 16  ;;  %v4882_v7 = vrot.slane %v4880_v18, 5  ;;  %vm4100_vm4 = vmpackc.low %vm6588_vm2, %vm6588_vm2 }
 0x3d5   : > { %v9680_v41 = vpop.permute.xlu0 %3019  ;;  %v4886_v0 = vrot.slane %v4884_v47, 4  ;;  %v4341_v29 = vor.u32 %v4340_v13, %v11381_v14  ;;  %v11382_v59 = vrot.slane %v11364_v49, 5  ;;  %v3216_v42 = vsel %vm11384_vm12, %v3200_v37, %v11383_v61  ;;  %v11388_v14 = vld [vmem:[#allocation61_spill] sm:$0xff]  ;;  %v11389_v37 = vld [vmem:[#allocation79_spill] sm:$0xff]  ;;  %v11390_v61 = vld [vmem:[#allocation56_spill] sm:$0xff] }
 0x3d6   : > { %vm11385_vm14 = vcmask 293888   ;;  %v4877_v48 = vor.u32 %v4876_v62, %v4873_v27  ;;  %v4694_v38 = vmax.bf16 %v4670_v10, %v11364_v49  ;;  %v4892_v57 = vrot.slane %v4890_v43, 5  ;;  %v11394_v10 = vld [vmem:[#allocation98_spill] sm:$0xff] }
 0x3d7   : > { %v3004_v46 = vpop.permute.xlu1 %3003  ;;  %v4504_v55 = vrot.slane %v11382_v59, 4  ;;  %v3230_v56 = vsel %vm11385_vm14, %v3214_v1, %v9576_v45  ;;  %v4887_v25 = vor.u32 %v4886_v0, %v4882_v7  ;;  %v4342_v23 = vrot.slane %v4341_v29, 4  ;;  %v11393_v1 = vld [vmem:[#allocation93_spill] sm:$0xff]  ;;  %v11395_v29 = vld [vmem:[#allocation99_spill] sm:$0xff]  ;;  %vm11402_vm13 = vmmov %vm11385_vm14 }
 0x3d8   : > { %v11386_v18 = vrot.slane %v11373_v60, 5  ;;  %v4878_v47 = vrot.slane %v4877_v48, 4  ;;  %v4750_v59 = vmax.bf16 %v11388_v14, %v11387_v51  ;;  %v11392_v45 = vmax.bf16 %v11390_v61, %v11391_v52  ;;  %v11401_v14 = vld [vmem:[#allocation110_spill] sm:$0xff] }
 0x3d9   : > { %v3022_v17 = vpop.permute.xlu0 %3021  ;;  %v4753_v62 = vmax.bf16 %v11394_v10, %v11393_v1  ;;  %v4888_v43 = vrot.slane %v4887_v25, 4  ;;  %v4347_v60 = vsel %vm6380_vm8, %v4342_v23, %v4346_v11  ;;  %v11400_v51 = vrot.slane %v11399_v44, 4 }
 0x3da   : > { %v4506_v13 = vsel %vm6424_vm3, %v4504_v55, %v11386_v18  ;;  %v4786_v27 = vmax.bf16 %v11392_v45, %v11389_v37  ;;  %v11397_v55 = vld [vmem:[#allocation91_spill] sm:$0xff]  ;;  %v3232_v52 = vsel %vm11402_vm13, %v3216_v42, %v9603_v39  ;;  %v4883_v37 = vsel %vm6380_vm8, %v4878_v47, %v4882_v7 }
 0x3db   : > { %v3006_v0 = vpop.permute.xlu1 %3005  ;;  %v11398_v48 = vmax.bf16 %v11396_v50, %v11397_v55  ;;  %v9714_v9 = vmax.bf16 %v11401_v14, %v11400_v51  ;;  %v4423_v25 = vmax.bf16 %v4347_v60, %v11364_v49  ;;  %v4635_v61 = vmax.bf16 %v4580_v35, %v4347_v60  ;;  %v11403_v45 = vld [vmem:[#allocation87_spill] sm:$0xff] }
 0x3dc   : > { %v3249_v11 = vsel %vm3241_vm7, %v3232_v52, %v9627_v5  ;;  %v4893_v50 = vsel %vm6380_vm8, %v4888_v43, %v4892_v57  ;;  %v4749_v44 = vmax.bf16 %v4694_v38, %v4347_v60  ;;  %v4788_v1 = vmax.bf16 %v4750_v59, %v11403_v45  ;;  %v11407_v59 = vld [vmem:[#allocation86_spill] sm:$0xff]  ;;  %v11408_v43 = vld [vmem:[#allocation97_spill] sm:$0xff]  ;;  %v11411_v45 = vld [vmem:[#allocation92_spill] sm:$0xff] }
 0x3dd   : > { %v4789_v18 = vmax.bf16 %v11398_v48, %v11395_v29  ;;  %v3045_v23 = vpop.permute.xlu0 %3044  ;;  %v3247_v10 = vsel %vm3241_vm7, %v3230_v56, %v2988_v4  ;;  %v9727_v29 = vcombine.low %v4883_v37, %v4893_v50  ;;  %v4559_v39 = vmax.bf16 %v4506_v13, %v4423_v25  ;;  %v5753_v37 = vld [vmem:[%s6021_s22 + $0x28] sm:$0xf]  ;;  %v11409_v25 = vld [vmem:[#allocation125_spill] sm:$0xff] }
 0x3de   : > { %v4673_v42 = vmax.bf16 %v4635_v61, %v4506_v13  ;;  %vm11405_vm12 = vcmask 359424   ;;  %v4787_v35 = vmax.bf16 %v4749_v44, %v4506_v13  ;;  %v4895_v57 = vshrl.u32 %v4786_v27, 16 }
 0x3df   : > { %v3264_v5 = vsel %vm11405_vm12, %v3247_v10, %v3004_v46  ;;  %v9733_v49 = vpop.permute.xlu1 %2887  ;;  %v4898_v38 = vshll.u32 %v4786_v27, 16  ;;  %vm11406_vm14 = vmmov %vm11405_vm12  ;;  %v4583_v4 = vmax.bf16 %v4559_v39, %v11407_v59  ;;  %v4791_v60 = vmax.bf16 %v4753_v62, %v11408_v43 }
 0x3e0   : > { %v3266_v47 = vsel %vm11406_vm14, %v3249_v11, %v3006_v0  ;;  %v4697_v56 = vmax.bf16 %v4673_v42, %v11407_v59  ;;  %v4897_v48 = vrot.slane %v4895_v57, 4  ;;  %v4904_v14 = vshll.u32 %v4787_v35, 16 }
 0x3e1   : > { %v3064_v55 = vpop.permute.xlu0 %3063  ;;  %v4900_v51 = vrot.slane %v4898_v38, 5  ;;  %v4914_v52 = vshll.u32 %v4788_v1, 16  ;;  %v9745_v46 = vsel %vm4100_vm4, %v5753_v37, 4286644096  ;;  %v4213_v13 = vshrl.u32 %v9683_v58, 16 }
 0x3e2   : > { %v4908_v0 = vshrl.u32 %v4787_v35, 16  ;;  %v11410_v62 = vrot.slane %v11409_v25, 5  ;;  %v4906_v44 = vrot.slane %v4904_v14, 5  ;;  %v4752_v1 = vmax.bf16 %v4697_v56, %v11411_v45  ;;  %v11414_v35 = vld [vmem:[#allocation95_spill] sm:$0xff] }
 0x3e3   : > { %v3043_v11 = vpop.permute.xlu1 %3042  ;;  %v4901_v50 = vor.u32 %v4900_v51, %v4897_v48  ;;  %vm11412_vm13 = vcmask 392192   ;;  %v4919_v7 = vshrl.u32 %v4789_v18, 16  ;;  %v4916_v59 = vrot.slane %v4914_v52, 5 }
 0x3e4   : > { %v9751_v61 = vrot.slane %v11410_v62, 4  ;;  %v3283_v10 = vsel %vm11412_vm13, %v3266_v47, %v3022_v17  ;;  %vm11413_vm2 = vmmov %vm11412_vm13  ;;  %v4910_v42 = vrot.slane %v4908_v0, 4  ;;  %v4790_v43 = vmax.bf16 %v4752_v1, %v11414_v35 }
 0x3e5   : > { %v3281_v39 = vsel %vm11413_vm2, %v3264_v5, %v9680_v41  ;;  %v3080_v57 = vpop.permute.xlu0 %3079  ;;  %v4902_v38 = vrot.slane %v4901_v50, 4  ;;  %v4922_v37 = vshll.u32 %v4789_v18, 16  ;;  %v4921_v62 = vrot.slane %v4919_v7, 4  ;;  %v11416_v7 = vld [vmem:[#allocation103_spill] sm:$0xff] }
 0x3e6   : > { %v4911_v25 = vor.u32 %v4910_v42, %v4906_v44  ;;  %v4938_v27 = vshll.u32 %v4791_v60, 16  ;;  %v4638_v48 = vmax.bf16 %v4583_v4, %v11411_v45  ;;  %v4928_v56 = vshll.u32 %v4790_v43, 16  ;;  %v11415_v4 = vld [vmem:[#allocation126_spill] sm:$0xff] }
 0x3e7   : > { %v3062_v51 = vpop.permute.xlu1 %3061  ;;  %v4907_v17 = vsel %vm6380_vm8, %v4902_v38, %v4906_v44  ;;  %v4924_v47 = vrot.slane %v4922_v37, 5  ;;  %v4932_v41 = vshrl.u32 %v4790_v43, 16  ;;  %v3300_v5 = vsel %vm3292_vm11, %v3283_v10, %v3045_v23  ;;  %v11417_v23 = vld [vmem:[#allocation116_spill] sm:$0xff] }
 0x3e8   : > { %v3298_v14 = vsel %vm3292_vm11, %v3281_v39, %v3043_v11  ;;  %v4912_v52 = vrot.slane %v4911_v25, 4  ;;  %v4676_v0 = vmax.bf16 %v4638_v48, %v11414_v35  ;;  %v4930_v60 = vrot.slane %v4928_v56, 5 }
 0x3e9   : > { %v9764_v18 = vpop.permute.xlu0 %2975  ;;  %v4925_v50 = vor.u32 %v4924_v47, %v4921_v62  ;;  %v4934_v1 = vrot.slane %v4932_v41, 4  ;;  %v4794_v45 = vmax.bf16 %v9714_v9, %v11415_v4  ;;  %v4940_v42 = vrot.slane %v4938_v27, 5  ;;  %v11418_v9 = vld [vmem:[#allocation111_spill] sm:$0xff] }
 0x3ea   : > { %v4917_v44 = vsel %vm6380_vm8, %v4912_v52, %v4916_v59  ;;  %v4700_v38 = vmax.bf16 %v4676_v0, %v11416_v7  ;;  %v4943_v10 = vshrl.u32 %v11417_v23, 16  ;;  %v4946_v37 = vshll.u32 %v11417_v23, 16  ;;  %v11420_v52 = vld [vmem:[#allocation131_spill] sm:$0xff] }
 0x3eb   : > { %v3078_v11 = vpop.permute.xlu1 %3077  ;;  %v9772_v39 = vcombine.low %v4907_v17, %v4917_v44  ;;  %v4926_v35 = vrot.slane %v4925_v50, 4  ;;  %v4935_v43 = vor.u32 %v4934_v1, %v4930_v60  ;;  %v3317_v25 = vsel %vm3309_vm15, %v3300_v5, %v3064_v55  ;;  %v11419_v17 = vld [vmem:[#allocation129_spill] sm:$0xff]  ;;  %v11421_v1 = vld [vmem:[#allocation114_spill] sm:$0xff] }
 0x3ec   : > { %v3315_v62 = vsel %vm3309_vm15, %v3298_v14, %v3062_v51  ;;  %v4755_v48 = vmax.bf16 %v4700_v38, %v11418_v9  ;;  %v4945_v47 = vrot.slane %v4943_v10, 4  ;;  %v4948_v41 = vrot.slane %v4946_v37, 5  ;;  %v11422_v5 = vld [vmem:[#allocation130_spill] sm:$0xff]  ;;  %v11423_v38 = vld [vmem:[#allocation133_spill] sm:$0xff] }
 0x3ed   : > { %v9778_v59 = vpop.permute.xlu0 %2977  ;;  %v4931_v27 = vsel %vm6380_vm8, %v4926_v35, %v4930_v60  ;;  %v4936_v56 = vrot.slane %v4935_v43, 4  ;;  %v4796_v0 = vmax.bf16 %v11420_v52, %v11419_v17  ;;  %v3332_v50 = vsel %vm3326_vm0, %v3315_v62, %v3078_v11 }
 0x3ee   : > { %v4793_v4 = vmax.bf16 %v4755_v48, %v11421_v1  ;;  %v4962_v55 = vshll.u32 %v4794_v45, 16  ;;  %v4797_v51 = vmax.bf16 %v9751_v61, %v11422_v5  ;;  %v4949_v7 = vor.u32 %v4948_v41, %v4945_v47  ;;  %v11425_v1 = vld [vmem:[#allocation22_spill] sm:$0xff] }
 0x3ef   : > { %v3880_v14 = vpop.permute.xlu1 %3879  ;;  %v4941_v44 = vsel %vm6380_vm8, %v4936_v56, %v4940_v42  ;;  %v4967_v60 = vshrl.u32 %v11423_v38, 16  ;;  %v4970_v23 = vshll.u32 %v11423_v38, 16  ;;  %v4976_v9 = vshll.u32 %v4796_v0, 16 }
 0x3f0   : > { %v3897_v10 = vsel %vm3891_vm1, %v3332_v50, %v3880_v14  ;;  %v9793_v35 = vcombine.low %v4931_v27, %v4941_v44  ;;  %v4952_v11 = vshll.u32 %v4793_v4, 16  ;;  %v4956_v43 = vshrl.u32 %v4793_v4, 16 }
 0x3f1   : > { %v9795_v37 = vpop.permute.xlu0 %2993  ;;  %5582 = vmatprep.mubr.msk.bf16.mxu1 %vm3960_vm5, %v3897_v10  ;;  %v4950_v61 = vrot.slane %v4949_v7, 4  ;;  %v4969_v45 = vrot.slane %v4967_v60, 4  ;;  %v4972_v62 = vrot.slane %v4970_v23, 5  ;;  %v3334_v42 = vsel %vm3326_vm0, %v3317_v25, %v3080_v57 }
 0x3f2   : > { %11424 = vst [vmem:[#allocation154_spill] sm:$0xff] %v9793_v35  ;;  %v4954_v48 = vrot.slane %v4952_v11, 5  ;;  %v4958_v47 = vrot.slane %v4956_v43, 4  ;;  %v4980_v56 = vshrl.u32 %v4796_v0, 16  ;;  %v4964_v17 = vrot.slane %v4962_v55, 5 }
 0x3f3   : > { %v3882_v41 = vpop.permute.xlu1 %3881  ;;  %v4973_v52 = vor.u32 %v4972_v62, %v4969_v45  ;;  %v4978_v27 = vrot.slane %v4976_v9, 5  ;;  %v4986_v50 = vshll.u32 %v4797_v51, 16  ;;  %vm11426_vm4 = vnez %v11425_v1  ;;  %v5754_v45 = vld [vmem:[%s6021_s22 + $0x20] sm:$0x3]  ;;  %v11430_v9 = vld [vmem:[#allocation38_spill] sm:$0xff] }
 0x3f4   : > { %vm4098_vm12 = vmpackc.low %vm11426_vm4, %vm11426_vm4  ;;  %v3899_v4 = vsel %vm3891_vm1, %v3334_v42, %v3882_v41  ;;  %v4955_v5 = vsel %vm6380_vm8, %v4950_v61, %v4954_v48  ;;  %v4959_v14 = vor.u32 %v4958_v47, %v4954_v48  ;;  %v4982_v57 = vrot.slane %v4980_v56, 4 }
 0x3f5   : > { %v11427_v25 = vor.u32 %v9438_v20, %v9382_v8  ;;  %v4222_v55 = vshll.u32 %v9745_v46, 16  ;;  %v4226_v51 = vshrl.u32 %v9745_v46, 16  ;;  %v9810_v44 = vpop.permute.xlu0 %2889  ;;  %5583 = vmatmul.mubr.msk.bf16.gmra.mxu1 %vm3960_vm5, %v3899_v4  ;;  %v4974_v7 = vrot.slane %v4973_v52, 4 }
 0x3f6   : > { %v11428_v38 = vshll.u32 %v9525_v3, 16  ;;  %v4960_v23 = vrot.slane %v4959_v14, 4  ;;  %v4983_v10 = vor.u32 %v4982_v57, %v4978_v27  ;;  %v4988_v11 = vrot.slane %v4986_v50, 5 }
 0x3f7   : > { %v4174_v0 = vrot.slane %v11427_v25, 4  ;;  %v4191_v43 = vor.u32 %v9668_v53, %v9666_v26  ;;  %v11429_v20 = vshrl.u32 %v9525_v3, 16  ;;  %v9825_v62 = vsel %vm4098_vm12, %v5754_v45, 4286644096  ;;  %v9830_v42 = vpop.permute.xlu1 %2991  ;;  %v5755_v25 = vld [vmem:[%s6021_s22 + $0x2c] sm:$0x3] }
 0x3f8   : > { %v4196_v60 = vrot.slane %v11428_v38, 5  ;;  %vm11431_vm14 = vnez %v11430_v9  ;;  %v4979_v26 = vsel %vm6380_vm8, %v4974_v7, %v4978_v27  ;;  %v4215_v53 = vrot.slane %v4213_v13, 4  ;;  %s5779_s22 = sshll.u32 %s5888_s2, 4  ;;  %s5780_s22 = int_to_ptr.vmem [resolvable:$false] %s5779_s22 }
 0x3f9   : > { %v4200_v61 = vrot.slane %v11429_v20, 4  ;;  %vm4101_vm13 = vmpackc.low %vm11431_vm14, %vm11431_vm14  ;;  %v11432_v48 = vshll.u32 %v9683_v58, 16  ;;  %v4965_v56 = vsel %vm6380_vm8, %v4960_v23, %v4964_v17  ;;  %v4984_v41 = vrot.slane %v4983_v10, 4  ;;  %v9845_v14 = vpop.permute.xlu0 %3023  ;;  %s5781_s25 = scalar_lea.vmem %s5780_s22, 4096  ;;  %p5782_p2 = scmp.lt.s32.totalorder %s10280_s9, %s5780_s22 }
 0x3fa   : > { %v11433_v52 = vshrl.u32 %v9395_v32, 16  ;;  %v4224_v1 = vrot.slane %v4222_v55, 5  ;;  %v4228_v4 = vrot.slane %v4226_v51, 4  ;;  %v9847_v27 = vcombine.low %v4955_v5, %v4965_v56  ;;  %p5783_p4 = scmp.lt.s32.totalorder %s5781_s25, %s5775_s24 }
 0x3fb   : > { %v4218_v47 = vrot.slane %v11432_v48, 5  ;;  %v4169_v13 = vsel %vm6380_vm8, %v9457_v16, %v9382_v8  ;;  %v11435_v57 = vrot.slane %v9395_v32, 5  ;;  %v9858_v7 = vsel %vm4101_vm13, %v5755_v25, 4286644096  ;;  %v9866_v23 = vpop.permute.xlu1 %3007  ;;  %v11441_v25 = vld [vmem:[#allocation53_spill] sm:$0xff] }
 0x3fc   : > { %v9843_v50 = vmax.bf16 %v11433_v52, %v9395_v32  ;;  %11434 = vst [vmem:[#allocation165_spill] sm:$0xff] %v9847_v27  ;;  %v4989_v55 = vsel %vm6380_vm8, %v4984_v41, %v4988_v11  ;;  %v4179_v5 = vsel %vm6380_vm8, %v4174_v0, %v9517_v34  ;;  %v4201_v51 = vor.u32 %v4200_v61, %v4196_v60  ;;  %p5784_p5 = por %p5783_p4, %p5782_p2 }
 0x3fd   : > { %v9855_v17 = vrot.slane %v11435_v57, 4  ;;  %v4204_v38 = vshll.u32 %v9825_v62, 16  ;;  %v9868_v8 = vcombine.low %v4979_v26, %v4989_v55  ;;  %v11437_v16 = vrot.slane %v9316_v6, 5  ;;  %v9883_v26 = vpop.permute.xlu0 %3025 }
 0x3fe   : > { %v11438_v10 = vrot.slane %v9287_v19, 9  ;;  %v4192_v45 = vrot.slane %v4191_v43, 4  ;;  %v4219_v11 = vor.u32 %v4218_v47, %v4215_v53  ;;  %v4404_v9 = vmax.bf16 %v4169_v13, %v9287_v19  ;;  %v11440_v53 = vld [vmem:[#allocation128_spill] sm:$0xff]  ;;  %p5785_p6 = pnand %p5784_p5, %p5778_p1 }
 0x3ff   : > { %11436 = vst [vmem:[#allocation104_spill] sm:$0xff] %v9868_v8  ;;  %v11439_v34 = vmov %v11435_v57  ;;  %v4232_v61 = vshll.u32 %v9858_v7, 16  ;;  %v4229_v48 = vor.u32 %v4228_v4, %v4224_v1  ;;  %v4405_v56 = vmax.bf16 %v4179_v5, %v9316_v6  ;;  %v9894_v13 = vpop.permute.xlu1 %3009 }
 0x400   : > { %v4455_v20 = vsel %vm6424_vm3, %v11438_v10, %v11437_v16  ;;  %v4458_v0 = vsel %vm6424_vm3, %v9461_v54, %v11439_v34  ;;  %v5367_v41 = vrot.slane %v9505_v30, 9  ;;  %v4462_v43 = vrot.slane %v9525_v3, 5 }
 0x401   : > { %v3154_v19 = vsel %vm2322_vm6, %v11440_v53, %v9658_v31  ;;  %v4542_v32 = vmax.bf16 %v9855_v17, %v9843_v50  ;;  %v4202_v47 = vrot.slane %v4201_v51, 4  ;;  %v4206_v54 = vrot.slane %v4204_v38, 5  ;;  %v11442_v17 = vld [vmem:[#allocation175_spill] sm:$0xff]  ;;  %v9907_v51 = vpop.permute.xlu0 %3048 }
 0x402   : > { %v4208_v52 = vshrl.u32 %v9825_v62, 16  ;;  %v9898_v6 = vsel %vm6380_vm8, %v4192_v45, %v4196_v60  ;;  %v4220_v4 = vrot.slane %v4219_v11, 4  ;;  %v4470_v57 = vrot.slane %v9745_v46, 5 }
 0x403   : > { %v3156_v31 = vsel %vm2322_vm6, %v11441_v25, %v9733_v49  ;;  %v4234_v55 = vrot.slane %v4232_v61, 5  ;;  %v4236_v50 = vshrl.u32 %v9858_v7, 16  ;;  %v3170_v5 = vsel %vm2355_vm9, %v3154_v19, %v11442_v17  ;;  %v11443_v61 = vld [vmem:[#allocation152_spill] sm:$0xff]  ;;  %v9916_v25 = vpop.permute.xlu1 %2891 }
 0x404   : > { %v4230_v38 = vrot.slane %v4229_v48, 4  ;;  %v4540_v16 = vmax.bf16 %v4455_v20, %v4404_v9  ;;  %v4541_v10 = vmax.bf16 %v4458_v0, %v4405_v56  ;;  %v4463_v60 = vsel %vm6424_vm3, %v5367_v41, %v4462_v43  ;;  %v11444_v0 = vld [vmem:[#allocation83_spill] sm:$0xff] }
 0x405   : > { %v4464_v45 = vrot.slane %v4462_v43, 4  ;;  %v4407_v11 = vmax.bf16 %v9898_v6, %v9505_v30  ;;  %v4210_v34 = vrot.slane %v4208_v52, 4  ;;  %v4465_v49 = vrot.slane %v9825_v62, 5  ;;  %v9928_v19 = vpop.permute.xlu0 %3067 }
 0x406   : > { %v3172_v53 = vsel %vm2355_vm9, %v3156_v31, %v11443_v61  ;;  %v4207_v48 = vsel %vm6380_vm8, %v4202_v47, %v4206_v54  ;;  %v9922_v20 = vsel %vm6380_vm8, %v4220_v4, %v4224_v1  ;;  %v5368_v9 = vrot.slane %v9683_v58, 9  ;;  %v11446_v54 = vld [vmem:[#allocation166_spill] sm:$0xff] }
 0x407   : > { %vm11445_vm2 = vcmask 195584   ;;  %v4238_v41 = vrot.slane %v4236_v50, 4  ;;  %v4473_v43 = vrot.slane %v9858_v7, 5  ;;  %v9932_v52 = vsel %vm6380_vm8, %v4230_v38, %v4234_v55  ;;  %v11448_v61 = vld [vmem:[#allocation134_spill] sm:$0xff]  ;;  %v3047_v8 = vpop.permute.xlu1 %3046 }
 0x408   : > { %v3186_v56 = vsel %vm11445_vm2, %v3170_v5, %v11444_v0  ;;  %v4472_v31 = vrot.slane %v4470_v57, 4  ;;  %v4564_v47 = vmax.bf16 %v4540_v16, %v9505_v30  ;;  %v4565_v1 = vmax.bf16 %v4541_v10, %v9525_v3  ;;  %vm11447_vm4 = vmmov %vm11445_vm2 }
 0x409   : > { %v3188_v4 = vsel %vm11447_vm4, %v3172_v53, %v11446_v54  ;;  %v4211_v17 = vrot.slane %v4210_v34, 4  ;;  %v4408_v5 = vmax.bf16 %v4207_v48, %v9525_v3  ;;  %v4410_v50 = vmax.bf16 %v9922_v20, %v9683_v58  ;;  %v11449_v34 = vld [vmem:[#allocation158_spill] sm:$0xff] }
 0x40a   : > { %v3202_v0 = vsel %vm2421_vm10, %v3186_v56, %v11448_v61  ;;  %v4543_v55 = vmax.bf16 %v4463_v60, %v4407_v11  ;;  %v4466_v38 = vsel %vm6424_vm3, %v4464_v45, %v4465_v49  ;;  %v9947_v30 = vsel %vm6424_vm3, %v5368_v9, %v4470_v57  ;;  %v3084_v56 = vpop.permute.xlu0 %3083  ;;  %v11450_v9 = vld [vmem:[#allocation42_spill] sm:$0xff] }
 0x40b   : > { %v4411_v16 = vmax.bf16 %v9932_v52, %v9745_v46  ;;  %v4566_v3 = vmax.bf16 %v4542_v32, %v9825_v62  ;;  %v9952_v10 = vrot.slane %v4238_v41, 4  ;;  %v3204_v53 = vsel %vm2421_vm10, %v3188_v4, %v11449_v34  ;;  %v3066_v34 = vpop.permute.xlu1 %3065 }
 0x40c   : > { %v9958_v11 = vsel %vm6424_vm3, %v4472_v31, %v4473_v43  ;;  %v4619_v45 = vmax.bf16 %v4564_v47, %v9898_v6  ;;  %v4467_v54 = vrot.slane %v4465_v49, 4  ;;  %v4620_v57 = vmax.bf16 %v4565_v1, %v4207_v48  ;;  %v11453_v31 = vld [vmem:[#allocation146_spill] sm:$0xff] }
 0x40d   : > { %vm11451_vm12 = vcmask 261120   ;;  %v4409_v27 = vmax.bf16 %v4211_v17, %v9825_v62  ;;  %v4544_v32 = vmax.bf16 %v4466_v38, %v4408_v5  ;;  %v4546_v41 = vmax.bf16 %v9947_v30, %v4410_v50 }
 0x40e   : > { %v3218_v61 = vsel %vm11451_vm12, %v3202_v0, %v11450_v9  ;;  %vm11452_vm14 = vcmask 293888   ;;  %v4567_v24 = vmax.bf16 %v4543_v55, %v9683_v58  ;;  %vm11454_vm3 = vmmov %vm11451_vm12  ;;  %v4547_v49 = vmax.bf16 %v9958_v11, %v4411_v16  ;;  %v9981_v1 = vpop.permute.xlu0 %2979  ;;  %v11457_v55 = vld [vmem:[#allocation5_spill] sm:$0xff] }
 0x40f   : > { %v3234_v4 = vsel %vm11452_vm14, %v3218_v61, %v9764_v18  ;;  %v3220_v35 = vsel %vm11454_vm3, %v3204_v53, %v11453_v31  ;;  %v4412_v62 = vmax.bf16 %v9952_v10, %v9858_v7  ;;  %v9975_v48 = vrot.slane %v4473_v43, 4  ;;  %vm11455_vm13 = vmmov %vm11452_vm14  ;;  %v3082_v53 = vpop.permute.xlu1 %3081  ;;  %v11461_v61 = vld [vmem:[#allocation16_spill] sm:$0xff] }
 0x410   : > { %v3251_v6 = vsel %vm3241_vm7, %v3234_v4, %v9830_v42  ;;  %v3236_v47 = vsel %vm11455_vm13, %v3220_v35, %v9778_v59  ;;  %vm11456_vm2 = vcmask 359424   ;;  %v4657_v5 = vmax.bf16 %v4619_v45, %v4463_v60 }
 0x411   : > { %v3268_v18 = vsel %vm11456_vm2, %v3251_v6, %v9866_v23  ;;  %v4658_v50 = vmax.bf16 %v4620_v57, %v4466_v38  ;;  %v3253_v42 = vsel %vm3241_vm7, %v3236_v47, %v9795_v37  ;;  %v4568_v0 = vmax.bf16 %v4544_v32, %v9745_v46  ;;  %vm11458_vm4 = vmmov %vm11456_vm2  ;;  %v11462_v47 = vld [vmem:[#allocation24_spill] sm:$0xff] }
 0x412   : > { %v4570_v16 = vmax.bf16 %v4546_v41, %v11457_v55  ;;  %v3270_v43 = vsel %vm11458_vm4, %v3253_v42, %v9894_v13  ;;  %v4545_v9 = vmax.bf16 %v4467_v54, %v4409_v27  ;;  %vm11459_vm12 = vcmask 392192   ;;  %v9995_v45 = vpop.permute.xlu0 %2981  ;;  %vm11483_vm2 = vmmov %vm11455_vm13 }
 0x413   : > { %v3285_v59 = vsel %vm11459_vm12, %v3268_v18, %v9845_v14  ;;  %v4571_v35 = vmax.bf16 %v4547_v49, %v11303_v63  ;;  %v4621_v23 = vmax.bf16 %v4566_v3, %v4211_v17  ;;  %v4622_v60 = vmax.bf16 %v4567_v24, %v9922_v20  ;;  %vm11460_vm14 = vmmov %vm11459_vm12  ;;  %v3884_v3 = vpop.permute.xlu1 %3883 }
 0x414   : > { %v4548_v38 = vmax.bf16 %v9975_v48, %v4412_v62  ;;  %v3302_v37 = vsel %vm3292_vm11, %v3285_v59, %v3047_v8  ;;  %v4681_v57 = vmax.bf16 %v4657_v5, %v9683_v58  ;;  %v3287_v13 = vsel %vm11460_vm14, %v3270_v43, %v9883_v26  ;;  %vm11484_vm12 = vmmov %vm11458_vm4 }
 0x415   : > { %v3319_v27 = vsel %vm3309_vm15, %v3302_v37, %v3066_v34  ;;  %v4682_v14 = vmax.bf16 %v4658_v50, %v9745_v46  ;;  %v4625_v32 = vmax.bf16 %v4570_v16, %v11461_v61  ;;  %v4623_v41 = vmax.bf16 %v4568_v0, %v9932_v52 }
 0x416   : > { %v3336_v17 = vsel %vm3326_vm0, %v3319_v27, %v3082_v53  ;;  %v4569_v8 = vmax.bf16 %v4545_v9, %v9858_v7  ;;  %v4626_v58 = vmax.bf16 %v4571_v35, %v9455_v40  ;;  %v4659_v24 = vmax.bf16 %v4621_v23, %v4467_v54  ;;  %v10012_v31 = vpop.permute.xlu0 %2997  ;;  %v11463_v53 = vld [vmem:[#allocation9_spill] sm:$0xff] }
 0x417   : > { %v3901_v4 = vsel %vm3891_vm1, %v3336_v17, %v3884_v3  ;;  %v4660_v26 = vmax.bf16 %v4622_v60, %v9947_v30  ;;  %v4572_v34 = vmax.bf16 %v4548_v38, %v9319_v28  ;;  %v3304_v46 = vsel %vm3292_vm11, %v3287_v13, %v9907_v51  ;;  %v3886_v5 = vpop.permute.xlu1 %3885  ;;  %v11464_v60 = vld [vmem:[#allocation66_spill] sm:$0xff] }
 0x418   : > { %5586 = vmatprep.mubr.msk.bf16.mxu1 %vm3960_vm5, %v3901_v4  ;;  %v4736_v6 = vmax.bf16 %v4681_v57, %v9922_v20  ;;  %v3321_v49 = vsel %vm3309_vm15, %v3304_v46, %v9928_v19  ;;  %v4737_v62 = vmax.bf16 %v4682_v14, %v9932_v52  ;;  %v4663_v54 = vmax.bf16 %v4625_v32, %v11462_v47  ;;  %v11465_v14 = vld [vmem:[#allocation31_spill] sm:$0xff]  ;;  %v11467_v4 = vld [vmem:[#allocation138_spill] sm:$0xff] }
 0x419   : > { %v3338_v18 = vsel %vm3326_vm0, %v3321_v49, %v3084_v56  ;;  %v4661_v50 = vmax.bf16 %v4623_v41, %v9958_v11  ;;  %v4624_v51 = vmax.bf16 %v4569_v8, %v9952_v10  ;;  %v4664_v0 = vmax.bf16 %v4626_v58, %v9482_v21 }
 0x41a   : > { %v3903_v42 = vsel %vm3891_vm1, %v3338_v18, %v3886_v5  ;;  %v4683_v20 = vmax.bf16 %v4659_v24, %v9858_v7  ;;  %v4684_v16 = vmax.bf16 %v4660_v26, %v11457_v55  ;;  %v4627_v19 = vmax.bf16 %v4572_v34, %v9397_v36  ;;  %v10028_v52 = vpop.permute.xlu0 %3013 }
 0x41b   : > { %5587 = vmatmul.mubr.msk.bf16.gmra.mxu1 %vm3960_vm5, %v3903_v42  ;;  %v4774_v56 = vmax.bf16 %v4736_v6, %v9947_v30  ;;  %v4775_v43 = vmax.bf16 %v4737_v62, %v9958_v11  ;;  %v4687_v9 = vmax.bf16 %v4663_v54, %v11463_v53  ;;  %v10034_v59 = vpop.permute.xlu1 %2995  ;;  %v4685_v35 = vmax.bf16 %v4661_v50, %v11303_v63 }
 0x41c   : > { %v4662_v7 = vmax.bf16 %v4624_v51, %v9975_v48  ;;  %v4688_v55 = vmax.bf16 %v4664_v0, %v11321_v12  ;;  %v4739_v23 = vmax.bf16 %v4684_v16, %v11461_v61  ;;  %v4665_v38 = vmax.bf16 %v4627_v19, %v11464_v60  ;;  %v11466_v61 = vld [vmem:[#allocation132_spill] sm:$0xff] }
 0x41d   : > { %v4738_v30 = vmax.bf16 %v4683_v20, %v9952_v10  ;;  %v4799_v57 = vshrl.u32 %v4774_v56, 16  ;;  %v4802_v11 = vshll.u32 %v4774_v56, 16  ;;  %v4808_v13 = vshll.u32 %v4775_v43, 16  ;;  %v11471_v51 = vld [vmem:[#allocation72_spill] sm:$0xff]  ;;  %v11474_v56 = vld [vmem:[#allocation163_spill] sm:$0xff] }
 0x41e   : > { %v10041_v37 = vpop.permute.xlu0 %3029  ;;  %v4812_v27 = vshrl.u32 %v4775_v43, 16  ;;  %v4742_v32 = vmax.bf16 %v4687_v9, %v11465_v14  ;;  %v4740_v63 = vmax.bf16 %v4685_v35, %v9455_v40  ;;  %v4686_v12 = vmax.bf16 %v4662_v7, %v9319_v28 }
 0x41f   : > { %v10045_v17 = vpop.permute.xlu1 %3011  ;;  %v3158_v3 = vsel %vm2322_vm6, %v11466_v61, %v9810_v44  ;;  %v4743_v41 = vmax.bf16 %v4688_v55, %v9561_v33  ;;  %v4777_v10 = vmax.bf16 %v4739_v23, %v11462_v47  ;;  %v4689_v8 = vmax.bf16 %v4665_v38, %v11336_v2  ;;  %v11468_v44 = vld [vmem:[#allocation52_spill] sm:$0xff]  ;;  %v11469_v2 = vld [vmem:[#allocation33_spill] sm:$0xff]  ;;  %v11470_v47 = vld [vmem:[#allocation155_spill] sm:$0xff] }
 0x420   : > { %v3160_v58 = vsel %vm2322_vm6, %v11467_v4, %v9916_v25  ;;  %v4776_v40 = vmax.bf16 %v4738_v30, %v9975_v48  ;;  %v4801_v26 = vrot.slane %v4799_v57, 4  ;;  %v4804_v28 = vrot.slane %v4802_v11, 5  ;;  %v11476_v57 = vld [vmem:[#allocation65_spill] sm:$0xff]  ;;  %v11479_v4 = vld [vmem:[#allocation139_spill] sm:$0xff] }
 0x421   : > { %v10061_v34 = vrot.slane %v4808_v13, 5  ;;  %v4814_v46 = vrot.slane %v4812_v27, 4  ;;  %v3174_v33 = vsel %vm2355_vm9, %v3158_v3, %v11468_v44  ;;  %v4778_v49 = vmax.bf16 %v4740_v63, %v9482_v21  ;;  %v11473_v21 = vld [vmem:[#allocation39_spill] sm:$0xff] }
 0x422   : > { %v10058_v24 = vpop.permute.xlu0 %3052  ;;  %v4780_v62 = vmax.bf16 %v4742_v32, %v11469_v2  ;;  %v3176_v25 = vsel %vm2355_vm9, %v3160_v58, %v11470_v47  ;;  %v4781_v54 = vmax.bf16 %v4743_v41, %v9582_v15  ;;  %v4823_v18 = vshrl.u32 %v4777_v10, 16  ;;  %v11477_v13 = vld [vmem:[#allocation35_spill] sm:$0xff]  ;;  %v11478_v41 = vld [vmem:[#allocation44_spill] sm:$0xff] }
 0x423   : > { %v3028_v6 = vpop.permute.xlu1 %3027  ;;  %v4826_v48 = vshll.u32 %v4777_v10, 16  ;;  %v4741_v5 = vmax.bf16 %v4686_v12, %v9397_v36  ;;  %v4818_v50 = vshll.u32 %v4776_v40, 16  ;;  %vm11472_vm6 = vcmask 195584  }
 0x424   : > { %v3190_v42 = vsel %vm11472_vm6, %v3174_v33, %v11471_v51  ;;  %v4805_v20 = vor.u32 %v4804_v28, %v4801_v26  ;;  %v4815_v16 = vor.u32 %v4814_v46, %v10061_v34  ;;  %v4744_v19 = vmax.bf16 %v4689_v8, %v11473_v21  ;;  %vm11475_vm3 = vmmov %vm11472_vm6  ;;  %v11481_v33 = vld [vmem:[#allocation26_spill] sm:$0xff] }
 0x425   : > { %v3192_v43 = vsel %vm11475_vm3, %v3176_v25, %v11474_v56  ;;  %v4832_v9 = vshll.u32 %v4778_v49, 16  ;;  %v4836_v15 = vshrl.u32 %v4778_v49, 16  ;;  %v4847_v35 = vshrl.u32 %v4780_v62, 16  ;;  %vm11485_vm6 = vmmov %vm11460_vm14 }
 0x426   : > { %v3072_v0 = vpop.permute.xlu0 %3071  ;;  %v4850_v7 = vshll.u32 %v4780_v62, 16  ;;  %v4856_v55 = vshll.u32 %v4781_v54, 16  ;;  %v4860_v36 = vshrl.u32 %v4781_v54, 16  ;;  %v4825_v23 = vrot.slane %v4823_v18, 4 }
 0x427   : > { %v3051_v53 = vpop.permute.xlu1 %3050  ;;  %v4828_v38 = vrot.slane %v4826_v48, 5  ;;  %v4779_v30 = vmax.bf16 %v4741_v5, %v11464_v60  ;;  %v3206_v11 = vsel %vm2421_vm10, %v3190_v42, %v11476_v57  ;;  %v3208_v27 = vsel %vm2421_vm10, %v3192_v43, %v11477_v13  ;;  %v11491_v57 = vld [vmem:[#allocation154_spill] sm:$0xff]  ;;  %v11495_v13 = vld [vmem:[#allocation104_spill] sm:$0xff] }
 0x428   : > { %v4806_v14 = vrot.slane %v4805_v20, 4  ;;  %v4816_v32 = vrot.slane %v4815_v16, 4  ;;  %v4820_v63 = vrot.slane %v4818_v50, 5  ;;  %v4834_v61 = vrot.slane %v4832_v9, 5 }
 0x429   : > { %v4838_v3 = vrot.slane %v4836_v15, 4  ;;  %v4782_v10 = vmax.bf16 %v4744_v19, %v11478_v41  ;;  %v4849_v8 = vrot.slane %v4847_v35, 4  ;;  %vm11480_vm9 = vcmask 261120  }
 0x42a   : > { %v3222_v58 = vsel %vm11480_vm9, %v3206_v11, %v11479_v4  ;;  %v3088_v40 = vpop.permute.xlu0 %3087  ;;  %v4852_v60 = vrot.slane %v4850_v7, 5  ;;  %v4858_v26 = vrot.slane %v4856_v55, 5  ;;  %v4862_v28 = vrot.slane %v4860_v36, 4  ;;  %vm11482_vm10 = vmmov %vm11480_vm9  ;;  %v11493_v11 = vld [vmem:[#allocation165_spill] sm:$0xff] }
 0x42b   : > { %v3070_v12 = vpop.permute.xlu1 %3069  ;;  %v4842_v46 = vshll.u32 %v4779_v30, 16  ;;  %v3238_v44 = vsel %vm11455_vm13, %v3222_v58, %v9981_v1  ;;  %v3224_v49 = vsel %vm11482_vm10, %v3208_v27, %v11481_v33  ;;  %v4829_v2 = vor.u32 %v4828_v38, %v4825_v23  ;;  %v1697_v27 = vpop.f32.mrf.mxu1  ;;  %vm11497_vm13 = vmmov %vm11480_vm9 }
 0x42c   : > { %v3240_v62 = vsel %vm11483_vm2, %v3224_v49, %v9995_v45  ;;  %v3255_v47 = vsel %vm3241_vm7, %v3238_v44, %v10034_v59  ;;  %v4811_v25 = vsel %vm6380_vm8, %v4806_v14, %v10061_v34  ;;  %v4821_v54 = vsel %vm6380_vm8, %v4816_v32, %v4820_v63  ;;  %vm11498_vm10 = vmmov %vm11480_vm9 }
 0x42d   : > { %v3257_v1 = vsel %vm3241_vm7, %v3240_v62, %v10012_v31  ;;  %v3272_v18 = vsel %vm11458_vm4, %v3255_v47, %v10045_v17  ;;  %v4839_v5 = vor.u32 %v4838_v3, %v4834_v61  ;;  %v4866_v50 = vshll.u32 %v4782_v10, 16  ;;  %v5529_v14 = vpop.f32.mrf.mxu1  ;;  %vm11499_vm2 = vmmov %vm11480_vm9 }
 0x42e   : > { %v3274_v45 = vsel %vm11484_vm12, %v3257_v1, %v10028_v52  ;;  %v3289_v59 = vsel %vm11460_vm14, %v3272_v18, %v3028_v6  ;;  %v4853_v51 = vor.u32 %v4852_v60, %v4849_v8  ;;  %v4863_v42 = vor.u32 %v4862_v28, %v4858_v26  ;;  %v3890_v21 = vpop.permute.xlu0 %3889  ;;  %vm11500_vm4 = vmmov %vm11499_vm2 }
 0x42f   : > { %v3086_v48 = vpop.permute.xlu1 %3085  ;;  %v4844_v34 = vrot.slane %v4842_v46, 5  ;;  %v3291_v20 = vsel %vm11485_vm6, %v3274_v45, %v10041_v37  ;;  %v3306_v16 = vsel %vm3292_vm11, %v3289_v59, %v3051_v53  ;;  %v5377_v19 = vcombine.low %v4811_v25, %v4821_v54  ;;  %v1700_v32 = vpop.f32.mrf.mxu1  ;;  %vm11501_vm12 = vmmov %vm11499_vm2 }
 0x430   : > { %v3308_v31 = vsel %vm3292_vm11, %v3291_v20, %v10058_v24  ;;  %v3323_v17 = vsel %vm3309_vm15, %v3306_v16, %v3070_v12  ;;  %v4830_v56 = vrot.slane %v4829_v2, 4  ;;  %v4840_v9 = vrot.slane %v4839_v5, 4  ;;  %vm11502_vm14 = vmmov %vm11499_vm2 }
 0x431   : > { %v3325_v52 = vsel %vm3309_vm15, %v3308_v31, %v3072_v0  ;;  %v3340_v6 = vsel %vm3326_vm0, %v3323_v17, %v3086_v48  ;;  %v4868_v15 = vrot.slane %v4866_v50, 5  ;;  %v4854_v53 = vrot.slane %v4853_v51, 4  ;;  %v5532_v63 = vpop.f32.mrf.mxu1  ;;  %vm11503_vm6 = vmmov %vm11499_vm2 }
 0x432   : > { %v3342_v35 = vsel %vm3326_vm0, %v3325_v52, %v3088_v40  ;;  %v4864_v7 = vrot.slane %v4863_v42, 4  ;;  %vm11486_vm7 = vcmask 31744   ;;  %v4835_v0 = vsel %vm6380_vm8, %v4830_v56, %v4834_v61 }
 0x433   : > { %v3888_v43 = vpop.permute.xlu1 %3887  ;;  %v3907_v24 = vsel %vm3891_vm1, %v3342_v35, %v3890_v21  ;;  %v4845_v55 = vsel %vm6380_vm8, %v4840_v9, %v4844_v34  ;;  %v4859_v36 = vsel %vm6380_vm8, %v4854_v53, %v4858_v26  ;;  %vm11487_vm15 = vmmov %vm11486_vm7  ;;  %v1713_v12 = vpop.f32.mrf.mxu1 }
 0x434   : > { %v3905_v37 = vsel %vm3891_vm1, %v3340_v6, %v3888_v43  ;;  %v4869_v23 = vsel %vm6380_vm8, %v4864_v7, %v4868_v15  ;;  %v5378_v38 = vcombine.low %v4835_v0, %v4845_v55  ;;  %vm11488_vm11 = vmmov %vm11486_vm7 }
 0x435   : > { %5590 = vmatprep.mubr.msk.bf16.mxu1 %vm3960_vm5, %v3905_v37  ;;  %v5379_v30 = vcombine.low %v4859_v36, %v4869_v23  ;;  %v10139_v61 = vpop.f32.mrf.mxu1 }
 0x436   : > { %5591 = vmatmul.mubr.msk.bf16.gmra.mxu1 %vm3960_vm5, %v3907_v24  ;;  %vm11489_vm5 = vmmov %vm11486_vm7 }
 0x437   : > { %5596 = vmatprep.mubr.msk.bf16.mxu1 %vm11486_vm7, %v5377_v19  ;;  %vm11490_vm0 = vmmov %vm11489_vm5  ;;  %v10188_v19 = vld [vmem:[%s10352_s7] ss:$0 sm:$0xff] }
 0x438   : > { %vm11492_vm1 = vmmov %vm11490_vm0  ;;  %v1762_v6 = vadd.f32 %v5528_v22, %v10188_v19  ;;  %v1760_v9 = vadd.f32 %v10188_v19, %v1697_v27  ;;  %v1763_v35 = vadd.f32 %v5529_v14, %v10188_v19  ;;  %v1761_v7 = vadd.f32 %v10188_v19, %v1700_v32 }
 0x439   : > { %vm11494_vm3 = vmmov %vm11490_vm0  ;;  %v1766_v36 = vadd.f32 %v5532_v63, %v10188_v19  ;;  %v1767_v32 = vadd.f32 %v10139_v61, %v10188_v19 }
 0x43a   : > { %vm11496_vm8 = vmmov %vm11490_vm0 }
 0x43b   : > { %vm11504_vm7 = vmmov %vm11499_vm2 }
 0x43e   : > { %5597 = vmatmul.mubr.msk.bf16.vlgmr.msra.gmra.mxu1 %vm11487_vm15, %v5378_v38  ;;  %vm11505_vm15 = vmmov %vm11499_vm2 }
 0x43f   : > { %5600 = vmatprep.mubr.msk.bf16.mxu1 %vm11488_vm11, %v5379_v30  ;;  %vm11506_vm11 = vmmov %vm11499_vm2 }
 0x446   : > { %5601 = vmatmul.mubr.msk.bf16.gmra.mxu1 %vm11489_vm5, %v9727_v29  ;;  %v10141_v29 = vpop.f32.mrf.mxu1  ;;  %vm11507_vm5 = vmmov %vm11499_vm2 }
 0x447   : > { %5604 = vmatprep.mubr.msk.bf16.mxu1 %vm11490_vm0, %v9772_v39  ;;  %vm11508_vm0 = vmmov %vm11499_vm2 }
 0x448   : > { %v10143_v39 = vpop.f32.mrf.mxu1 }
 0x44a   : > { %v10145_v3 = vpop.f32.mrf.mxu1 }
 0x44c   : > { %v10147_v41 = vpop.f32.mrf.mxu1 }
 0x44e   : > { %5605 = vmatmul.mubr.msk.bf16.gmra.mxu1 %vm11492_vm1, %v11491_v57  ;;  %v10149_v10 = vpop.f32.mrf.mxu1  ;;  %v1764_v57 = vadd.f32 %v10188_v19, %v1713_v12  ;;  %vm11509_vm1 = vmmov %vm11508_vm0 }
 0x44f   : > { %5608 = vmatprep.mubr.msk.bf16.mxu1 %vm11494_vm3, %v11493_v11  ;;  %vm11510_vm3 = vmmov %vm11508_vm0 }
 0x450   : > { %v10151_v8 = vpop.f32.mrf.mxu1 }
 0x452   : > { %v10153_v4 = vpop.f32.mrf.mxu1 }
 0x454   : > { %v10155_v58 = vpop.f32.mrf.mxu1 }
 0x456   : > { %5609 = vmatmul.mubr.msk.bf16.gmra.mxu1 %vm11496_vm8, %v11495_v13  ;;  %v10157_v40 = vpop.f32.mrf.mxu1  ;;  %vm11511_vm8 = vmmov %vm11508_vm0 }
 0x458   : > { %v5550_v60 = vpop.f32.mrf.mxu1 }
 0x459   : > { %v2714_v37 = vadd.f32 %v5550_v60, %v1762_v6 }
 0x45a   : > { %v2649_v26 = vpop.f32.mrf.mxu1 }
 0x45b   : > { %v2712_v24 = vadd.f32 %v2649_v26, %v1760_v9 }
 0x45c   : > { %v5551_v28 = vpop.f32.mrf.mxu1 }
 0x45d   : > { %v2715_v23 = vadd.f32 %v5551_v28, %v1763_v35  ;;  %v1765_v28 = vadd.f32 %v10188_v19, %v10141_v29 }
 0x45e   : > { %v2652_v46 = vpop.f32.mrf.mxu1 }
 0x45f   : > { %v2713_v22 = vadd.f32 %v2652_v46, %v1761_v7 }
 0x460   : > { %v5554_v44 = vpop.f32.mrf.mxu1 }
 0x461   : > { %v2718_v26 = vadd.f32 %v5554_v44, %v1766_v36 }
 0x462   : > { %v2665_v33 = vpop.f32.mrf.mxu1 }
 0x464   : > { %v10159_v49 = vpop.f32.mrf.mxu1 }
 0x465   : > { %v2719_v9 = vadd.f32 %v10159_v49, %v1767_v32  ;;  %v1771_v49 = vadd.f32 %v10147_v41, %v10188_v19 }
 0x466   : > { %v10161_v2 = vpop.f32.mrf.mxu1 }
 0x467   : > { %v2717_v7 = vadd.f32 %v10161_v2, %v1765_v28  ;;  %v1769_v2 = vadd.f32 %v10188_v19, %v10149_v10 }
 0x468   : > { %v10163_v62 = vpop.f32.mrf.mxu1 }
 0x46a   : > { %v10165_v47 = vpop.f32.mrf.mxu1 }
 0x46c   : > { %v10167_v25 = vpop.f32.mrf.mxu1 }
 0x46e   : > { %v10169_v54 = vpop.f32.mrf.mxu1 }
 0x470   : > { %v10171_v1 = vpop.f32.mrf.mxu1 }
 0x472   : > { %v10173_v18 = vpop.f32.mrf.mxu1 }
 0x474   : > { %v10175_v48 = vpop.f32.mrf.mxu1 }
 0x476   : > { %v10177_v5 = vpop.f32.mrf.mxu1 }
 0x491   : > { %v5580_v50 = vpop.f32.mrf.mxu1 }
 0x492   : > { %v4079_v0 = vadd.f32 %v5580_v50, %v2714_v37 }
 0x493   : > { %v4014_v45 = vpop.f32.mrf.mxu1 }
 0x494   : > { %v4077_v38 = vadd.f32 %v4014_v45, %v2712_v24  ;;  %v2716_v45 = vadd.f32 %v2665_v33, %v1764_v57  ;;  %v1768_v33 = vadd.f32 %v10188_v19, %v10145_v3 }
 0x495   : > { %v5581_v59 = vpop.f32.mrf.mxu1 }
 0x496   : > { %v4080_v13 = vadd.f32 %v5581_v59, %v2715_v23 }
 0x497   : > { %v4017_v51 = vpop.f32.mrf.mxu1 }
 0x498   : > { %v4078_v50 = vadd.f32 %v4017_v51, %v2713_v22  ;;  %v1770_v51 = vadd.f32 %v10143_v39, %v10188_v19 }
 0x4b5   : > { %v5584_v42 = vpop.f32.mrf.mxu1 }
 0x4b6   : > { %v4083_v59 = vadd.f32 %v5584_v42, %v2718_v26 }
 0x4b7   : > { %v4030_v34 = vpop.f32.mrf.mxu1 }
 0x4b8   : > { %v4081_v35 = vadd.f32 %v4030_v34, %v2716_v45 }
 0x4b9   : > { %v5585_v20 = vpop.f32.mrf.mxu1 }
 0x4ba   : > { %v4084_v24 = vadd.f32 %v5585_v20, %v2719_v9 }
 0x4bb   : > { %v4033_v16 = vpop.f32.mrf.mxu1 }
 0x4bc   : > { %v4082_v36 = vadd.f32 %v4033_v16, %v2717_v7 }
 0x4db   : > { %v10179_v31 = vpop.f32.mrf.mxu1 }
 0x4dd   : > { %v10181_v17 = vpop.f32.mrf.mxu1 }
 0x4df   : > { %v10183_v21 = vpop.f32.mrf.mxu1 }
 0x4e1   : > { %v10190_v56 = vpop.f32.mrf.mxu1 }
 0x4f6   : > { %v10192_v52 = vpop.f32.mrf.mxu1 }
 0x4f8   : > { %v10195_v43 = vpop.f32.mrf.mxu1 }
 0x4fa   : > { %v10198_v15 = vpop.f32.mrf.mxu1 }
 0x4fc   : > { %v10202_v53 = vpop.f32.mrf.mxu1 }
 0x4fe   : > { %v5598_v55 = vpop.f32.mrf.mxu1 }
 0x4ff   : > { %v5141_v30 = vadd.f32 %v5598_v55, %v4079_v0  ;;  %v2722_v55 = vadd.f32 %v10163_v62, %v1770_v51  ;;  %v1774_v62 = vadd.f32 %v10151_v8, %v10188_v19 }
 0x500   : > { %v5076_v11 = vpop.f32.mrf.mxu1 }
 0x501   : > { %v5157_v27 = vmax.f32 %v5141_v30, 0.0  ;;  %v5139_v14 = vadd.f32 %v5076_v11, %v4077_v38  ;;  %v2720_v38 = vadd.f32 %v10165_v47, %v1768_v33  ;;  %v4087_v30 = vadd.f32 %v10179_v31, %v2722_v55 }
 0x502   : > { %v5599_v60 = vpop.f32.mrf.mxu1  ;;  %v2723_v11 = vadd.f32 %v10167_v25, %v1771_v49  ;;  %v1772_v31 = vadd.f32 %v10188_v19, %v10153_v4 }
 0x503   : > { %5173 = vst.msk [vmem:[%s10211_s4 + $0x10] sm:$0xff] %vm11480_vm9, %v5157_v27  ;;  %v5155_v63 = vmax.f32 %v5139_v14, 0.0  ;;  %v5142_v12 = vadd.f32 %v5599_v60, %v4080_v13  ;;  %v4085_v22 = vadd.f32 %v10181_v17, %v2720_v38  ;;  %v2721_v27 = vadd.f32 %v10169_v54, %v1769_v2 }
 0x504   : > { %v5079_v46 = vpop.f32.mrf.mxu1  ;;  %v4088_v14 = vadd.f32 %v10183_v21, %v2723_v11  ;;  %v1775_v17 = vadd.f32 %v10155_v58, %v10188_v19  ;;  %v2726_v60 = vadd.f32 %v10171_v1, %v1774_v62  ;;  %v1773_v21 = vadd.f32 %v10188_v19, %v10157_v40 }
 0x505   : > { %5171 = vst.msk [vmem:[%s10211_s4] sm:$0xff] %vm11497_vm13, %v5155_v63  ;;  %v5158_v61 = vmax.f32 %v5142_v12, 0.0  ;;  %v5140_v44 = vadd.f32 %v5079_v46, %v4078_v50  ;;  %v4086_v4 = vadd.f32 %v10190_v56, %v2721_v27  ;;  %v2724_v63 = vadd.f32 %v10173_v18, %v1772_v31 }
 0x506   : > { %v5602_v6 = vpop.f32.mrf.mxu1  ;;  %v4091_v58 = vadd.f32 %v10192_v52, %v2726_v60  ;;  %v2727_v56 = vadd.f32 %v10175_v48, %v1775_v17  ;;  %v2725_v52 = vadd.f32 %v10177_v5, %v1773_v21 }
 0x507   : > { %5174 = vst.msk [vmem:[%s10211_s4 + $0x18] sm:$0xff] %vm11498_vm10, %v5158_v61  ;;  %v5156_v37 = vmax.f32 %v5140_v44, 0.0  ;;  %v5145_v29 = vadd.f32 %v5602_v6, %v4083_v59  ;;  %v4089_v46 = vadd.f32 %v10195_v43, %v2724_v63 }
 0x508   : > { %v5092_v42 = vpop.f32.mrf.mxu1  ;;  %v4092_v45 = vadd.f32 %v10198_v15, %v2727_v56  ;;  %v4090_v43 = vadd.f32 %v10202_v53, %v2725_v52 }
 0x509   : > { %5172 = vst.msk [vmem:[%s10211_s4 + $0x8] sm:$0xff] %vm11499_vm2, %v5156_v37  ;;  %v5161_v39 = vmax.f32 %v5145_v29, 0.0  ;;  %v5143_v0 = vadd.f32 %v5092_v42, %v4081_v35 }
 0x50a   : > { %v5603_v34 = vpop.f32.mrf.mxu1 }
 0x50b   : > { %5177 = vst.msk [vmem:[%s10211_s4 + $0x30] sm:$0xff] %vm11500_vm4, %v5161_v39  ;;  %v5159_v3 = vmax.f32 %v5143_v0, 0.0  ;;  %v5146_v23 = vadd.f32 %v5603_v34, %v4084_v24 }
 0x50c   : > { %v5095_v20 = vpop.f32.mrf.mxu1 }
 0x50d   : > { %5175 = vst.msk [vmem:[%s10211_s4 + $0x20] sm:$0xff] %vm11501_vm12, %v5159_v3  ;;  %v5162_v41 = vmax.f32 %v5146_v23, 0.0  ;;  %v5144_v57 = vadd.f32 %v5095_v20, %v4082_v36 }
 0x50e   : > { %v5606_v16 = vpop.f32.mrf.mxu1 }
 0x50f   : > { %5178 = vst.msk [vmem:[%s10211_s4 + $0x38] sm:$0xff] %vm11502_vm14, %v5162_v41  ;;  %v5160_v10 = vmax.f32 %v5144_v57, 0.0  ;;  %v5149_v47 = vadd.f32 %v5606_v16, %v4087_v30 }
 0x510   : > { %v5108_v13 = vpop.f32.mrf.mxu1 }
 0x511   : > { %5176 = vst.msk [vmem:[%s10211_s4 + $0x28] sm:$0xff] %vm11503_vm6, %v5160_v10  ;;  %v5165_v8 = vmax.f32 %v5149_v47, 0.0  ;;  %v5147_v25 = vadd.f32 %v5108_v13, %v4085_v22 }
 0x512   : > { %v5607_v32 = vpop.f32.mrf.mxu1 }
 0x513   : > { %5181 = vst.msk [vmem:[%s10211_s4 + $0x50] sm:$0xff] %vm11504_vm7, %v5165_v8  ;;  %v5163_v54 = vmax.f32 %v5147_v25, 0.0  ;;  %v5150_v26 = vadd.f32 %v5607_v32, %v4088_v14 }
 0x514   : > { %v5111_v50 = vpop.f32.mrf.mxu1 }
 0x515   : > { %5179 = vst.msk [vmem:[%s10211_s4 + $0x40] sm:$0xff] %vm11505_vm15, %v5163_v54  ;;  %v5166_v12 = vmax.f32 %v5150_v26, 0.0  ;;  %v5148_v1 = vadd.f32 %v5111_v50, %v4086_v4 }
 0x516   : > { %v5610_v28 = vpop.f32.mrf.mxu1 }
 0x517   : > { %5182 = vst.msk [vmem:[%s10211_s4 + $0x58] sm:$0xff] %vm11506_vm11, %v5166_v12  ;;  %v5164_v40 = vmax.f32 %v5148_v1, 0.0  ;;  %v5153_v18 = vadd.f32 %v5610_v28, %v4091_v58 }
 0x518   : > { %v5124_v19 = vpop.f32.mrf.mxu1 }
 0x519   : > { %5180 = vst.msk [vmem:[%s10211_s4 + $0x48] sm:$0xff] %vm11507_vm5, %v5164_v40  ;;  %v5169_v59 = vmax.f32 %v5153_v18, 0.0  ;;  %v5151_v61 = vadd.f32 %v5124_v19, %v4089_v46 }
 0x51a   : > { %v5611_v48 = vpop.f32.mrf.mxu1 }
 0x51b   : > { %5185 = vst.msk [vmem:[%s10211_s4 + $0x70] sm:$0xff] %vm11508_vm0, %v5169_v59  ;;  %v5167_v44 = vmax.f32 %v5151_v61, 0.0  ;;  %v5154_v51 = vadd.f32 %v5611_v48, %v4092_v45 }
 0x51c   : > { %v5127_v5 = vpop.f32.mrf.mxu1 }
 0x51d   : > { %5183 = vst.msk [vmem:[%s10211_s4 + $0x60] sm:$0xff] %vm11509_vm1, %v5167_v44  ;;  %v5170_v15 = vmax.f32 %v5154_v51, 0.0  ;;  %v5152_v6 = vadd.f32 %v5127_v5, %v4090_v43 }
 0x51f   : > { %5186 = vst.msk [vmem:[%s10211_s4 + $0x78] sm:$0xff] %vm11510_vm3, %v5170_v15  ;;  %v5168_v53 = vmax.f32 %v5152_v6, 0.0 }
 0x521   : > { %5184 = vst.msk [vmem:[%s10211_s4 + $0x68] sm:$0xff] %vm11511_vm8, %v5168_v53 }
 0x522   : > { %5788 = shalt.err (!%p5785_p6)
}
 0x523   : > { %s5789_s20 = scalar_lea.hbm %s10287_s13, 2048  ;;  %s5793_s26 = scalar_lea.hbm %s10353_s8, 8192 }
 0x524   : > { %p5790_p7 = scmp.ne.s32.totalorder %s10287_s13, %s5789_s20  ;;  %p5794_p11 = scmp.lt.s32.totalorder %s10287_s13, %s10353_s8 }
 0x525   : > { %p5795_p12 = scmp.lt.s32.totalorder %s5793_s26, %s5789_s20 }
 0x526   : > { %p5791_p9 = pnand %p5790_p7, %p5986_p3 }
 0x527   : > { %p5796_p13 = por %p5795_p12, %p5794_p11 }
 0x528   : > { %p5792_p10 = pneg %p5791_p9 }
 0x52a   : > { %p5797_p0 = pnand %p5796_p13, %p5792_p10 }
 0x52c   : > { %5800 = shalt.err (!%p5797_p0)
}
 0x52d   : > { %s5889_s3 = smov 128  }
 0x52e   : > { %5617 = dma.vmem_to_hbm [thread:$0]  (%p5986_p3), %s10280_s9, 2048, %s10287_s13, %s10293_s0, %s5889_s3, %s5889_s3, %s10956_s17  }
 0x52f PF: > { %p5623_p1 = scmp.ge.s32.totalorder %s5867_s12, 2  ;;  %s5219_s21 = sand.u32 1, %s5839_s27  }
 0x530   : > { %s5220_s24 = scalar_lea.sflag [#allocation3], %s5219_s21 }
 0x531   : > { %p5620_p2 = pnand %p5623_p1, %p5995_p8 }
 0x533   : > { %p5621_p4 = pneg %p5620_p2 }
 0x535   : > { %5834 = dma.done.wait (%p5621_p4), %s5220_s24, 2048  }
 0x536   : > { %5836 = vsyncadd (%p5621_p4), %s5220_s24, 4294965248  ;;  %s21_s12 = sadd.s32 1, %s5867_s12   ;;  %s11512_s27 = smov %s5843_s28 }
 0x537   : > { %p18_p5 = scmp.ge.s32.totalorder %s21_s12, 6   ;;  %s11513_s28 = smov %s5847_s29 }
 0x538   : > { %s11514_s29 = smov %s6004_s23  ;;  %s11515_s30 = smov %s5859_s10 }
 0x539   : > { %s11516_s9 = smov %s5863_s11  ;;  %s11517_s10 = smov %s11520_s15 }
 0x53a   : > { %s11518_s11 = smov %s11524_s16  ;;  %20 = sbr.rel (!%p18_p5) target bundleno = 11 (0xb), region = 88 }
 0x53f   :  { %5225 = vsyncpa [#allocation3], 1 }
 0x540   :  { %5227 = vsyncpa [#allocation3 + $0x1], 1 }

</bundles_post_ra>
